<compile_context>
chip_gen: v5e
topology: v5e:2x2
jax: 0.10.0
libtpu: 0.0.40
codegen_flags: <defaults>
</compile_context>

<pallas_src>
import functools

import jax
import jax.numpy as jnp
from jax.experimental import pallas as pl
from jax.experimental.pallas import tpu as pltpu


_VMEM_LIMIT_BYTES = 48 * 1024 * 1024  # > default scoped limit, < v7x physical


def _round_up(x, m):
    return (x + m - 1) // m * m


# ----------------------------------------------------------------------------
# Pallas GEMM kernels (bias + activation [+ fused gain multiply] epilogue)
# ----------------------------------------------------------------------------
def _apply_act(acc, act):
    if act == "relu":
        return jnp.maximum(acc, 0.0)
    if act == "sigmoid":
        return jax.nn.sigmoid(acc)
    if act == "silu":
        return acc * jax.nn.sigmoid(acc)
    return acc


def _gemm_kernel(a_ref, b_ref, bias_ref, o_ref, acc_ref, *, act):
    k = pl.program_id(2)

    @pl.when(k == 0)
    def _():
        acc_ref[...] = jnp.zeros_like(acc_ref)

    acc_ref[...] += jnp.dot(a_ref[...], b_ref[...],
                            preferred_element_type=jnp.float32)

    @pl.when(k == pl.num_programs(2) - 1)
    def _():
        acc = acc_ref[...] + bias_ref[...]
        o_ref[...] = _apply_act(acc, act).astype(o_ref.dtype)


def _gemm_mul_kernel(a_ref, b_ref, bias_ref, r_ref, o_ref, acc_ref, *, act):
    k = pl.program_id(2)

    @pl.when(k == 0)
    def _():
        acc_ref[...] = jnp.zeros_like(acc_ref)

    acc_ref[...] += jnp.dot(a_ref[...], b_ref[...],
                            preferred_element_type=jnp.float32)

    @pl.when(k == pl.num_programs(2) - 1)
    def _():
        acc = acc_ref[...] + bias_ref[...]
        out = _apply_act(acc, act) * r_ref[...].astype(jnp.float32)
        o_ref[...] = out.astype(o_ref.dtype)


def gemm_bias_act(a, b, bias, act="linear", residual=None,
                  out_dtype=jnp.bfloat16):
    """Computes act(a @ b + bias) (optionally * residual).

    a: (M, K), b: (K, N), bias: (N,), residual: (M, N) or None.
    Operands are cast to bf16 (f32 accumulation); M/N/K are padded to tile
    multiples (N up to a multiple of 128 for lane-dense stores) and the
    padding is sliced off before returning.
    """
    m, k = a.shape
    k2, n = b.shape
    assert k == k2

    # Tile selection.
    tm = 256 if m >= 256 else _round_up(m, 8)
    tn = 128                               # lane-dense output tile
    tk = 128 if k > 256 else k             # tile K only for large reductions
    mp = _round_up(m, tm)
    np_ = _round_up(n, tn)
    kp = _round_up(k, tk)

    a_p = a.astype(jnp.bfloat16)
    if (mp, kp) != (m, k):
        a_p = jnp.pad(a_p, ((0, mp - m), (0, kp - k)))
    b_p = b.astype(jnp.bfloat16)
    if (kp, np_) != (k, n):
        b_p = jnp.pad(b_p, ((0, kp - k), (0, np_ - n)))
    bias_p = bias.astype(jnp.float32).reshape(1, n)
    if np_ != n:
        bias_p = jnp.pad(bias_p, ((0, 0), (0, np_ - n)))

    in_specs = [
        pl.BlockSpec((tm, tk), lambda i, j, kk: (i, kk)),
        pl.BlockSpec((tk, tn), lambda i, j, kk: (kk, j)),
        pl.BlockSpec((1, tn), lambda i, j, kk: (0, j)),
    ]
    args = [a_p, b_p, bias_p]

    if residual is None:
        kernel = functools.partial(_gemm_kernel, act=act)
    else:
        r_p = residual.astype(jnp.bfloat16)
        rm, rn = residual.shape
        if (mp, np_) != (rm, rn):
            r_p = jnp.pad(r_p, ((0, mp - rm), (0, np_ - rn)))
        in_specs.append(pl.BlockSpec((tm, tn), lambda i, j, kk: (i, j)))
        args.append(r_p)
        kernel = functools.partial(_gemm_mul_kernel, act=act)

    out = pl.pallas_call(
        kernel,
        out_shape=jax.ShapeDtypeStruct((mp, np_), out_dtype),
        grid_spec=pltpu.PrefetchScalarGridSpec(
            num_scalar_prefetch=0,
            grid=(mp // tm, np_ // tn, kp // tk),
            in_specs=in_specs,
            out_specs=pl.BlockSpec((tm, tn), lambda i, j, kk: (i, j)),
            scratch_shapes=[pltpu.VMEM((tm, tn), jnp.float32)],
        ),
        compiler_params=pltpu.CompilerParams(
            dimension_semantics=("parallel", "parallel", "arbitrary"),
            vmem_limit_bytes=_VMEM_LIMIT_BYTES,
        ),
    )(*args)

    if (mp, np_) != (m, n):
        out = out[:m, :n]
    return out


# ----------------------------------------------------------------------------
# Conv = im2col (glue, 3x3 only) / reshape (1x1) + Pallas GEMM (hot path)
# ----------------------------------------------------------------------------
def _im2col(x, kh, kw, stride, pad):
    # TODO(synk): a halo-DMA direct-conv kernel would remove the kh*kw
    # activation blowup entirely; kept as plain-JAX glue here (bf16 activations
    # already halve its HBM bytes vs the previous f32 version).
    if pad:
        x = jnp.pad(x, ((0, 0), (pad, pad), (pad, pad), (0, 0)))
    n, h, w, c = x.shape
    ho = (h - kh) // stride + 1
    wo = (w - kw) // stride + 1
    cols = []
    for i in range(kh):
        for j in range(kw):
            cols.append(
                x[:, i:i + stride * ho:stride, j:j + stride * wo:stride, :])
    patches = jnp.concatenate(cols, axis=-1)  # (N, Ho, Wo, kh*kw*C)
    return patches.reshape(n * ho * wo, kh * kw * c), (n, ho, wo)


def conv2d(x, w, b, stride=1, pad=0, act="linear", residual=None,
           out_dtype=jnp.bfloat16):
    """x: (N,H,W,Cin) NHWC; w: (Cout,Cin,kh,kw) (PyTorch layout); b: (Cout,)."""
    cout, cin, kh, kw = w.shape
    if kh == 1 and kw == 1 and stride == 1 and pad == 0:
        # 1x1 conv: no im2col, straight reshape -> GEMM.
        n, h, wd, _ = x.shape
        a, (ho, wo) = x.reshape(n * h * wd, cin), (h, wd)
    else:
        a, (n, ho, wo) = _im2col(x, kh, kw, stride, pad)
    # Reorder weights to match im2col column ordering (kh, kw, Cin) -> Cout.
    w2 = jnp.transpose(w, (2, 3, 1, 0)).reshape(kh * kw * cin, cout)
    r = None
    if residual is not None:
        r = residual.reshape(n * ho * wo, cout)
    y = gemm_bias_act(a, w2, b, act=act, residual=r, out_dtype=out_dtype)
    return y.reshape(n, ho, wo, cout)


# ----------------------------------------------------------------------------
# Deterministic parameter initialization
# ----------------------------------------------------------------------------
def _conv_params(key, cout, cin, kh, kw):
    k1, k2 = jax.random.split(key)
    fan_in = cin * kh * kw
    w = jax.random.normal(k1, (cout, cin, kh, kw), jnp.float32) / jnp.sqrt(fan_in)
    b = 0.01 * jax.random.normal(k2, (cout,), jnp.float32)
    return w, b


def init_params(key):
    keys = jax.random.split(key, 10)
    nc = 4                   # number of classes (synthetic, small)
    no = 5 + nc              # 4 box + 1 obj + nc classes per location
    p = {
        # DENet (synthetic enhancement net)
        "de1": _conv_params(keys[0], 8, 3, 3, 3),
        "de2": _conv_params(keys[1], 8, 8, 3, 3),
        "de3": _conv_params(keys[2], 3, 8, 3, 3),
        # YOLOv6-style backbone
        "stem": _conv_params(keys[3], 16, 3, 3, 3),
        "c3": _conv_params(keys[4], 32, 16, 3, 3),
        "c4": _conv_params(keys[5], 64, 32, 3, 3),
        "c5": _conv_params(keys[6], 128, 64, 3, 3),
        # anchor-free 1x1 detection heads
        "h3": _conv_params(keys[7], no, 32, 1, 1),
        "h4": _conv_params(keys[8], no, 64, 1, 1),
        "h5": _conv_params(keys[9], no, 128, 1, 1),
    }
    return p, no


# ----------------------------------------------------------------------------
# Forward pass: x -> DENet(x) -> YOLOv6 -> (pred, feature_maps)
# ----------------------------------------------------------------------------
def denet(params, x_nhwc):
    # TODO(synk): init_DENet is not defined in the reference snippet; this is a
    # synthetic 3-conv enhancement net producing a sigmoid gain map.  The
    # gain * image multiply is fused into the final conv's GEMM epilogue.
    h = conv2d(x_nhwc, *params["de1"], stride=1, pad=1, act="relu")
    h = conv2d(h, *params["de2"], stride=1, pad=1, act="relu")
    return conv2d(h, *params["de3"], stride=1, pad=1, act="sigmoid",
                  residual=x_nhwc)


def yolov6(params, no, x_nhwc):
    # TODO(synk): init_Yolov6 is not defined in the reference snippet; this is
    # a synthetic YOLOv6-style backbone (strides 2/4/8) + anchor-free 1x1 heads.
    s = conv2d(x_nhwc, *params["stem"], stride=2, pad=1, act="silu")
    p3 = conv2d(s, *params["c3"], stride=2, pad=1, act="silu")
    p4 = conv2d(p3, *params["c4"], stride=2, pad=1, act="silu")
    p5 = conv2d(p4, *params["c5"], stride=2, pad=1, act="silu")
    preds = []
    # TODO(synk): the three tiny 1x1 heads (M<=128) are latency-bound and could
    # be fused into a single pallas_call; kept as separate GEMMs for clarity.
    for feat, name in ((p3, "h3"), (p4, "h4"), (p5, "h5")):
        y = conv2d(feat, *params[name], stride=1, pad=0, act="linear",
                   out_dtype=jnp.float32)
        n, hh, ww, c = y.shape
        preds.append(y.reshape(n, hh * ww, c))
    pred = jnp.concatenate(preds, axis=1)                # (N, total_anchors, no)
    feature_maps = [jnp.transpose(f, (0, 3, 1, 2)).astype(jnp.float32)
                    for f in (p3, p4, p5)]               # NCHW
    return pred, feature_maps


def deyolov6_forward(params, no, x_nchw):
    x = jnp.transpose(x_nchw, (0, 2, 3, 1)).astype(jnp.float32)  # NCHW -> NHWC
    x = denet(params, x)
    return yolov6(params, no, x)


if __name__ == "__main__":
    key = jax.random.PRNGKey(0)
    pkey, xkey = jax.random.split(key)
    params, no = init_params(pkey)

    # Small RGB image batch, PyTorch NCHW convention.
    x = jax.random.uniform(xkey, (2, 3, 32, 32), jnp.float32)

    fwd = jax.jit(deyolov6_forward, static_argnums=(1,))
    pred, feature_maps = fwd(params, no, x)
    pred = jax.block_until_ready(pred)
    feature_maps = [jax.block_until_ready(f) for f in feature_maps]

    assert pred.shape == (2, 8 * 8 + 4 * 4 + 2 * 2, no)
    assert feature_maps[0].shape == (2, 32, 8, 8)
    assert feature_maps[1].shape == (2, 64, 4, 4)
    assert feature_maps[2].shape == (2, 128, 2, 2)
    print("KERNEL_OK")
</pallas_src>

<mosaic_0001>
module attributes {stable_mosaic.version = 11 : i64} {
  func.func @_gemm_kernel(%arg0: i32, %arg1: i32, %arg2: i32, %arg3: memref<256x27xbf16, #tpu.memory_space<vmem>>, %arg4: memref<27x128xbf16, #tpu.memory_space<vmem>>, %arg5: memref<1x128xf32, #tpu.memory_space<vmem>>, %arg6: memref<256x128xbf16, #tpu.memory_space<vmem>>, %arg7: memref<256x128xf32, #tpu.memory_space<vmem>>) attributes {dimension_semantics = [#tpu.dimension_semantics<parallel>, #tpu.dimension_semantics<parallel>, #tpu.dimension_semantics<arbitrary>], iteration_bounds = array<i64: 8, 1, 1>, scalar_prefetch = 0 : i64, scratch_operands = 1 : i64, tpu.core_type = #tpu.core_type<tc>, window_params = [{transform_indices = @transform_0, window_bounds = array<i64: 256, 27>}, {transform_indices = @transform_1, window_bounds = array<i64: 27, 128>}, {transform_indices = @transform_2, window_bounds = array<i64: 1, 128>}, {transform_indices = @transform_3, window_bounds = array<i64: 256, 128>}]} {
    %c0_i32 = arith.constant 0 : i32
    %0 = arith.cmpi eq, %arg2, %c0_i32 : i32
    %1 = arith.extui %0 : i1 to i32
    %c0_i32_0 = arith.constant 0 : i32
    %2 = arith.cmpi ne, %1, %c0_i32_0 : i32
    scf.if %2 {
      %cst_10 = arith.constant 0.000000e+00 : f32
      %12 = vector.broadcast %cst_10 : f32 to vector<256x128xf32>
      %c0_11 = arith.constant 0 : index
      %c0_12 = arith.constant 0 : index
      %13 = vector.load %arg7[%c0_11, %c0_12] : memref<256x128xf32, #tpu.memory_space<vmem>>, vector<256x128xf32>
      tpu.vector_store %arg7[%c0_11, %c0_12], %12 {strides = array<i32>} : memref<256x128xf32, #tpu.memory_space<vmem>>, vector<256x128xf32>,
    } else {
    }
    %c0 = arith.constant 0 : index
    %c0_1 = arith.constant 0 : index
    %3 = vector.load %arg7[%c0, %c0_1] : memref<256x128xf32, #tpu.memory_space<vmem>>, vector<256x128xf32>
    %c0_2 = arith.constant 0 : index
    %c0_3 = arith.constant 0 : index
    %4 = vector.load %arg3[%c0_2, %c0_3] : memref<256x27xbf16, #tpu.memory_space<vmem>>, vector<256x27xbf16>
    %c0_4 = arith.constant 0 : index
    %c0_5 = arith.constant 0 : index
    %5 = vector.load %arg4[%c0_4, %c0_5] : memref<27x128xbf16, #tpu.memory_space<vmem>>, vector<27x128xbf16>
    %cst = arith.constant dense<0.000000e+00> : vector<256x128xf32>
    %6 = tpu.matmul %4, %5, %cst {dimension_numbers = #tpu.dot_dimension_numbers<[1], [0], [0], [1], [0, 0, 1, 1], [], []>} : vector<256x27xbf16>, vector<27x128xbf16>, vector<256x128xf32> -> vector<256x128xf32>
    %7 = arith.addf %3, %6 : vector<256x128xf32>
    %c0_6 = arith.constant 0 : index
    %c0_7 = arith.constant 0 : index
    %8 = vector.load %arg7[%c0_6, %c0_7] : memref<256x128xf32, #tpu.memory_space<vmem>>, vector<256x128xf32>
    tpu.vector_store %arg7[%c0_6, %c0_7], %7 {strides = array<i32>} : memref<256x128xf32, #tpu.memory_space<vmem>>, vector<256x128xf32>,
    %c0_i32_8 = arith.constant 0 : i32
    %9 = arith.cmpi eq, %arg2, %c0_i32_8 : i32
    %10 = arith.extui %9 : i1 to i32
    %c0_i32_9 = arith.constant 0 : i32
    %11 = arith.cmpi ne, %10, %c0_i32_9 : i32
    scf.if %11 {
      %c0_10 = arith.constant 0 : index
      %c0_11 = arith.constant 0 : index
      %12 = vector.load %arg7[%c0_10, %c0_11] : memref<256x128xf32, #tpu.memory_space<vmem>>, vector<256x128xf32>
      %c0_12 = arith.constant 0 : index
      %c0_13 = arith.constant 0 : index
      %13 = vector.load %arg5[%c0_12, %c0_13] : memref<1x128xf32, #tpu.memory_space<vmem>>, vector<1x128xf32>
      %14 = vector.broadcast %13 : vector<1x128xf32> to vector<256x128xf32>
      %15 = arith.addf %12, %14 : vector<256x128xf32>
      %cst_14 = arith.constant 0.000000e+00 : f32
      %16 = vector.broadcast %cst_14 : f32 to vector<256x128xf32>
      %17 = arith.maximumf %15, %16 : vector<256x128xf32>
      %18 = arith.truncf %17 : vector<256x128xf32> to vector<256x128xbf16>
      %c0_15 = arith.constant 0 : index
      %c0_16 = arith.constant 0 : index
      %19 = vector.load %arg6[%c0_15, %c0_16] : memref<256x128xbf16, #tpu.memory_space<vmem>>, vector<256x128xbf16>
      tpu.vector_store %arg6[%c0_15, %c0_16], %18 {strides = array<i32>} : memref<256x128xbf16, #tpu.memory_space<vmem>>, vector<256x128xbf16>,
    } else {
    }
    return
  }
  func.func @transform_0(%arg0: i32, %arg1: i32, %arg2: i32) -> (i32, i32) {
    %c0_i32 = arith.constant 0 : i32
    return %arg0, %arg2 : i32, i32
  }
  func.func @transform_1(%arg0: i32, %arg1: i32, %arg2: i32) -> (i32, i32) {
    %c0_i32 = arith.constant 0 : i32
    return %arg2, %arg1 : i32, i32
  }
  func.func @transform_2(%arg0: i32, %arg1: i32, %arg2: i32) -> (i32, i32) {
    %c0_i32 = arith.constant 0 : i32
    %c0_i32_0 = arith.constant 0 : i32
    return %c0_i32, %arg1 : i32, i32
  }
  func.func @transform_3(%arg0: i32, %arg1: i32, %arg2: i32) -> (i32, i32) {
    %c0_i32 = arith.constant 0 : i32
    return %arg0, %arg1 : i32, i32
  }
}

module attributes {stable_mosaic.version = 11 : i64} {
  func.func @_gemm_kernel(%arg0: i32, %arg1: i32, %arg2: i32, %arg3: memref<256x72xbf16, #tpu.memory_space<vmem>>, %arg4: memref<72x128xbf16, #tpu.memory_space<vmem>>, %arg5: memref<1x128xf32, #tpu.memory_space<vmem>>, %arg6: memref<256x128xbf16, #tpu.memory_space<vmem>>, %arg7: memref<256x128xf32, #tpu.memory_space<vmem>>) attributes {dimension_semantics = [#tpu.dimension_semantics<parallel>, #tpu.dimension_semantics<parallel>, #tpu.dimension_semantics<arbitrary>], iteration_bounds = array<i64: 8, 1, 1>, scalar_prefetch = 0 : i64, scratch_operands = 1 : i64, tpu.core_type = #tpu.core_type<tc>, window_params = [{transform_indices = @transform_0, window_bounds = array<i64: 256, 72>}, {transform_indices = @transform_1, window_bounds = array<i64: 72, 128>}, {transform_indices = @transform_2, window_bounds = array<i64: 1, 128>}, {transform_indices = @transform_3, window_bounds = array<i64: 256, 128>}]} {
    %c0_i32 = arith.constant 0 : i32
    %0 = arith.cmpi eq, %arg2, %c0_i32 : i32
    %1 = arith.extui %0 : i1 to i32
    %c0_i32_0 = arith.constant 0 : i32
    %2 = arith.cmpi ne, %1, %c0_i32_0 : i32
    scf.if %2 {
      %cst_10 = arith.constant 0.000000e+00 : f32
      %12 = vector.broadcast %cst_10 : f32 to vector<256x128xf32>
      %c0_11 = arith.constant 0 : index
      %c0_12 = arith.constant 0 : index
      %13 = vector.load %arg7[%c0_11, %c0_12] : memref<256x128xf32, #tpu.memory_space<vmem>>, vector<256x128xf32>
      tpu.vector_store %arg7[%c0_11, %c0_12], %12 {strides = array<i32>} : memref<256x128xf32, #tpu.memory_space<vmem>>, vector<256x128xf32>,
    } else {
    }
    %c0 = arith.constant 0 : index
    %c0_1 = arith.constant 0 : index
    %3 = vector.load %arg7[%c0, %c0_1] : memref<256x128xf32, #tpu.memory_space<vmem>>, vector<256x128xf32>
    %c0_2 = arith.constant 0 : index
    %c0_3 = arith.constant 0 : index
    %4 = vector.load %arg3[%c0_2, %c0_3] : memref<256x72xbf16, #tpu.memory_space<vmem>>, vector<256x72xbf16>
    %c0_4 = arith.constant 0 : index
    %c0_5 = arith.constant 0 : index
    %5 = vector.load %arg4[%c0_4, %c0_5] : memref<72x128xbf16, #tpu.memory_space<vmem>>, vector<72x128xbf16>
    %cst = arith.constant dense<0.000000e+00> : vector<256x128xf32>
    %6 = tpu.matmul %4, %5, %cst {dimension_numbers = #tpu.dot_dimension_numbers<[1], [0], [0], [1], [0, 0, 1, 1], [], []>} : vector<256x72xbf16>, vector<72x128xbf16>, vector<256x128xf32> -> vector<256x128xf32>
    %7 = arith.addf %3, %6 : vector<256x128xf32>
    %c0_6 = arith.constant 0 : index
    %c0_7 = arith.constant 0 : index
    %8 = vector.load %arg7[%c0_6, %c0_7] : memref<256x128xf32, #tpu.memory_space<vmem>>, vector<256x128xf32>
    tpu.vector_store %arg7[%c0_6, %c0_7], %7 {strides = array<i32>} : memref<256x128xf32, #tpu.memory_space<vmem>>, vector<256x128xf32>,
    %c0_i32_8 = arith.constant 0 : i32
    %9 = arith.cmpi eq, %arg2, %c0_i32_8 : i32
    %10 = arith.extui %9 : i1 to i32
    %c0_i32_9 = arith.constant 0 : i32
    %11 = arith.cmpi ne, %10, %c0_i32_9 : i32
    scf.if %11 {
      %c0_10 = arith.constant 0 : index
      %c0_11 = arith.constant 0 : index
      %12 = vector.load %arg7[%c0_10, %c0_11] : memref<256x128xf32, #tpu.memory_space<vmem>>, vector<256x128xf32>
      %c0_12 = arith.constant 0 : index
      %c0_13 = arith.constant 0 : index
      %13 = vector.load %arg5[%c0_12, %c0_13] : memref<1x128xf32, #tpu.memory_space<vmem>>, vector<1x128xf32>
      %14 = vector.broadcast %13 : vector<1x128xf32> to vector<256x128xf32>
      %15 = arith.addf %12, %14 : vector<256x128xf32>
      %cst_14 = arith.constant 0.000000e+00 : f32
      %16 = vector.broadcast %cst_14 : f32 to vector<256x128xf32>
      %17 = arith.maximumf %15, %16 : vector<256x128xf32>
      %18 = arith.truncf %17 : vector<256x128xf32> to vector<256x128xbf16>
      %c0_15 = arith.constant 0 : index
      %c0_16 = arith.constant 0 : index
      %19 = vector.load %arg6[%c0_15, %c0_16] : memref<256x128xbf16, #tpu.memory_space<vmem>>, vector<256x128xbf16>
      tpu.vector_store %arg6[%c0_15, %c0_16], %18 {strides = array<i32>} : memref<256x128xbf16, #tpu.memory_space<vmem>>, vector<256x128xbf16>,
    } else {
    }
    return
  }
  func.func @transform_0(%arg0: i32, %arg1: i32, %arg2: i32) -> (i32, i32) {
    %c0_i32 = arith.constant 0 : i32
    return %arg0, %arg2 : i32, i32
  }
  func.func @transform_1(%arg0: i32, %arg1: i32, %arg2: i32) -> (i32, i32) {
    %c0_i32 = arith.constant 0 : i32
    return %arg2, %arg1 : i32, i32
  }
  func.func @transform_2(%arg0: i32, %arg1: i32, %arg2: i32) -> (i32, i32) {
    %c0_i32 = arith.constant 0 : i32
    %c0_i32_0 = arith.constant 0 : i32
    return %c0_i32, %arg1 : i32, i32
  }
  func.func @transform_3(%arg0: i32, %arg1: i32, %arg2: i32) -> (i32, i32) {
    %c0_i32 = arith.constant 0 : i32
    return %arg0, %arg1 : i32, i32
  }
}

module attributes {stable_mosaic.version = 11 : i64} {
  func.func @_gemm_mul_kernel(%arg0: i32, %arg1: i32, %arg2: i32, %arg3: memref<256x72xbf16, #tpu.memory_space<vmem>>, %arg4: memref<72x128xbf16, #tpu.memory_space<vmem>>, %arg5: memref<1x128xf32, #tpu.memory_space<vmem>>, %arg6: memref<256x128xbf16, #tpu.memory_space<vmem>>, %arg7: memref<256x128xbf16, #tpu.memory_space<vmem>>, %arg8: memref<256x128xf32, #tpu.memory_space<vmem>>) attributes {dimension_semantics = [#tpu.dimension_semantics<parallel>, #tpu.dimension_semantics<parallel>, #tpu.dimension_semantics<arbitrary>], iteration_bounds = array<i64: 8, 1, 1>, scalar_prefetch = 0 : i64, scratch_operands = 1 : i64, tpu.core_type = #tpu.core_type<tc>, window_params = [{transform_indices = @transform_0, window_bounds = array<i64: 256, 72>}, {transform_indices = @transform_1, window_bounds = array<i64: 72, 128>}, {transform_indices = @transform_2, window_bounds = array<i64: 1, 128>}, {transform_indices = @transform_3, window_bounds = array<i64: 256, 128>}, {transform_indices = @transform_4, window_bounds = array<i64: 256, 128>}]} {
    %c0_i32 = arith.constant 0 : i32
    %0 = arith.cmpi eq, %arg2, %c0_i32 : i32
    %1 = arith.extui %0 : i1 to i32
    %c0_i32_0 = arith.constant 0 : i32
    %2 = arith.cmpi ne, %1, %c0_i32_0 : i32
    scf.if %2 {
      %cst_10 = arith.constant 0.000000e+00 : f32
      %12 = vector.broadcast %cst_10 : f32 to vector<256x128xf32>
      %c0_11 = arith.constant 0 : index
      %c0_12 = arith.constant 0 : index
      %13 = vector.load %arg8[%c0_11, %c0_12] : memref<256x128xf32, #tpu.memory_space<vmem>>, vector<256x128xf32>
      tpu.vector_store %arg8[%c0_11, %c0_12], %12 {strides = array<i32>} : memref<256x128xf32, #tpu.memory_space<vmem>>, vector<256x128xf32>,
    } else {
    }
    %c0 = arith.constant 0 : index
    %c0_1 = arith.constant 0 : index
    %3 = vector.load %arg8[%c0, %c0_1] : memref<256x128xf32, #tpu.memory_space<vmem>>, vector<256x128xf32>
    %c0_2 = arith.constant 0 : index
    %c0_3 = arith.constant 0 : index
    %4 = vector.load %arg3[%c0_2, %c0_3] : memref<256x72xbf16, #tpu.memory_space<vmem>>, vector<256x72xbf16>
    %c0_4 = arith.constant 0 : index
    %c0_5 = arith.constant 0 : index
    %5 = vector.load %arg4[%c0_4, %c0_5] : memref<72x128xbf16, #tpu.memory_space<vmem>>, vector<72x128xbf16>
    %cst = arith.constant dense<0.000000e+00> : vector<256x128xf32>
    %6 = tpu.matmul %4, %5, %cst {dimension_numbers = #tpu.dot_dimension_numbers<[1], [0], [0], [1], [0, 0, 1, 1], [], []>} : vector<256x72xbf16>, vector<72x128xbf16>, vector<256x128xf32> -> vector<256x128xf32>
    %7 = arith.addf %3, %6 : vector<256x128xf32>
    %c0_6 = arith.constant 0 : index
    %c0_7 = arith.constant 0 : index
    %8 = vector.load %arg8[%c0_6, %c0_7] : memref<256x128xf32, #tpu.memory_space<vmem>>, vector<256x128xf32>
    tpu.vector_store %arg8[%c0_6, %c0_7], %7 {strides = array<i32>} : memref<256x128xf32, #tpu.memory_space<vmem>>, vector<256x128xf32>,
    %c0_i32_8 = arith.constant 0 : i32
    %9 = arith.cmpi eq, %arg2, %c0_i32_8 : i32
    %10 = arith.extui %9 : i1 to i32
    %c0_i32_9 = arith.constant 0 : i32
    %11 = arith.cmpi ne, %10, %c0_i32_9 : i32
    scf.if %11 {
      %c0_10 = arith.constant 0 : index
      %c0_11 = arith.constant 0 : index
      %12 = vector.load %arg8[%c0_10, %c0_11] : memref<256x128xf32, #tpu.memory_space<vmem>>, vector<256x128xf32>
      %c0_12 = arith.constant 0 : index
      %c0_13 = arith.constant 0 : index
      %13 = vector.load %arg5[%c0_12, %c0_13] : memref<1x128xf32, #tpu.memory_space<vmem>>, vector<1x128xf32>
      %14 = vector.broadcast %13 : vector<1x128xf32> to vector<256x128xf32>
      %15 = arith.addf %12, %14 : vector<256x128xf32>
      %16 = arith.negf %15 : vector<256x128xf32>
      %17 = math.exp %16 : vector<256x128xf32>
      %cst_14 = arith.constant 1.000000e+00 : f32
      %18 = vector.broadcast %cst_14 : f32 to vector<256x128xf32>
      %19 = arith.addf %18, %17 : vector<256x128xf32>
      %20 = arith.divf %18, %19 : vector<256x128xf32>
      %c0_15 = arith.constant 0 : index
      %c0_16 = arith.constant 0 : index
      %21 = vector.load %arg6[%c0_15, %c0_16] : memref<256x128xbf16, #tpu.memory_space<vmem>>, vector<256x128xbf16>
      %22 = arith.extf %21 : vector<256x128xbf16> to vector<256x128xf32>
      %23 = arith.mulf %20, %22 : vector<256x128xf32>
      %24 = arith.truncf %23 : vector<256x128xf32> to vector<256x128xbf16>
      %c0_17 = arith.constant 0 : index
      %c0_18 = arith.constant 0 : index
      %25 = vector.load %arg7[%c0_17, %c0_18] : memref<256x128xbf16, #tpu.memory_space<vmem>>, vector<256x128xbf16>
      tpu.vector_store %arg7[%c0_17, %c0_18], %24 {strides = array<i32>} : memref<256x128xbf16, #tpu.memory_space<vmem>>, vector<256x128xbf16>,
    } else {
    }
    return
  }
  func.func @transform_0(%arg0: i32, %arg1: i32, %arg2: i32) -> (i32, i32) {
    %c0_i32 = arith.constant 0 : i32
    return %arg0, %arg2 : i32, i32
  }
  func.func @transform_1(%arg0: i32, %arg1: i32, %arg2: i32) -> (i32, i32) {
    %c0_i32 = arith.constant 0 : i32
    return %arg2, %arg1 : i32, i32
  }
  func.func @transform_2(%arg0: i32, %arg1: i32, %arg2: i32) -> (i32, i32) {
    %c0_i32 = arith.constant 0 : i32
    %c0_i32_0 = arith.constant 0 : i32
    return %c0_i32, %arg1 : i32, i32
  }
  func.func @transform_3(%arg0: i32, %arg1: i32, %arg2: i32) -> (i32, i32) {
    %c0_i32 = arith.constant 0 : i32
    return %arg0, %arg1 : i32, i32
  }
  func.func @transform_4(%arg0: i32, %arg1: i32, %arg2: i32) -> (i32, i32) {
    %c0_i32 = arith.constant 0 : i32
    return %arg0, %arg1 : i32, i32
  }
}

module attributes {stable_mosaic.version = 11 : i64} {
  func.func @_gemm_kernel(%arg0: i32, %arg1: i32, %arg2: i32, %arg3: memref<256x27xbf16, #tpu.memory_space<vmem>>, %arg4: memref<27x128xbf16, #tpu.memory_space<vmem>>, %arg5: memref<1x128xf32, #tpu.memory_space<vmem>>, %arg6: memref<256x128xbf16, #tpu.memory_space<vmem>>, %arg7: memref<256x128xf32, #tpu.memory_space<vmem>>) attributes {dimension_semantics = [#tpu.dimension_semantics<parallel>, #tpu.dimension_semantics<parallel>, #tpu.dimension_semantics<arbitrary>], iteration_bounds = array<i64: 2, 1, 1>, scalar_prefetch = 0 : i64, scratch_operands = 1 : i64, tpu.core_type = #tpu.core_type<tc>, window_params = [{transform_indices = @transform_0, window_bounds = array<i64: 256, 27>}, {transform_indices = @transform_1, window_bounds = array<i64: 27, 128>}, {transform_indices = @transform_2, window_bounds = array<i64: 1, 128>}, {transform_indices = @transform_3, window_bounds = array<i64: 256, 128>}]} {
    %c0_i32 = arith.constant 0 : i32
    %0 = arith.cmpi eq, %arg2, %c0_i32 : i32
    %1 = arith.extui %0 : i1 to i32
    %c0_i32_0 = arith.constant 0 : i32
    %2 = arith.cmpi ne, %1, %c0_i32_0 : i32
    scf.if %2 {
      %cst_10 = arith.constant 0.000000e+00 : f32
      %12 = vector.broadcast %cst_10 : f32 to vector<256x128xf32>
      %c0_11 = arith.constant 0 : index
      %c0_12 = arith.constant 0 : index
      %13 = vector.load %arg7[%c0_11, %c0_12] : memref<256x128xf32, #tpu.memory_space<vmem>>, vector<256x128xf32>
      tpu.vector_store %arg7[%c0_11, %c0_12], %12 {strides = array<i32>} : memref<256x128xf32, #tpu.memory_space<vmem>>, vector<256x128xf32>,
    } else {
    }
    %c0 = arith.constant 0 : index
    %c0_1 = arith.constant 0 : index
    %3 = vector.load %arg7[%c0, %c0_1] : memref<256x128xf32, #tpu.memory_space<vmem>>, vector<256x128xf32>
    %c0_2 = arith.constant 0 : index
    %c0_3 = arith.constant 0 : index
    %4 = vector.load %arg3[%c0_2, %c0_3] : memref<256x27xbf16, #tpu.memory_space<vmem>>, vector<256x27xbf16>
    %c0_4 = arith.constant 0 : index
    %c0_5 = arith.constant 0 : index
    %5 = vector.load %arg4[%c0_4, %c0_5] : memref<27x128xbf16, #tpu.memory_space<vmem>>, vector<27x128xbf16>
    %cst = arith.constant dense<0.000000e+00> : vector<256x128xf32>
    %6 = tpu.matmul %4, %5, %cst {dimension_numbers = #tpu.dot_dimension_numbers<[1], [0], [0], [1], [0, 0, 1, 1], [], []>} : vector<256x27xbf16>, vector<27x128xbf16>, vector<256x128xf32> -> vector<256x128xf32>
    %7 = arith.addf %3, %6 : vector<256x128xf32>
    %c0_6 = arith.constant 0 : index
    %c0_7 = arith.constant 0 : index
    %8 = vector.load %arg7[%c0_6, %c0_7] : memref<256x128xf32, #tpu.memory_space<vmem>>, vector<256x128xf32>
    tpu.vector_store %arg7[%c0_6, %c0_7], %7 {strides = array<i32>} : memref<256x128xf32, #tpu.memory_space<vmem>>, vector<256x128xf32>,
    %c0_i32_8 = arith.constant 0 : i32
    %9 = arith.cmpi eq, %arg2, %c0_i32_8 : i32
    %10 = arith.extui %9 : i1 to i32
    %c0_i32_9 = arith.constant 0 : i32
    %11 = arith.cmpi ne, %10, %c0_i32_9 : i32
    scf.if %11 {
      %c0_10 = arith.constant 0 : index
      %c0_11 = arith.constant 0 : index
      %12 = vector.load %arg7[%c0_10, %c0_11] : memref<256x128xf32, #tpu.memory_space<vmem>>, vector<256x128xf32>
      %c0_12 = arith.constant 0 : index
      %c0_13 = arith.constant 0 : index
      %13 = vector.load %arg5[%c0_12, %c0_13] : memref<1x128xf32, #tpu.memory_space<vmem>>, vector<1x128xf32>
      %14 = vector.broadcast %13 : vector<1x128xf32> to vector<256x128xf32>
      %15 = arith.addf %12, %14 : vector<256x128xf32>
      %16 = arith.negf %15 : vector<256x128xf32>
      %17 = math.exp %16 : vector<256x128xf32>
      %cst_14 = arith.constant 1.000000e+00 : f32
      %18 = vector.broadcast %cst_14 : f32 to vector<256x128xf32>
      %19 = arith.addf %18, %17 : vector<256x128xf32>
      %20 = arith.divf %18, %19 : vector<256x128xf32>
      %21 = arith.mulf %15, %20 : vector<256x128xf32>
      %22 = arith.truncf %21 : vector<256x128xf32> to vector<256x128xbf16>
      %c0_15 = arith.constant 0 : index
      %c0_16 = arith.constant 0 : index
      %23 = vector.load %arg6[%c0_15, %c0_16] : memref<256x128xbf16, #tpu.memory_space<vmem>>, vector<256x128xbf16>
      tpu.vector_store %arg6[%c0_15, %c0_16], %22 {strides = array<i32>} : memref<256x128xbf16, #tpu.memory_space<vmem>>, vector<256x128xbf16>,
    } else {
    }
    return
  }
  func.func @transform_0(%arg0: i32, %arg1: i32, %arg2: i32) -> (i32, i32) {
    %c0_i32 = arith.constant 0 : i32
    return %arg0, %arg2 : i32, i32
  }
  func.func @transform_1(%arg0: i32, %arg1: i32, %arg2: i32) -> (i32, i32) {
    %c0_i32 = arith.constant 0 : i32
    return %arg2, %arg1 : i32, i32
  }
  func.func @transform_2(%arg0: i32, %arg1: i32, %arg2: i32) -> (i32, i32) {
    %c0_i32 = arith.constant 0 : i32
    %c0_i32_0 = arith.constant 0 : i32
    return %c0_i32, %arg1 : i32, i32
  }
  func.func @transform_3(%arg0: i32, %arg1: i32, %arg2: i32) -> (i32, i32) {
    %c0_i32 = arith.constant 0 : i32
    return %arg0, %arg1 : i32, i32
  }
}

module attributes {stable_mosaic.version = 11 : i64} {
  func.func @_gemm_kernel(%arg0: i32, %arg1: i32, %arg2: i32, %arg3: memref<128x144xbf16, #tpu.memory_space<vmem>>, %arg4: memref<144x128xbf16, #tpu.memory_space<vmem>>, %arg5: memref<1x128xf32, #tpu.memory_space<vmem>>, %arg6: memref<128x128xbf16, #tpu.memory_space<vmem>>, %arg7: memref<128x128xf32, #tpu.memory_space<vmem>>) attributes {dimension_semantics = [#tpu.dimension_semantics<parallel>, #tpu.dimension_semantics<parallel>, #tpu.dimension_semantics<arbitrary>], iteration_bounds = array<i64: 1, 1, 1>, scalar_prefetch = 0 : i64, scratch_operands = 1 : i64, tpu.core_type = #tpu.core_type<tc>, window_params = [{transform_indices = @transform_0, window_bounds = array<i64: 128, 144>}, {transform_indices = @transform_1, window_bounds = array<i64: 144, 128>}, {transform_indices = @transform_2, window_bounds = array<i64: 1, 128>}, {transform_indices = @transform_3, window_bounds = array<i64: 128, 128>}]} {
    %c0_i32 = arith.constant 0 : i32
    %0 = arith.cmpi eq, %arg2, %c0_i32 : i32
    %1 = arith.extui %0 : i1 to i32
    %c0_i32_0 = arith.constant 0 : i32
    %2 = arith.cmpi ne, %1, %c0_i32_0 : i32
    scf.if %2 {
      %cst_10 = arith.constant 0.000000e+00 : f32
      %12 = vector.broadcast %cst_10 : f32 to vector<128x128xf32>
      %c0_11 = arith.constant 0 : index
      %c0_12 = arith.constant 0 : index
      %13 = vector.load %arg7[%c0_11, %c0_12] : memref<128x128xf32, #tpu.memory_space<vmem>>, vector<128x128xf32>
      tpu.vector_store %arg7[%c0_11, %c0_12], %12 {strides = array<i32>} : memref<128x128xf32, #tpu.memory_space<vmem>>, vector<128x128xf32>,
    } else {
    }
    %c0 = arith.constant 0 : index
    %c0_1 = arith.constant 0 : index
    %3 = vector.load %arg7[%c0, %c0_1] : memref<128x128xf32, #tpu.memory_space<vmem>>, vector<128x128xf32>
    %c0_2 = arith.constant 0 : index
    %c0_3 = arith.constant 0 : index
    %4 = vector.load %arg3[%c0_2, %c0_3] : memref<128x144xbf16, #tpu.memory_space<vmem>>, vector<128x144xbf16>
    %c0_4 = arith.constant 0 : index
    %c0_5 = arith.constant 0 : index
    %5 = vector.load %arg4[%c0_4, %c0_5] : memref<144x128xbf16, #tpu.memory_space<vmem>>, vector<144x128xbf16>
    %cst = arith.constant dense<0.000000e+00> : vector<128x128xf32>
    %6 = tpu.matmul %4, %5, %cst {dimension_numbers = #tpu.dot_dimension_numbers<[1], [0], [0], [1], [0, 0, 1, 1], [], []>} : vector<128x144xbf16>, vector<144x128xbf16>, vector<128x128xf32> -> vector<128x128xf32>
    %7 = arith.addf %3, %6 : vector<128x128xf32>
    %c0_6 = arith.constant 0 : index
    %c0_7 = arith.constant 0 : index
    %8 = vector.load %arg7[%c0_6, %c0_7] : memref<128x128xf32, #tpu.memory_space<vmem>>, vector<128x128xf32>
    tpu.vector_store %arg7[%c0_6, %c0_7], %7 {strides = array<i32>} : memref<128x128xf32, #tpu.memory_space<vmem>>, vector<128x128xf32>,
    %c0_i32_8 = arith.constant 0 : i32
    %9 = arith.cmpi eq, %arg2, %c0_i32_8 : i32
    %10 = arith.extui %9 : i1 to i32
    %c0_i32_9 = arith.constant 0 : i32
    %11 = arith.cmpi ne, %10, %c0_i32_9 : i32
    scf.if %11 {
      %c0_10 = arith.constant 0 : index
      %c0_11 = arith.constant 0 : index
      %12 = vector.load %arg7[%c0_10, %c0_11] : memref<128x128xf32, #tpu.memory_space<vmem>>, vector<128x128xf32>
      %c0_12 = arith.constant 0 : index
      %c0_13 = arith.constant 0 : index
      %13 = vector.load %arg5[%c0_12, %c0_13] : memref<1x128xf32, #tpu.memory_space<vmem>>, vector<1x128xf32>
      %14 = vector.broadcast %13 : vector<1x128xf32> to vector<128x128xf32>
      %15 = arith.addf %12, %14 : vector<128x128xf32>
      %16 = arith.negf %15 : vector<128x128xf32>
      %17 = math.exp %16 : vector<128x128xf32>
      %cst_14 = arith.constant 1.000000e+00 : f32
      %18 = vector.broadcast %cst_14 : f32 to vector<128x128xf32>
      %19 = arith.addf %18, %17 : vector<128x128xf32>
      %20 = arith.divf %18, %19 : vector<128x128xf32>
      %21 = arith.mulf %15, %20 : vector<128x128xf32>
      %22 = arith.truncf %21 : vector<128x128xf32> to vector<128x128xbf16>
      %c0_15 = arith.constant 0 : index
      %c0_16 = arith.constant 0 : index
      %23 = vector.load %arg6[%c0_15, %c0_16] : memref<128x128xbf16, #tpu.memory_space<vmem>>, vector<128x128xbf16>
      tpu.vector_store %arg6[%c0_15, %c0_16], %22 {strides = array<i32>} : memref<128x128xbf16, #tpu.memory_space<vmem>>, vector<128x128xbf16>,
    } else {
    }
    return
  }
  func.func @transform_0(%arg0: i32, %arg1: i32, %arg2: i32) -> (i32, i32) {
    %c0_i32 = arith.constant 0 : i32
    return %arg0, %arg2 : i32, i32
  }
  func.func @transform_1(%arg0: i32, %arg1: i32, %arg2: i32) -> (i32, i32) {
    %c0_i32 = arith.constant 0 : i32
    return %arg2, %arg1 : i32, i32
  }
  func.func @transform_2(%arg0: i32, %arg1: i32, %arg2: i32) -> (i32, i32) {
    %c0_i32 = arith.constant 0 : i32
    %c0_i32_0 = arith.constant 0 : i32
    return %c0_i32, %arg1 : i32, i32
  }
  func.func @transform_3(%arg0: i32, %arg1: i32, %arg2: i32) -> (i32, i32) {
    %c0_i32 = arith.constant 0 : i32
    return %arg0, %arg1 : i32, i32
  }
}

module attributes {stable_mosaic.version = 11 : i64} {
  func.func @_gemm_kernel(%arg0: i32, %arg1: i32, %arg2: i32, %arg3: memref<32x128xbf16, #tpu.memory_space<vmem>>, %arg4: memref<128x128xbf16, #tpu.memory_space<vmem>>, %arg5: memref<1x128xf32, #tpu.memory_space<vmem>>, %arg6: memref<32x128xbf16, #tpu.memory_space<vmem>>, %arg7: memref<32x128xf32, #tpu.memory_space<vmem>>) attributes {dimension_semantics = [#tpu.dimension_semantics<parallel>, #tpu.dimension_semantics<parallel>, #tpu.dimension_semantics<arbitrary>], iteration_bounds = array<i64: 1, 1, 3>, scalar_prefetch = 0 : i64, scratch_operands = 1 : i64, tpu.core_type = #tpu.core_type<tc>, window_params = [{transform_indices = @transform_0, window_bounds = array<i64: 32, 128>}, {transform_indices = @transform_1, window_bounds = array<i64: 128, 128>}, {transform_indices = @transform_2, window_bounds = array<i64: 1, 128>}, {transform_indices = @transform_3, window_bounds = array<i64: 32, 128>}]} {
    %c0_i32 = arith.constant 0 : i32
    %0 = arith.cmpi eq, %arg2, %c0_i32 : i32
    %1 = arith.extui %0 : i1 to i32
    %c0_i32_0 = arith.constant 0 : i32
    %2 = arith.cmpi ne, %1, %c0_i32_0 : i32
    scf.if %2 {
      %cst_9 = arith.constant 0.000000e+00 : f32
      %12 = vector.broadcast %cst_9 : f32 to vector<32x128xf32>
      %c0_10 = arith.constant 0 : index
      %c0_11 = arith.constant 0 : index
      %13 = vector.load %arg7[%c0_10, %c0_11] : memref<32x128xf32, #tpu.memory_space<vmem>>, vector<32x128xf32>
      tpu.vector_store %arg7[%c0_10, %c0_11], %12 {strides = array<i32>} : memref<32x128xf32, #tpu.memory_space<vmem>>, vector<32x128xf32>,
    } else {
    }
    %c0 = arith.constant 0 : index
    %c0_1 = arith.constant 0 : index
    %3 = vector.load %arg7[%c0, %c0_1] : memref<32x128xf32, #tpu.memory_space<vmem>>, vector<32x128xf32>
    %c0_2 = arith.constant 0 : index
    %c0_3 = arith.constant 0 : index
    %4 = vector.load %arg3[%c0_2, %c0_3] : memref<32x128xbf16, #tpu.memory_space<vmem>>, vector<32x128xbf16>
    %c0_4 = arith.constant 0 : index
    %c0_5 = arith.constant 0 : index
    %5 = vector.load %arg4[%c0_4, %c0_5] : memref<128x128xbf16, #tpu.memory_space<vmem>>, vector<128x128xbf16>
    %cst = arith.constant dense<0.000000e+00> : vector<32x128xf32>
    %6 = tpu.matmul %4, %5, %cst {dimension_numbers = #tpu.dot_dimension_numbers<[1], [0], [0], [1], [0, 0, 1, 1], [], []>} : vector<32x128xbf16>, vector<128x128xbf16>, vector<32x128xf32> -> vector<32x128xf32>
    %7 = arith.addf %3, %6 : vector<32x128xf32>
    %c0_6 = arith.constant 0 : index
    %c0_7 = arith.constant 0 : index
    %8 = vector.load %arg7[%c0_6, %c0_7] : memref<32x128xf32, #tpu.memory_space<vmem>>, vector<32x128xf32>
    tpu.vector_store %arg7[%c0_6, %c0_7], %7 {strides = array<i32>} : memref<32x128xf32, #tpu.memory_space<vmem>>, vector<32x128xf32>,
    %c2_i32 = arith.constant 2 : i32
    %9 = arith.cmpi eq, %arg2, %c2_i32 : i32
    %10 = arith.extui %9 : i1 to i32
    %c0_i32_8 = arith.constant 0 : i32
    %11 = arith.cmpi ne, %10, %c0_i32_8 : i32
    scf.if %11 {
      %c0_9 = arith.constant 0 : index
      %c0_10 = arith.constant 0 : index
      %12 = vector.load %arg7[%c0_9, %c0_10] : memref<32x128xf32, #tpu.memory_space<vmem>>, vector<32x128xf32>
      %c0_11 = arith.constant 0 : index
      %c0_12 = arith.constant 0 : index
      %13 = vector.load %arg5[%c0_11, %c0_12] : memref<1x128xf32, #tpu.memory_space<vmem>>, vector<1x128xf32>
      %14 = vector.broadcast %13 : vector<1x128xf32> to vector<32x128xf32>
      %15 = arith.addf %12, %14 : vector<32x128xf32>
      %16 = arith.negf %15 : vector<32x128xf32>
      %17 = math.exp %16 : vector<32x128xf32>
      %cst_13 = arith.constant 1.000000e+00 : f32
      %18 = vector.broadcast %cst_13 : f32 to vector<32x128xf32>
      %19 = arith.addf %18, %17 : vector<32x128xf32>
      %20 = arith.divf %18, %19 : vector<32x128xf32>
      %21 = arith.mulf %15, %20 : vector<32x128xf32>
      %22 = arith.truncf %21 : vector<32x128xf32> to vector<32x128xbf16>
      %c0_14 = arith.constant 0 : index
      %c0_15 = arith.constant 0 : index
      %23 = vector.load %arg6[%c0_14, %c0_15] : memref<32x128xbf16, #tpu.memory_space<vmem>>, vector<32x128xbf16>
      tpu.vector_store %arg6[%c0_14, %c0_15], %22 {strides = array<i32>} : memref<32x128xbf16, #tpu.memory_space<vmem>>, vector<32x128xbf16>,
    } else {
    }
    return
  }
  func.func @transform_0(%arg0: i32, %arg1: i32, %arg2: i32) -> (i32, i32) {
    %c0_i32 = arith.constant 0 : i32
    return %arg0, %arg2 : i32, i32
  }
  func.func @transform_1(%arg0: i32, %arg1: i32, %arg2: i32) -> (i32, i32) {
    %c0_i32 = arith.constant 0 : i32
    return %arg2, %arg1 : i32, i32
  }
  func.func @transform_2(%arg0: i32, %arg1: i32, %arg2: i32) -> (i32, i32) {
    %c0_i32 = arith.constant 0 : i32
    %c0_i32_0 = arith.constant 0 : i32
    return %c0_i32, %arg1 : i32, i32
  }
  func.func @transform_3(%arg0: i32, %arg1: i32, %arg2: i32) -> (i32, i32) {
    %c0_i32 = arith.constant 0 : i32
    return %arg0, %arg1 : i32, i32
  }
}

module attributes {stable_mosaic.version = 11 : i64} {
  func.func @_gemm_kernel(%arg0: i32, %arg1: i32, %arg2: i32, %arg3: memref<8x128xbf16, #tpu.memory_space<vmem>>, %arg4: memref<128x128xbf16, #tpu.memory_space<vmem>>, %arg5: memref<1x128xf32, #tpu.memory_space<vmem>>, %arg6: memref<8x128xbf16, #tpu.memory_space<vmem>>, %arg7: memref<8x128xf32, #tpu.memory_space<vmem>>) attributes {dimension_semantics = [#tpu.dimension_semantics<parallel>, #tpu.dimension_semantics<parallel>, #tpu.dimension_semantics<arbitrary>], iteration_bounds = array<i64: 1, 1, 5>, scalar_prefetch = 0 : i64, scratch_operands = 1 : i64, tpu.core_type = #tpu.core_type<tc>, window_params = [{transform_indices = @transform_0, window_bounds = array<i64: 8, 128>}, {transform_indices = @transform_1, window_bounds = array<i64: 128, 128>}, {transform_indices = @transform_2, window_bounds = array<i64: 1, 128>}, {transform_indices = @transform_3, window_bounds = array<i64: 8, 128>}]} {
    %c0_i32 = arith.constant 0 : i32
    %0 = arith.cmpi eq, %arg2, %c0_i32 : i32
    %1 = arith.extui %0 : i1 to i32
    %c0_i32_0 = arith.constant 0 : i32
    %2 = arith.cmpi ne, %1, %c0_i32_0 : i32
    scf.if %2 {
      %cst_9 = arith.constant 0.000000e+00 : f32
      %12 = vector.broadcast %cst_9 : f32 to vector<8x128xf32>
      %c0_10 = arith.constant 0 : index
      %c0_11 = arith.constant 0 : index
      %13 = vector.load %arg7[%c0_10, %c0_11] : memref<8x128xf32, #tpu.memory_space<vmem>>, vector<8x128xf32>
      tpu.vector_store %arg7[%c0_10, %c0_11], %12 {strides = array<i32>} : memref<8x128xf32, #tpu.memory_space<vmem>>, vector<8x128xf32>,
    } else {
    }
    %c0 = arith.constant 0 : index
    %c0_1 = arith.constant 0 : index
    %3 = vector.load %arg7[%c0, %c0_1] : memref<8x128xf32, #tpu.memory_space<vmem>>, vector<8x128xf32>
    %c0_2 = arith.constant 0 : index
    %c0_3 = arith.constant 0 : index
    %4 = vector.load %arg3[%c0_2, %c0_3] : memref<8x128xbf16, #tpu.memory_space<vmem>>, vector<8x128xbf16>
    %c0_4 = arith.constant 0 : index
    %c0_5 = arith.constant 0 : index
    %5 = vector.load %arg4[%c0_4, %c0_5] : memref<128x128xbf16, #tpu.memory_space<vmem>>, vector<128x128xbf16>
    %cst = arith.constant dense<0.000000e+00> : vector<8x128xf32>
    %6 = tpu.matmul %4, %5, %cst {dimension_numbers = #tpu.dot_dimension_numbers<[1], [0], [0], [1], [0, 0, 1, 1], [], []>} : vector<8x128xbf16>, vector<128x128xbf16>, vector<8x128xf32> -> vector<8x128xf32>
    %7 = arith.addf %3, %6 : vector<8x128xf32>
    %c0_6 = arith.constant 0 : index
    %c0_7 = arith.constant 0 : index
    %8 = vector.load %arg7[%c0_6, %c0_7] : memref<8x128xf32, #tpu.memory_space<vmem>>, vector<8x128xf32>
    tpu.vector_store %arg7[%c0_6, %c0_7], %7 {strides = array<i32>} : memref<8x128xf32, #tpu.memory_space<vmem>>, vector<8x128xf32>,
    %c4_i32 = arith.constant 4 : i32
    %9 = arith.cmpi eq, %arg2, %c4_i32 : i32
    %10 = arith.extui %9 : i1 to i32
    %c0_i32_8 = arith.constant 0 : i32
    %11 = arith.cmpi ne, %10, %c0_i32_8 : i32
    scf.if %11 {
      %c0_9 = arith.constant 0 : index
      %c0_10 = arith.constant 0 : index
      %12 = vector.load %arg7[%c0_9, %c0_10] : memref<8x128xf32, #tpu.memory_space<vmem>>, vector<8x128xf32>
      %c0_11 = arith.constant 0 : index
      %c0_12 = arith.constant 0 : index
      %13 = vector.load %arg5[%c0_11, %c0_12] : memref<1x128xf32, #tpu.memory_space<vmem>>, vector<1x128xf32>
      %14 = vector.broadcast %13 : vector<1x128xf32> to vector<8x128xf32>
      %15 = arith.addf %12, %14 : vector<8x128xf32>
      %16 = arith.negf %15 : vector<8x128xf32>
      %17 = math.exp %16 : vector<8x128xf32>
      %cst_13 = arith.constant 1.000000e+00 : f32
      %18 = vector.broadcast %cst_13 : f32 to vector<8x128xf32>
      %19 = arith.addf %18, %17 : vector<8x128xf32>
      %20 = arith.divf %18, %19 : vector<8x128xf32>
      %21 = arith.mulf %15, %20 : vector<8x128xf32>
      %22 = arith.truncf %21 : vector<8x128xf32> to vector<8x128xbf16>
      %c0_14 = arith.constant 0 : index
      %c0_15 = arith.constant 0 : index
      %23 = vector.load %arg6[%c0_14, %c0_15] : memref<8x128xbf16, #tpu.memory_space<vmem>>, vector<8x128xbf16>
      tpu.vector_store %arg6[%c0_14, %c0_15], %22 {strides = array<i32>} : memref<8x128xbf16, #tpu.memory_space<vmem>>, vector<8x128xbf16>,
    } else {
    }
    return
  }
  func.func @transform_0(%arg0: i32, %arg1: i32, %arg2: i32) -> (i32, i32) {
    %c0_i32 = arith.constant 0 : i32
    return %arg0, %arg2 : i32, i32
  }
  func.func @transform_1(%arg0: i32, %arg1: i32, %arg2: i32) -> (i32, i32) {
    %c0_i32 = arith.constant 0 : i32
    return %arg2, %arg1 : i32, i32
  }
  func.func @transform_2(%arg0: i32, %arg1: i32, %arg2: i32) -> (i32, i32) {
    %c0_i32 = arith.constant 0 : i32
    %c0_i32_0 = arith.constant 0 : i32
    return %c0_i32, %arg1 : i32, i32
  }
  func.func @transform_3(%arg0: i32, %arg1: i32, %arg2: i32) -> (i32, i32) {
    %c0_i32 = arith.constant 0 : i32
    return %arg0, %arg1 : i32, i32
  }
}

module attributes {stable_mosaic.version = 11 : i64} {
  func.func @_gemm_kernel(%arg0: i32, %arg1: i32, %arg2: i32, %arg3: memref<32x64xbf16, #tpu.memory_space<vmem>>, %arg4: memref<64x128xbf16, #tpu.memory_space<vmem>>, %arg5: memref<1x128xf32, #tpu.memory_space<vmem>>, %arg6: memref<32x128xf32, #tpu.memory_space<vmem>>, %arg7: memref<32x128xf32, #tpu.memory_space<vmem>>) attributes {dimension_semantics = [#tpu.dimension_semantics<parallel>, #tpu.dimension_semantics<parallel>, #tpu.dimension_semantics<arbitrary>], iteration_bounds = array<i64: 1, 1, 1>, scalar_prefetch = 0 : i64, scratch_operands = 1 : i64, tpu.core_type = #tpu.core_type<tc>, window_params = [{transform_indices = @transform_0, window_bounds = array<i64: 32, 64>}, {transform_indices = @transform_1, window_bounds = array<i64: 64, 128>}, {transform_indices = @transform_2, window_bounds = array<i64: 1, 128>}, {transform_indices = @transform_3, window_bounds = array<i64: 32, 128>}]} {
    %c0_i32 = arith.constant 0 : i32
    %0 = arith.cmpi eq, %arg2, %c0_i32 : i32
    %1 = arith.extui %0 : i1 to i32
    %c0_i32_0 = arith.constant 0 : i32
    %2 = arith.cmpi ne, %1, %c0_i32_0 : i32
    scf.if %2 {
      %cst_10 = arith.constant 0.000000e+00 : f32
      %12 = vector.broadcast %cst_10 : f32 to vector<32x128xf32>
      %c0_11 = arith.constant 0 : index
      %c0_12 = arith.constant 0 : index
      %13 = vector.load %arg7[%c0_11, %c0_12] : memref<32x128xf32, #tpu.memory_space<vmem>>, vector<32x128xf32>
      tpu.vector_store %arg7[%c0_11, %c0_12], %12 {strides = array<i32>} : memref<32x128xf32, #tpu.memory_space<vmem>>, vector<32x128xf32>,
    } else {
    }
    %c0 = arith.constant 0 : index
    %c0_1 = arith.constant 0 : index
    %3 = vector.load %arg7[%c0, %c0_1] : memref<32x128xf32, #tpu.memory_space<vmem>>, vector<32x128xf32>
    %c0_2 = arith.constant 0 : index
    %c0_3 = arith.constant 0 : index
    %4 = vector.load %arg3[%c0_2, %c0_3] : memref<32x64xbf16, #tpu.memory_space<vmem>>, vector<32x64xbf16>
    %c0_4 = arith.constant 0 : index
    %c0_5 = arith.constant 0 : index
    %5 = vector.load %arg4[%c0_4, %c0_5] : memref<64x128xbf16, #tpu.memory_space<vmem>>, vector<64x128xbf16>
    %cst = arith.constant dense<0.000000e+00> : vector<32x128xf32>
    %6 = tpu.matmul %4, %5, %cst {dimension_numbers = #tpu.dot_dimension_numbers<[1], [0], [0], [1], [0, 0, 1, 1], [], []>} : vector<32x64xbf16>, vector<64x128xbf16>, vector<32x128xf32> -> vector<32x128xf32>
    %7 = arith.addf %3, %6 : vector<32x128xf32>
    %c0_6 = arith.constant 0 : index
    %c0_7 = arith.constant 0 : index
    %8 = vector.load %arg7[%c0_6, %c0_7] : memref<32x128xf32, #tpu.memory_space<vmem>>, vector<32x128xf32>
    tpu.vector_store %arg7[%c0_6, %c0_7], %7 {strides = array<i32>} : memref<32x128xf32, #tpu.memory_space<vmem>>, vector<32x128xf32>,
    %c0_i32_8 = arith.constant 0 : i32
    %9 = arith.cmpi eq, %arg2, %c0_i32_8 : i32
    %10 = arith.extui %9 : i1 to i32
    %c0_i32_9 = arith.constant 0 : i32
    %11 = arith.cmpi ne, %10, %c0_i32_9 : i32
    scf.if %11 {
      %c0_10 = arith.constant 0 : index
      %c0_11 = arith.constant 0 : index
      %12 = vector.load %arg7[%c0_10, %c0_11] : memref<32x128xf32, #tpu.memory_space<vmem>>, vector<32x128xf32>
      %c0_12 = arith.constant 0 : index
      %c0_13 = arith.constant 0 : index
      %13 = vector.load %arg5[%c0_12, %c0_13] : memref<1x128xf32, #tpu.memory_space<vmem>>, vector<1x128xf32>
      %14 = vector.broadcast %13 : vector<1x128xf32> to vector<32x128xf32>
      %15 = arith.addf %12, %14 : vector<32x128xf32>
      %c0_14 = arith.constant 0 : index
      %c0_15 = arith.constant 0 : index
      %16 = vector.load %arg6[%c0_14, %c0_15] : memref<32x128xf32, #tpu.memory_space<vmem>>, vector<32x128xf32>
      tpu.vector_store %arg6[%c0_14, %c0_15], %15 {strides = array<i32>} : memref<32x128xf32, #tpu.memory_space<vmem>>, vector<32x128xf32>,
    } else {
    }
    return
  }
  func.func @transform_0(%arg0: i32, %arg1: i32, %arg2: i32) -> (i32, i32) {
    %c0_i32 = arith.constant 0 : i32
    return %arg0, %arg2 : i32, i32
  }
  func.func @transform_1(%arg0: i32, %arg1: i32, %arg2: i32) -> (i32, i32) {
    %c0_i32 = arith.constant 0 : i32
    return %arg2, %arg1 : i32, i32
  }
  func.func @transform_2(%arg0: i32, %arg1: i32, %arg2: i32) -> (i32, i32) {
    %c0_i32 = arith.constant 0 : i32
    %c0_i32_0 = arith.constant 0 : i32
    return %c0_i32, %arg1 : i32, i32
  }
  func.func @transform_3(%arg0: i32, %arg1: i32, %arg2: i32) -> (i32, i32) {
    %c0_i32 = arith.constant 0 : i32
    return %arg0, %arg1 : i32, i32
  }
}

module attributes {stable_mosaic.version = 11 : i64} {
  func.func @_gemm_kernel(%arg0: i32, %arg1: i32, %arg2: i32, %arg3: memref<8x128xbf16, #tpu.memory_space<vmem>>, %arg4: memref<128x128xbf16, #tpu.memory_space<vmem>>, %arg5: memref<1x128xf32, #tpu.memory_space<vmem>>, %arg6: memref<8x128xf32, #tpu.memory_space<vmem>>, %arg7: memref<8x128xf32, #tpu.memory_space<vmem>>) attributes {dimension_semantics = [#tpu.dimension_semantics<parallel>, #tpu.dimension_semantics<parallel>, #tpu.dimension_semantics<arbitrary>], iteration_bounds = array<i64: 1, 1, 1>, scalar_prefetch = 0 : i64, scratch_operands = 1 : i64, tpu.core_type = #tpu.core_type<tc>, window_params = [{transform_indices = @transform_0, window_bounds = array<i64: 8, 128>}, {transform_indices = @transform_1, window_bounds = array<i64: 128, 128>}, {transform_indices = @transform_2, window_bounds = array<i64: 1, 128>}, {transform_indices = @transform_3, window_bounds = array<i64: 8, 128>}]} {
    %c0_i32 = arith.constant 0 : i32
    %0 = arith.cmpi eq, %arg2, %c0_i32 : i32
    %1 = arith.extui %0 : i1 to i32
    %c0_i32_0 = arith.constant 0 : i32
    %2 = arith.cmpi ne, %1, %c0_i32_0 : i32
    scf.if %2 {
      %cst_10 = arith.constant 0.000000e+00 : f32
      %12 = vector.broadcast %cst_10 : f32 to vector<8x128xf32>
      %c0_11 = arith.constant 0 : index
      %c0_12 = arith.constant 0 : index
      %13 = vector.load %arg7[%c0_11, %c0_12] : memref<8x128xf32, #tpu.memory_space<vmem>>, vector<8x128xf32>
      tpu.vector_store %arg7[%c0_11, %c0_12], %12 {strides = array<i32>} : memref<8x128xf32, #tpu.memory_space<vmem>>, vector<8x128xf32>,
    } else {
    }
    %c0 = arith.constant 0 : index
    %c0_1 = arith.constant 0 : index
    %3 = vector.load %arg7[%c0, %c0_1] : memref<8x128xf32, #tpu.memory_space<vmem>>, vector<8x128xf32>
    %c0_2 = arith.constant 0 : index
    %c0_3 = arith.constant 0 : index
    %4 = vector.load %arg3[%c0_2, %c0_3] : memref<8x128xbf16, #tpu.memory_space<vmem>>, vector<8x128xbf16>
    %c0_4 = arith.constant 0 : index
    %c0_5 = arith.constant 0 : index
    %5 = vector.load %arg4[%c0_4, %c0_5] : memref<128x128xbf16, #tpu.memory_space<vmem>>, vector<128x128xbf16>
    %cst = arith.constant dense<0.000000e+00> : vector<8x128xf32>
    %6 = tpu.matmul %4, %5, %cst {dimension_numbers = #tpu.dot_dimension_numbers<[1], [0], [0], [1], [0, 0, 1, 1], [], []>} : vector<8x128xbf16>, vector<128x128xbf16>, vector<8x128xf32> -> vector<8x128xf32>
    %7 = arith.addf %3, %6 : vector<8x128xf32>
    %c0_6 = arith.constant 0 : index
    %c0_7 = arith.constant 0 : index
    %8 = vector.load %arg7[%c0_6, %c0_7] : memref<8x128xf32, #tpu.memory_space<vmem>>, vector<8x128xf32>
    tpu.vector_store %arg7[%c0_6, %c0_7], %7 {strides = array<i32>} : memref<8x128xf32, #tpu.memory_space<vmem>>, vector<8x128xf32>,
    %c0_i32_8 = arith.constant 0 : i32
    %9 = arith.cmpi eq, %arg2, %c0_i32_8 : i32
    %10 = arith.extui %9 : i1 to i32
    %c0_i32_9 = arith.constant 0 : i32
    %11 = arith.cmpi ne, %10, %c0_i32_9 : i32
    scf.if %11 {
      %c0_10 = arith.constant 0 : index
      %c0_11 = arith.constant 0 : index
      %12 = vector.load %arg7[%c0_10, %c0_11] : memref<8x128xf32, #tpu.memory_space<vmem>>, vector<8x128xf32>
      %c0_12 = arith.constant 0 : index
      %c0_13 = arith.constant 0 : index
      %13 = vector.load %arg5[%c0_12, %c0_13] : memref<1x128xf32, #tpu.memory_space<vmem>>, vector<1x128xf32>
      %14 = vector.broadcast %13 : vector<1x128xf32> to vector<8x128xf32>
      %15 = arith.addf %12, %14 : vector<8x128xf32>
      %c0_14 = arith.constant 0 : index
      %c0_15 = arith.constant 0 : index
      %16 = vector.load %arg6[%c0_14, %c0_15] : memref<8x128xf32, #tpu.memory_space<vmem>>, vector<8x128xf32>
      tpu.vector_store %arg6[%c0_14, %c0_15], %15 {strides = array<i32>} : memref<8x128xf32, #tpu.memory_space<vmem>>, vector<8x128xf32>,
    } else {
    }
    return
  }
  func.func @transform_0(%arg0: i32, %arg1: i32, %arg2: i32) -> (i32, i32) {
    %c0_i32 = arith.constant 0 : i32
    return %arg0, %arg2 : i32, i32
  }
  func.func @transform_1(%arg0: i32, %arg1: i32, %arg2: i32) -> (i32, i32) {
    %c0_i32 = arith.constant 0 : i32
    return %arg2, %arg1 : i32, i32
  }
  func.func @transform_2(%arg0: i32, %arg1: i32, %arg2: i32) -> (i32, i32) {
    %c0_i32 = arith.constant 0 : i32
    %c0_i32_0 = arith.constant 0 : i32
    return %c0_i32, %arg1 : i32, i32
  }
  func.func @transform_3(%arg0: i32, %arg1: i32, %arg2: i32) -> (i32, i32) {
    %c0_i32 = arith.constant 0 : i32
    return %arg0, %arg1 : i32, i32
  }
}

module attributes {stable_mosaic.version = 11 : i64} {
  func.func @_gemm_kernel(%arg0: i32, %arg1: i32, %arg2: i32, %arg3: memref<128x32xbf16, #tpu.memory_space<vmem>>, %arg4: memref<32x128xbf16, #tpu.memory_space<vmem>>, %arg5: memref<1x128xf32, #tpu.memory_space<vmem>>, %arg6: memref<128x128xf32, #tpu.memory_space<vmem>>, %arg7: memref<128x128xf32, #tpu.memory_space<vmem>>) attributes {dimension_semantics = [#tpu.dimension_semantics<parallel>, #tpu.dimension_semantics<parallel>, #tpu.dimension_semantics<arbitrary>], iteration_bounds = array<i64: 1, 1, 1>, scalar_prefetch = 0 : i64, scratch_operands = 1 : i64, tpu.core_type = #tpu.core_type<tc>, window_params = [{transform_indices = @transform_0, window_bounds = array<i64: 128, 32>}, {transform_indices = @transform_1, window_bounds = array<i64: 32, 128>}, {transform_indices = @transform_2, window_bounds = array<i64: 1, 128>}, {transform_indices = @transform_3, window_bounds = array<i64: 128, 128>}]} {
    %c0_i32 = arith.constant 0 : i32
    %0 = arith.cmpi eq, %arg2, %c0_i32 : i32
    %1 = arith.extui %0 : i1 to i32
    %c0_i32_0 = arith.constant 0 : i32
    %2 = arith.cmpi ne, %1, %c0_i32_0 : i32
    scf.if %2 {
      %cst_10 = arith.constant 0.000000e+00 : f32
      %12 = vector.broadcast %cst_10 : f32 to vector<128x128xf32>
      %c0_11 = arith.constant 0 : index
      %c0_12 = arith.constant 0 : index
      %13 = vector.load %arg7[%c0_11, %c0_12] : memref<128x128xf32, #tpu.memory_space<vmem>>, vector<128x128xf32>
      tpu.vector_store %arg7[%c0_11, %c0_12], %12 {strides = array<i32>} : memref<128x128xf32, #tpu.memory_space<vmem>>, vector<128x128xf32>,
    } else {
    }
    %c0 = arith.constant 0 : index
    %c0_1 = arith.constant 0 : index
    %3 = vector.load %arg7[%c0, %c0_1] : memref<128x128xf32, #tpu.memory_space<vmem>>, vector<128x128xf32>
    %c0_2 = arith.constant 0 : index
    %c0_3 = arith.constant 0 : index
    %4 = vector.load %arg3[%c0_2, %c0_3] : memref<128x32xbf16, #tpu.memory_space<vmem>>, vector<128x32xbf16>
    %c0_4 = arith.constant 0 : index
    %c0_5 = arith.constant 0 : index
    %5 = vector.load %arg4[%c0_4, %c0_5] : memref<32x128xbf16, #tpu.memory_space<vmem>>, vector<32x128xbf16>
    %cst = arith.constant dense<0.000000e+00> : vector<128x128xf32>
    %6 = tpu.matmul %4, %5, %cst {dimension_numbers = #tpu.dot_dimension_numbers<[1], [0], [0], [1], [0, 0, 1, 1], [], []>} : vector<128x32xbf16>, vector<32x128xbf16>, vector<128x128xf32> -> vector<128x128xf32>
    %7 = arith.addf %3, %6 : vector<128x128xf32>
    %c0_6 = arith.constant 0 : index
    %c0_7 = arith.constant 0 : index
    %8 = vector.load %arg7[%c0_6, %c0_7] : memref<128x128xf32, #tpu.memory_space<vmem>>, vector<128x128xf32>
    tpu.vector_store %arg7[%c0_6, %c0_7], %7 {strides = array<i32>} : memref<128x128xf32, #tpu.memory_space<vmem>>, vector<128x128xf32>,
    %c0_i32_8 = arith.constant 0 : i32
    %9 = arith.cmpi eq, %arg2, %c0_i32_8 : i32
    %10 = arith.extui %9 : i1 to i32
    %c0_i32_9 = arith.constant 0 : i32
    %11 = arith.cmpi ne, %10, %c0_i32_9 : i32
    scf.if %11 {
      %c0_10 = arith.constant 0 : index
      %c0_11 = arith.constant 0 : index
      %12 = vector.load %arg7[%c0_10, %c0_11] : memref<128x128xf32, #tpu.memory_space<vmem>>, vector<128x128xf32>
      %c0_12 = arith.constant 0 : index
      %c0_13 = arith.constant 0 : index
      %13 = vector.load %arg5[%c0_12, %c0_13] : memref<1x128xf32, #tpu.memory_space<vmem>>, vector<1x128xf32>
      %14 = vector.broadcast %13 : vector<1x128xf32> to vector<128x128xf32>
      %15 = arith.addf %12, %14 : vector<128x128xf32>
      %c0_14 = arith.constant 0 : index
      %c0_15 = arith.constant 0 : index
      %16 = vector.load %arg6[%c0_14, %c0_15] : memref<128x128xf32, #tpu.memory_space<vmem>>, vector<128x128xf32>
      tpu.vector_store %arg6[%c0_14, %c0_15], %15 {strides = array<i32>} : memref<128x128xf32, #tpu.memory_space<vmem>>, vector<128x128xf32>,
    } else {
    }
    return
  }
  func.func @transform_0(%arg0: i32, %arg1: i32, %arg2: i32) -> (i32, i32) {
    %c0_i32 = arith.constant 0 : i32
    return %arg0, %arg2 : i32, i32
  }
  func.func @transform_1(%arg0: i32, %arg1: i32, %arg2: i32) -> (i32, i32) {
    %c0_i32 = arith.constant 0 : i32
    return %arg2, %arg1 : i32, i32
  }
  func.func @transform_2(%arg0: i32, %arg1: i32, %arg2: i32) -> (i32, i32) {
    %c0_i32 = arith.constant 0 : i32
    %c0_i32_0 = arith.constant 0 : i32
    return %c0_i32, %arg1 : i32, i32
  }
  func.func @transform_3(%arg0: i32, %arg1: i32, %arg2: i32) -> (i32, i32) {
    %c0_i32 = arith.constant 0 : i32
    return %arg0, %arg1 : i32, i32
  }
}

</mosaic_0001>

<bundles_post_ra>
// kernel: deyolov6_forward.10
= control target key start
LH: loop header
LB: loop body
LE: loop exit
PB: predicated region body
PF: predicated region fallthrough
CT: control target
= control target key end

     0   :  { %s1233_s12 = smov 0   ;;  %s1235_s13 = smov 0   ;;  %s1371_s0 = inlined_call_operand.vmem [shape: bf16[2048,27], index: 0, kind: input, shape index: {}]   ;;  %s1372_s1 = inlined_call_operand.vmem [shape: bf16[27,128], index: 1, kind: input, shape index: {}]   ;;  %s1373_s2 = inlined_call_operand.vmem [shape: f32[1,128], index: 2, kind: input, shape index: {}]   ;;  %s1374_s3 = inlined_call_operand.vmem [shape: bf16[2048,128], index: 3, kind: output, shape index: {}]  }
   0x1   :  { %s1237_s14 = smov 0  }
   0x2 LB: > { %s32_s15 = sadd.s32 1, %s1206_s13  ;;  %p948_p0 = scmp.ge.s32.totalorder %s1210_s14, 1  ;;  %s1210_s14 = sphi %s1237_s14, %s13_s14   ;;  %s1206_s13 = sphi %s1235_s13, %s1376_s13   ;;  %s1202_s12 = sphi %s1233_s12, %s1375_s12  }
   0x3   : > { %p34_p1 = scmp.ge.s32.totalorder %s32_s15, 8  ;;  %p188_p2 = scmp.lt.s32.totalorder %s1210_s14, 9 }
   0x5   : > { %s1378_s15 = smov (%p34_p1, %s32_s15), 0  ;;  %p189_p3 = pnand %p948_p0, %p188_p2 }
   0x6   : > { %s949_s20 = sshll.u32 (!%p189_p3), %s1202_s12, 5 }
   0x7   : > { %192 = sbr.rel (%p189_p3) target bundleno = 222 (0xde), region = 32  ;;  %p230_p4 = scmp.lt.s32.totalorder (!%p189_p3), %s949_s20, 255 }
   0xc   : > { %v1023_v0 = vld [vmem:[%s1372_s1 + $0x8] sm:$0xf]  ;;  %v1060_v1 = vld [vmem:[%s1372_s1 + $0x8] sm:$0x30]  ;;  %vm504_vm0 = vcmask 1044480   ;;  %vm505_vm1 = vcmask 1045504  }
   0xd   : > { %v1024_v2 = vor.u32 %v1060_v1, %v1023_v0  ;;  %v1212_v3 = vmov 65535   ;;  %s1380_s20 = smov (!%p230_p4, %s949_s20), 255  ;;  %v1059_v7 = vld [vmem:[%s1372_s1] sm:$0xff]  ;;  %vm455_vm2 = vcmask 220160  }
   0xe   : > { %v506_v4 = vsel %vm504_vm0, 4294967295, %v1212_v3  ;;  %s950_s23 = sshll.u32 %s1380_s20, 2  ;;  %v1305_v26 = vld [vmem:[%s1373_s2] ss:$0 sm:$0xff] }
   0xf   : > { %v507_v5 = vsel %vm505_vm1, %v506_v4, 0  ;;  %s1268_s26 = scalar_lea.vmem %s1371_s0, %s950_s23  ;;  %s1316_s4 = scalar_lea.vmem %s1374_s3, %s950_s23 }
  0x10   : > { %v509_v6 = vand.u32 %v1024_v2, %v507_v5  ;;  %v1043_v8 = vld [vmem:[%s1268_s26] sm:$0xff]  ;;  %v1044_v12 = vld [vmem:[%s1268_s26 + $0x8] sm:$0xff]  ;;  %v1045_v16 = vld [vmem:[%s1268_s26 + $0x10] sm:$0xff] }
  0x11   : > { %v1047_v9 = vld [vmem:[%s1268_s26 + $0x20] sm:$0xff]  ;;  %v1048_v13 = vld [vmem:[%s1268_s26 + $0x28] sm:$0xff]  ;;  %v1049_v17 = vld [vmem:[%s1268_s26 + $0x30] sm:$0xff] }
  0x12   : > { %517 = vmatpush.bf16.msra.mxu0 %v509_v6  ;;  %1156 = vmatpush.bf16.msra.mxu1 %v509_v6  ;;  %v1051_v10 = vld [vmem:[%s1268_s26 + $0x40] sm:$0xff]  ;;  %v1052_v14 = vld [vmem:[%s1268_s26 + $0x48] sm:$0xff]  ;;  %v1053_v18 = vld [vmem:[%s1268_s26 + $0x50] sm:$0xff] }
  0x13   : > { %1157 = vmatpush.bf16.msra.mxu2 %v509_v6  ;;  %1158 = vmatpush.bf16.msra.mxu3 %v509_v6  ;;  %v1055_v11 = vld [vmem:[%s1268_s26 + $0x60] sm:$0xff]  ;;  %v1056_v15 = vld [vmem:[%s1268_s26 + $0x68] sm:$0xff]  ;;  %v1057_v19 = vld [vmem:[%s1268_s26 + $0x70] sm:$0xff] }
  0x14   : > { %v1046_v20 = vld [vmem:[%s1268_s26 + $0x18] sm:$0xff] }
  0x15   : > { %v1050_v21 = vld [vmem:[%s1268_s26 + $0x38] sm:$0xff] }
  0x16   : > { %518 = vmatpush.bf16.msra.mxu0 %v1059_v7  ;;  %1159 = vmatpush.bf16.msra.mxu1 %v1059_v7  ;;  %v1054_v22 = vld [vmem:[%s1268_s26 + $0x58] sm:$0xff] }
  0x17   : > { %1160 = vmatpush.bf16.msra.mxu2 %v1059_v7  ;;  %1161 = vmatpush.bf16.msra.mxu3 %v1059_v7  ;;  %v1058_v23 = vld [vmem:[%s1268_s26 + $0x78] sm:$0xff] }
  0x19   : > { %1025 = vmatmul.msk.bf16.vlgmr.msra.gmra.mxu0 %vm455_vm2, %v1043_v8  ;;  %1029 = vmatmul.msk.bf16.vlgmr.msra.gmra.mxu1 %vm455_vm2, %v1047_v9 }
  0x1a   : > { %1033 = vmatmul.msk.bf16.vlgmr.msra.gmra.mxu2 %vm455_vm2, %v1051_v10  ;;  %1037 = vmatmul.msk.bf16.vlgmr.msra.gmra.mxu3 %vm455_vm2, %v1055_v11 }
  0x29   : > { %1026 = vmatmul.msk.bf16.gmra.mxu0 %vm455_vm2, %v1044_v12  ;;  %1030 = vmatmul.msk.bf16.gmra.mxu1 %vm455_vm2, %v1048_v13 }
  0x2a   : > { %1034 = vmatmul.msk.bf16.gmra.mxu2 %vm455_vm2, %v1052_v14  ;;  %1038 = vmatmul.msk.bf16.gmra.mxu3 %vm455_vm2, %v1056_v15 }
  0x39   : > { %1027 = vmatmul.msk.bf16.gmra.mxu0 %vm455_vm2, %v1045_v16  ;;  %1031 = vmatmul.msk.bf16.gmra.mxu1 %vm455_vm2, %v1049_v17 }
  0x3a   : > { %1035 = vmatmul.msk.bf16.gmra.mxu2 %vm455_vm2, %v1053_v18  ;;  %1039 = vmatmul.msk.bf16.gmra.mxu3 %vm455_vm2, %v1057_v19 }
  0x49   : > { %1028 = vmatmul.msk.bf16.gmra.mxu0 %vm455_vm2, %v1046_v20  ;;  %1032 = vmatmul.msk.bf16.gmra.mxu1 %vm455_vm2, %v1050_v21 }
  0x4a   : > { %1036 = vmatmul.msk.bf16.gmra.mxu2 %vm455_vm2, %v1054_v22  ;;  %1040 = vmatmul.msk.bf16.gmra.mxu3 %vm455_vm2, %v1058_v23 }
  0x96   : > { %v520_v24 = vpop.f32.mrf.mxu0  ;;  %v540_v25 = vpop.f32.mrf.mxu1 }
  0x97   : > { %v703_v27 = vadd.f32 %v1305_v26, %v520_v24  ;;  %v711_v28 = vadd.f32 %v1305_v26, %v540_v25 }
  0x99   : > { %v735_v35 = vmax.f32 %v703_v27, 0.0  ;;  %v743_v36 = vmax.f32 %v711_v28, 0.0 }
  0x9d   : > { %v560_v29 = vpop.f32.mrf.mxu2  ;;  %v580_v30 = vpop.f32.mrf.mxu3 }
  0x9e   : > { %v522_v31 = vpop.f32.mrf.mxu0  ;;  %v542_v32 = vpop.f32.mrf.mxu1  ;;  %v719_v41 = vadd.f32 %v1305_v26, %v560_v29  ;;  %v727_v42 = vadd.f32 %v1305_v26, %v580_v30 }
  0x9f   : > { %v704_v33 = vadd.f32 %v1305_v26, %v522_v31  ;;  %v712_v34 = vadd.f32 %v1305_v26, %v542_v32 }
  0xa0   : > { %v751_v49 = vmax.f32 %v719_v41, 0.0  ;;  %v759_v50 = vmax.f32 %v727_v42, 0.0 }
  0xa1   : > { %v736_v37 = vmax.f32 %v704_v33, 0.0  ;;  %v744_v38 = vmax.f32 %v712_v34, 0.0 }
  0xa3   : > { %v1064_v39 = vpack.c.bf16 %v736_v37, %v735_v35  ;;  %v1084_v40 = vpack.c.bf16 %v744_v38, %v743_v36 }
  0xa5   : > { %1065 = vst [vmem:[%s1316_s4] sm:$0xff] %v1064_v39   ;;  %v562_v43 = vpop.f32.mrf.mxu2  ;;  %v582_v44 = vpop.f32.mrf.mxu3 }
  0xa6   : > { %1144 = vst [vmem:[%s1316_s4 + $0x20] sm:$0xff] %v1084_v40   ;;  %v720_v45 = vadd.f32 %v1305_v26, %v562_v43  ;;  %v728_v46 = vadd.f32 %v1305_v26, %v582_v44  ;;  %v525_v47 = vpop.f32.mrf.mxu0  ;;  %v545_v48 = vpop.f32.mrf.mxu1 }
  0xa7   : > { %v705_v55 = vadd.f32 %v1305_v26, %v525_v47  ;;  %v713_v56 = vadd.f32 %v1305_v26, %v545_v48 }
  0xa8   : > { %v752_v51 = vmax.f32 %v720_v45, 0.0  ;;  %v760_v52 = vmax.f32 %v728_v46, 0.0 }
  0xa9   : > { %v737_v63 = vmax.f32 %v705_v55, 0.0  ;;  %v745_v0 = vmax.f32 %v713_v56, 0.0 }
  0xaa   : > { %v1104_v53 = vpack.c.bf16 %v752_v51, %v751_v49  ;;  %v1124_v54 = vpack.c.bf16 %v760_v52, %v759_v50 }
  0xac   : > { %1148 = vst [vmem:[%s1316_s4 + $0x40] sm:$0xff] %v1104_v53  }
  0xad   : > { %1152 = vst [vmem:[%s1316_s4 + $0x60] sm:$0xff] %v1124_v54   ;;  %v565_v57 = vpop.f32.mrf.mxu2  ;;  %v585_v58 = vpop.f32.mrf.mxu3 }
  0xae   : > { %v527_v59 = vpop.f32.mrf.mxu0  ;;  %v547_v60 = vpop.f32.mrf.mxu1  ;;  %v721_v5 = vadd.f32 %v1305_v26, %v565_v57  ;;  %v729_v6 = vadd.f32 %v1305_v26, %v585_v58 }
  0xaf   : > { %v706_v61 = vadd.f32 %v1305_v26, %v527_v59  ;;  %v714_v62 = vadd.f32 %v1305_v26, %v547_v60 }
  0xb0   : > { %v753_v13 = vmax.f32 %v721_v5, 0.0  ;;  %v761_v14 = vmax.f32 %v729_v6, 0.0 }
  0xb1   : > { %v738_v1 = vmax.f32 %v706_v61, 0.0  ;;  %v746_v2 = vmax.f32 %v714_v62, 0.0 }
  0xb3   : > { %v1069_v3 = vpack.c.bf16 %v738_v1, %v737_v63  ;;  %v1089_v4 = vpack.c.bf16 %v746_v2, %v745_v0 }
  0xb5   : > { %1141 = vst [vmem:[%s1316_s4 + $0x8] sm:$0xff] %v1069_v3   ;;  %v567_v7 = vpop.f32.mrf.mxu2  ;;  %v587_v8 = vpop.f32.mrf.mxu3 }
  0xb6   : > { %1145 = vst [vmem:[%s1316_s4 + $0x28] sm:$0xff] %v1089_v4   ;;  %v722_v9 = vadd.f32 %v1305_v26, %v567_v7  ;;  %v730_v10 = vadd.f32 %v1305_v26, %v587_v8  ;;  %v530_v11 = vpop.f32.mrf.mxu0  ;;  %v550_v12 = vpop.f32.mrf.mxu1 }
  0xb7   : > { %v707_v19 = vadd.f32 %v1305_v26, %v530_v11  ;;  %v715_v20 = vadd.f32 %v1305_v26, %v550_v12 }
  0xb8   : > { %v754_v15 = vmax.f32 %v722_v9, 0.0  ;;  %v762_v16 = vmax.f32 %v730_v10, 0.0 }
  0xb9   : > { %v739_v28 = vmax.f32 %v707_v19, 0.0  ;;  %v747_v29 = vmax.f32 %v715_v20, 0.0 }
  0xba   : > { %v1109_v17 = vpack.c.bf16 %v754_v15, %v753_v13  ;;  %v1129_v18 = vpack.c.bf16 %v762_v16, %v761_v14 }
  0xbc   : > { %1149 = vst [vmem:[%s1316_s4 + $0x48] sm:$0xff] %v1109_v17  }
  0xbd   : > { %1153 = vst [vmem:[%s1316_s4 + $0x68] sm:$0xff] %v1129_v18   ;;  %v570_v21 = vpop.f32.mrf.mxu2  ;;  %v590_v22 = vpop.f32.mrf.mxu3 }
  0xbe   : > { %v532_v23 = vpop.f32.mrf.mxu0  ;;  %v552_v24 = vpop.f32.mrf.mxu1  ;;  %v723_v34 = vadd.f32 %v1305_v26, %v570_v21  ;;  %v731_v35 = vadd.f32 %v1305_v26, %v590_v22 }
  0xbf   : > { %v708_v25 = vadd.f32 %v1305_v26, %v532_v23  ;;  %v716_v27 = vadd.f32 %v1305_v26, %v552_v24 }
  0xc0   : > { %v755_v42 = vmax.f32 %v723_v34, 0.0  ;;  %v763_v43 = vmax.f32 %v731_v35, 0.0 }
  0xc1   : > { %v740_v30 = vmax.f32 %v708_v25, 0.0  ;;  %v748_v31 = vmax.f32 %v716_v27, 0.0 }
  0xc3   : > { %v1074_v32 = vpack.c.bf16 %v740_v30, %v739_v28  ;;  %v1094_v33 = vpack.c.bf16 %v748_v31, %v747_v29 }
  0xc5   : > { %1142 = vst [vmem:[%s1316_s4 + $0x10] sm:$0xff] %v1074_v32   ;;  %v572_v36 = vpop.f32.mrf.mxu2  ;;  %v592_v37 = vpop.f32.mrf.mxu3 }
  0xc6   : > { %1146 = vst [vmem:[%s1316_s4 + $0x30] sm:$0xff] %v1094_v33   ;;  %v724_v38 = vadd.f32 %v1305_v26, %v572_v36  ;;  %v732_v39 = vadd.f32 %v1305_v26, %v592_v37  ;;  %v535_v40 = vpop.f32.mrf.mxu0  ;;  %v555_v41 = vpop.f32.mrf.mxu1 }
  0xc7   : > { %v709_v48 = vadd.f32 %v1305_v26, %v535_v40  ;;  %v717_v49 = vadd.f32 %v1305_v26, %v555_v41 }
  0xc8   : > { %v756_v44 = vmax.f32 %v724_v38, 0.0  ;;  %v764_v45 = vmax.f32 %v732_v39, 0.0 }
  0xc9   : > { %v741_v56 = vmax.f32 %v709_v48, 0.0  ;;  %v749_v57 = vmax.f32 %v717_v49, 0.0 }
  0xca   : > { %v1114_v46 = vpack.c.bf16 %v756_v44, %v755_v42  ;;  %v1134_v47 = vpack.c.bf16 %v764_v45, %v763_v43 }
  0xcc   : > { %1150 = vst [vmem:[%s1316_s4 + $0x50] sm:$0xff] %v1114_v46  }
  0xcd   : > { %1154 = vst [vmem:[%s1316_s4 + $0x70] sm:$0xff] %v1134_v47   ;;  %v575_v50 = vpop.f32.mrf.mxu2  ;;  %v595_v51 = vpop.f32.mrf.mxu3 }
  0xce   : > { %v537_v52 = vpop.f32.mrf.mxu0  ;;  %v557_v53 = vpop.f32.mrf.mxu1  ;;  %v725_v62 = vadd.f32 %v1305_v26, %v575_v50  ;;  %v733_v63 = vadd.f32 %v1305_v26, %v595_v51 }
  0xcf   : > { %v710_v54 = vadd.f32 %v1305_v26, %v537_v52  ;;  %v718_v55 = vadd.f32 %v1305_v26, %v557_v53 }
  0xd0   : > { %v757_v4 = vmax.f32 %v725_v62, 0.0  ;;  %v765_v5 = vmax.f32 %v733_v63, 0.0 }
  0xd1   : > { %v742_v58 = vmax.f32 %v710_v54, 0.0  ;;  %v750_v59 = vmax.f32 %v718_v55, 0.0 }
  0xd3   : > { %v1079_v60 = vpack.c.bf16 %v742_v58, %v741_v56  ;;  %v1099_v61 = vpack.c.bf16 %v750_v59, %v749_v57 }
  0xd5   : > { %1143 = vst [vmem:[%s1316_s4 + $0x18] sm:$0xff] %v1079_v60   ;;  %v577_v0 = vpop.f32.mrf.mxu2  ;;  %v597_v1 = vpop.f32.mrf.mxu3 }
  0xd6   : > { %1147 = vst [vmem:[%s1316_s4 + $0x38] sm:$0xff] %v1099_v61   ;;  %v726_v2 = vadd.f32 %v1305_v26, %v577_v0  ;;  %v734_v3 = vadd.f32 %v1305_v26, %v597_v1 }
  0xd8   : > { %v758_v6 = vmax.f32 %v726_v2, 0.0  ;;  %v766_v7 = vmax.f32 %v734_v3, 0.0 }
  0xda   : > { %v1119_v8 = vpack.c.bf16 %v758_v6, %v757_v4  ;;  %v1139_v9 = vpack.c.bf16 %v766_v7, %v765_v5 }
  0xdc   : > { %1151 = vst [vmem:[%s1316_s4 + $0x58] sm:$0xff] %v1119_v8  }
  0xdd   : > { %1155 = vst [vmem:[%s1316_s4 + $0x78] sm:$0xff] %v1139_v9  }
  0xde PF: > { %s13_s14 = sadd.s32 1, %s1210_s14   ;;  %s1375_s12 = smov %s1206_s13 }
  0xdf   : > { %p10_p5 = scmp.ge.s32.totalorder %s13_s14, 10   ;;  %s1376_s13 = smov %s1378_s15 }
  0xe1   :  { %12 = sbr.rel (!%p10_p5) target bundleno = 2 (0x2), region = 76 }

// kernel: deyolov6_forward.11
= control target key start
LH: loop header
LB: loop body
LE: loop exit
PB: predicated region body
PF: predicated region fallthrough
CT: control target
= control target key end

     0   :  { %s1268_s12 = smov 0   ;;  %s1270_s13 = smov 0   ;;  %s1412_s0 = inlined_call_operand.vmem [shape: bf16[2048,72], index: 0, kind: input, shape index: {}]   ;;  %s1413_s1 = inlined_call_operand.vmem [shape: bf16[72,128], index: 1, kind: input, shape index: {}]   ;;  %s1414_s2 = inlined_call_operand.vmem [shape: f32[1,128], index: 2, kind: input, shape index: {}]   ;;  %s1415_s3 = inlined_call_operand.vmem [shape: bf16[2048,128], index: 3, kind: output, shape index: {}]  }
   0x1   :  { %s1272_s14 = smov 0  }
   0x2 LB: > { %s32_s15 = sadd.s32 1, %s1242_s13  ;;  %p966_p0 = scmp.ge.s32.totalorder %s1246_s14, 1  ;;  %s1246_s14 = sphi %s1272_s14, %s13_s14   ;;  %s1242_s13 = sphi %s1270_s13, %s1417_s13   ;;  %s1238_s12 = sphi %s1268_s12, %s1416_s12  }
   0x3   : > { %p34_p1 = scmp.ge.s32.totalorder %s32_s15, 8  ;;  %p188_p2 = scmp.lt.s32.totalorder %s1246_s14, 9 }
   0x5   : > { %s1419_s15 = smov (%p34_p1, %s32_s15), 0  ;;  %p189_p3 = pnand %p966_p0, %p188_p2 }
   0x6   : > { %s967_s18 = sshll.u32 (!%p189_p3), %s1238_s12, 5 }
   0x7   : > { %192 = sbr.rel (%p189_p3) target bundleno = 234 (0xea), region = 32  ;;  %p230_p4 = scmp.lt.s32.totalorder (!%p189_p3), %s967_s18, 255 }
   0xc   : > { %v368_v0 = vld [vmem:[%s1413_s1 + $0x20] sm:$0xf]  ;;  %vm525_vm0 = vcmask 1043456   ;;  %v1088_v4 = vld [vmem:[%s1413_s1 + $0x18] sm:$0xff]  ;;  %v1087_v5 = vld [vmem:[%s1413_s1 + $0x10] sm:$0xff]  ;;  %s1421_s18 = smov (!%p230_p4, %s967_s18), 255 }
   0xd   : > { %v466_v1 = vunpack.c.l.b16 %v368_v0  ;;  %v1086_v6 = vld [vmem:[%s1413_s1 + $0x8] sm:$0xff]  ;;  %s968_s25 = sshll.u32 %s1421_s18, 2  ;;  %v1085_v7 = vld [vmem:[%s1413_s1] sm:$0xff]  ;;  %vm476_vm1 = vcmask 588800  }
   0xe   : > { %s1309_s30 = scalar_lea.vmem %s1412_s0, %s968_s25  ;;  %v1346_v26 = vld [vmem:[%s1414_s2] ss:$0 sm:$0xff]  ;;  %s1357_s8 = scalar_lea.vmem %s1415_s3, %s968_s25 }
   0xf   : > { %v471_v2 = vpack.c.b16 %v466_v1, %v466_v1  ;;  %v1069_v8 = vld [vmem:[%s1309_s30] sm:$0xff]  ;;  %v1070_v12 = vld [vmem:[%s1309_s30 + $0x8] sm:$0xff]  ;;  %v1071_v16 = vld [vmem:[%s1309_s30 + $0x10] sm:$0xff] }
  0x10   : > { %v1073_v9 = vld [vmem:[%s1309_s30 + $0x20] sm:$0xff]  ;;  %v1074_v13 = vld [vmem:[%s1309_s30 + $0x28] sm:$0xff]  ;;  %v1075_v17 = vld [vmem:[%s1309_s30 + $0x30] sm:$0xff] }
  0x11   : > { %v527_v3 = vsel %vm525_vm0, %v471_v2, 0  ;;  %v1077_v10 = vld [vmem:[%s1309_s30 + $0x40] sm:$0xff]  ;;  %v1078_v14 = vld [vmem:[%s1309_s30 + $0x48] sm:$0xff]  ;;  %v1079_v18 = vld [vmem:[%s1309_s30 + $0x50] sm:$0xff] }
  0x12   : > { %532 = vmatpush.bf16.msra.mxu0 %v527_v3  ;;  %1184 = vmatpush.bf16.msra.mxu1 %v527_v3  ;;  %v1081_v11 = vld [vmem:[%s1309_s30 + $0x60] sm:$0xff]  ;;  %v1082_v15 = vld [vmem:[%s1309_s30 + $0x68] sm:$0xff]  ;;  %v1083_v19 = vld [vmem:[%s1309_s30 + $0x70] sm:$0xff] }
  0x13   : > { %1185 = vmatpush.bf16.msra.mxu2 %v527_v3  ;;  %1186 = vmatpush.bf16.msra.mxu3 %v527_v3  ;;  %v1072_v20 = vld [vmem:[%s1309_s30 + $0x18] sm:$0xff] }
  0x14   : > { %v1076_v21 = vld [vmem:[%s1309_s30 + $0x38] sm:$0xff] }
  0x15   : > { %v1080_v22 = vld [vmem:[%s1309_s30 + $0x58] sm:$0xff] }
  0x16   : > { %533 = vmatpush.bf16.msra.mxu0 %v1088_v4  ;;  %1187 = vmatpush.bf16.msra.mxu1 %v1088_v4  ;;  %v1084_v23 = vld [vmem:[%s1309_s30 + $0x78] sm:$0xff] }
  0x17   : > { %1188 = vmatpush.bf16.msra.mxu2 %v1088_v4  ;;  %1189 = vmatpush.bf16.msra.mxu3 %v1088_v4 }
  0x1a   : > { %534 = vmatpush.bf16.msra.mxu0 %v1087_v5  ;;  %1190 = vmatpush.bf16.msra.mxu1 %v1087_v5 }
  0x1b   : > { %1191 = vmatpush.bf16.msra.mxu2 %v1087_v5  ;;  %1192 = vmatpush.bf16.msra.mxu3 %v1087_v5 }
  0x1e   : > { %535 = vmatpush.bf16.msra.mxu0 %v1086_v6  ;;  %1193 = vmatpush.bf16.msra.mxu1 %v1086_v6 }
  0x1f   : > { %1194 = vmatpush.bf16.msra.mxu2 %v1086_v6  ;;  %1195 = vmatpush.bf16.msra.mxu3 %v1086_v6 }
  0x22   : > { %536 = vmatpush.bf16.msra.mxu0 %v1085_v7  ;;  %1196 = vmatpush.bf16.msra.mxu1 %v1085_v7 }
  0x23   : > { %1197 = vmatpush.bf16.msra.mxu2 %v1085_v7  ;;  %1198 = vmatpush.bf16.msra.mxu3 %v1085_v7 }
  0x25   : > { %1051 = vmatmul.msk.bf16.vlgmr.msra.gmra.mxu0 %vm476_vm1, %v1069_v8  ;;  %1055 = vmatmul.msk.bf16.vlgmr.msra.gmra.mxu1 %vm476_vm1, %v1073_v9 }
  0x26   : > { %1059 = vmatmul.msk.bf16.vlgmr.msra.gmra.mxu2 %vm476_vm1, %v1077_v10  ;;  %1063 = vmatmul.msk.bf16.vlgmr.msra.gmra.mxu3 %vm476_vm1, %v1081_v11 }
  0x35   : > { %1052 = vmatmul.msk.bf16.gmra.mxu0 %vm476_vm1, %v1070_v12  ;;  %1056 = vmatmul.msk.bf16.gmra.mxu1 %vm476_vm1, %v1074_v13 }
  0x36   : > { %1060 = vmatmul.msk.bf16.gmra.mxu2 %vm476_vm1, %v1078_v14  ;;  %1064 = vmatmul.msk.bf16.gmra.mxu3 %vm476_vm1, %v1082_v15 }
  0x45   : > { %1053 = vmatmul.msk.bf16.gmra.mxu0 %vm476_vm1, %v1071_v16  ;;  %1057 = vmatmul.msk.bf16.gmra.mxu1 %vm476_vm1, %v1075_v17 }
  0x46   : > { %1061 = vmatmul.msk.bf16.gmra.mxu2 %vm476_vm1, %v1079_v18  ;;  %1065 = vmatmul.msk.bf16.gmra.mxu3 %vm476_vm1, %v1083_v19 }
  0x55   : > { %1054 = vmatmul.msk.bf16.gmra.mxu0 %vm476_vm1, %v1072_v20  ;;  %1058 = vmatmul.msk.bf16.gmra.mxu1 %vm476_vm1, %v1076_v21 }
  0x56   : > { %1062 = vmatmul.msk.bf16.gmra.mxu2 %vm476_vm1, %v1080_v22  ;;  %1066 = vmatmul.msk.bf16.gmra.mxu3 %vm476_vm1, %v1084_v23 }
  0xa2   : > { %v538_v24 = vpop.f32.mrf.mxu0  ;;  %v558_v25 = vpop.f32.mrf.mxu1 }
  0xa3   : > { %v721_v27 = vadd.f32 %v1346_v26, %v538_v24  ;;  %v729_v28 = vadd.f32 %v1346_v26, %v558_v25 }
  0xa5   : > { %v753_v35 = vmax.f32 %v721_v27, 0.0  ;;  %v761_v36 = vmax.f32 %v729_v28, 0.0 }
  0xa9   : > { %v578_v29 = vpop.f32.mrf.mxu2  ;;  %v598_v30 = vpop.f32.mrf.mxu3 }
  0xaa   : > { %v540_v31 = vpop.f32.mrf.mxu0  ;;  %v560_v32 = vpop.f32.mrf.mxu1  ;;  %v737_v41 = vadd.f32 %v1346_v26, %v578_v29  ;;  %v745_v42 = vadd.f32 %v1346_v26, %v598_v30 }
  0xab   : > { %v722_v33 = vadd.f32 %v1346_v26, %v540_v31  ;;  %v730_v34 = vadd.f32 %v1346_v26, %v560_v32 }
  0xac   : > { %v769_v49 = vmax.f32 %v737_v41, 0.0  ;;  %v777_v50 = vmax.f32 %v745_v42, 0.0 }
  0xad   : > { %v754_v37 = vmax.f32 %v722_v33, 0.0  ;;  %v762_v38 = vmax.f32 %v730_v34, 0.0 }
  0xaf   : > { %v1092_v39 = vpack.c.bf16 %v754_v37, %v753_v35  ;;  %v1112_v40 = vpack.c.bf16 %v762_v38, %v761_v36 }
  0xb1   : > { %1093 = vst [vmem:[%s1357_s8] sm:$0xff] %v1092_v39   ;;  %v580_v43 = vpop.f32.mrf.mxu2  ;;  %v600_v44 = vpop.f32.mrf.mxu3 }
  0xb2   : > { %1172 = vst [vmem:[%s1357_s8 + $0x20] sm:$0xff] %v1112_v40   ;;  %v738_v45 = vadd.f32 %v1346_v26, %v580_v43  ;;  %v746_v46 = vadd.f32 %v1346_v26, %v600_v44  ;;  %v543_v47 = vpop.f32.mrf.mxu0  ;;  %v563_v48 = vpop.f32.mrf.mxu1 }
  0xb3   : > { %v723_v55 = vadd.f32 %v1346_v26, %v543_v47  ;;  %v731_v56 = vadd.f32 %v1346_v26, %v563_v48 }
  0xb4   : > { %v770_v51 = vmax.f32 %v738_v45, 0.0  ;;  %v778_v52 = vmax.f32 %v746_v46, 0.0 }
  0xb5   : > { %v755_v63 = vmax.f32 %v723_v55, 0.0  ;;  %v763_v0 = vmax.f32 %v731_v56, 0.0 }
  0xb6   : > { %v1132_v53 = vpack.c.bf16 %v770_v51, %v769_v49  ;;  %v1152_v54 = vpack.c.bf16 %v778_v52, %v777_v50 }
  0xb8   : > { %1176 = vst [vmem:[%s1357_s8 + $0x40] sm:$0xff] %v1132_v53  }
  0xb9   : > { %1180 = vst [vmem:[%s1357_s8 + $0x60] sm:$0xff] %v1152_v54   ;;  %v583_v57 = vpop.f32.mrf.mxu2  ;;  %v603_v58 = vpop.f32.mrf.mxu3 }
  0xba   : > { %v545_v59 = vpop.f32.mrf.mxu0  ;;  %v565_v60 = vpop.f32.mrf.mxu1  ;;  %v739_v5 = vadd.f32 %v1346_v26, %v583_v57  ;;  %v747_v6 = vadd.f32 %v1346_v26, %v603_v58 }
  0xbb   : > { %v724_v61 = vadd.f32 %v1346_v26, %v545_v59  ;;  %v732_v62 = vadd.f32 %v1346_v26, %v565_v60 }
  0xbc   : > { %v771_v13 = vmax.f32 %v739_v5, 0.0  ;;  %v779_v14 = vmax.f32 %v747_v6, 0.0 }
  0xbd   : > { %v756_v1 = vmax.f32 %v724_v61, 0.0  ;;  %v764_v2 = vmax.f32 %v732_v62, 0.0 }
  0xbf   : > { %v1097_v3 = vpack.c.bf16 %v756_v1, %v755_v63  ;;  %v1117_v4 = vpack.c.bf16 %v764_v2, %v763_v0 }
  0xc1   : > { %1169 = vst [vmem:[%s1357_s8 + $0x8] sm:$0xff] %v1097_v3   ;;  %v585_v7 = vpop.f32.mrf.mxu2  ;;  %v605_v8 = vpop.f32.mrf.mxu3 }
  0xc2   : > { %1173 = vst [vmem:[%s1357_s8 + $0x28] sm:$0xff] %v1117_v4   ;;  %v740_v9 = vadd.f32 %v1346_v26, %v585_v7  ;;  %v748_v10 = vadd.f32 %v1346_v26, %v605_v8  ;;  %v548_v11 = vpop.f32.mrf.mxu0  ;;  %v568_v12 = vpop.f32.mrf.mxu1 }
  0xc3   : > { %v725_v19 = vadd.f32 %v1346_v26, %v548_v11  ;;  %v733_v20 = vadd.f32 %v1346_v26, %v568_v12 }
  0xc4   : > { %v772_v15 = vmax.f32 %v740_v9, 0.0  ;;  %v780_v16 = vmax.f32 %v748_v10, 0.0 }
  0xc5   : > { %v757_v28 = vmax.f32 %v725_v19, 0.0  ;;  %v765_v29 = vmax.f32 %v733_v20, 0.0 }
  0xc6   : > { %v1137_v17 = vpack.c.bf16 %v772_v15, %v771_v13  ;;  %v1157_v18 = vpack.c.bf16 %v780_v16, %v779_v14 }
  0xc8   : > { %1177 = vst [vmem:[%s1357_s8 + $0x48] sm:$0xff] %v1137_v17  }
  0xc9   : > { %1181 = vst [vmem:[%s1357_s8 + $0x68] sm:$0xff] %v1157_v18   ;;  %v588_v21 = vpop.f32.mrf.mxu2  ;;  %v608_v22 = vpop.f32.mrf.mxu3 }
  0xca   : > { %v550_v23 = vpop.f32.mrf.mxu0  ;;  %v570_v24 = vpop.f32.mrf.mxu1  ;;  %v741_v34 = vadd.f32 %v1346_v26, %v588_v21  ;;  %v749_v35 = vadd.f32 %v1346_v26, %v608_v22 }
  0xcb   : > { %v726_v25 = vadd.f32 %v1346_v26, %v550_v23  ;;  %v734_v27 = vadd.f32 %v1346_v26, %v570_v24 }
  0xcc   : > { %v773_v42 = vmax.f32 %v741_v34, 0.0  ;;  %v781_v43 = vmax.f32 %v749_v35, 0.0 }
  0xcd   : > { %v758_v30 = vmax.f32 %v726_v25, 0.0  ;;  %v766_v31 = vmax.f32 %v734_v27, 0.0 }
  0xcf   : > { %v1102_v32 = vpack.c.bf16 %v758_v30, %v757_v28  ;;  %v1122_v33 = vpack.c.bf16 %v766_v31, %v765_v29 }
  0xd1   : > { %1170 = vst [vmem:[%s1357_s8 + $0x10] sm:$0xff] %v1102_v32   ;;  %v590_v36 = vpop.f32.mrf.mxu2  ;;  %v610_v37 = vpop.f32.mrf.mxu3 }
  0xd2   : > { %1174 = vst [vmem:[%s1357_s8 + $0x30] sm:$0xff] %v1122_v33   ;;  %v742_v38 = vadd.f32 %v1346_v26, %v590_v36  ;;  %v750_v39 = vadd.f32 %v1346_v26, %v610_v37  ;;  %v553_v40 = vpop.f32.mrf.mxu0  ;;  %v573_v41 = vpop.f32.mrf.mxu1 }
  0xd3   : > { %v727_v48 = vadd.f32 %v1346_v26, %v553_v40  ;;  %v735_v49 = vadd.f32 %v1346_v26, %v573_v41 }
  0xd4   : > { %v774_v44 = vmax.f32 %v742_v38, 0.0  ;;  %v782_v45 = vmax.f32 %v750_v39, 0.0 }
  0xd5   : > { %v759_v56 = vmax.f32 %v727_v48, 0.0  ;;  %v767_v57 = vmax.f32 %v735_v49, 0.0 }
  0xd6   : > { %v1142_v46 = vpack.c.bf16 %v774_v44, %v773_v42  ;;  %v1162_v47 = vpack.c.bf16 %v782_v45, %v781_v43 }
  0xd8   : > { %1178 = vst [vmem:[%s1357_s8 + $0x50] sm:$0xff] %v1142_v46  }
  0xd9   : > { %1182 = vst [vmem:[%s1357_s8 + $0x70] sm:$0xff] %v1162_v47   ;;  %v593_v50 = vpop.f32.mrf.mxu2  ;;  %v613_v51 = vpop.f32.mrf.mxu3 }
  0xda   : > { %v555_v52 = vpop.f32.mrf.mxu0  ;;  %v575_v53 = vpop.f32.mrf.mxu1  ;;  %v743_v62 = vadd.f32 %v1346_v26, %v593_v50  ;;  %v751_v63 = vadd.f32 %v1346_v26, %v613_v51 }
  0xdb   : > { %v728_v54 = vadd.f32 %v1346_v26, %v555_v52  ;;  %v736_v55 = vadd.f32 %v1346_v26, %v575_v53 }
  0xdc   : > { %v775_v4 = vmax.f32 %v743_v62, 0.0  ;;  %v783_v5 = vmax.f32 %v751_v63, 0.0 }
  0xdd   : > { %v760_v58 = vmax.f32 %v728_v54, 0.0  ;;  %v768_v59 = vmax.f32 %v736_v55, 0.0 }
  0xdf   : > { %v1107_v60 = vpack.c.bf16 %v760_v58, %v759_v56  ;;  %v1127_v61 = vpack.c.bf16 %v768_v59, %v767_v57 }
  0xe1   : > { %1171 = vst [vmem:[%s1357_s8 + $0x18] sm:$0xff] %v1107_v60   ;;  %v595_v0 = vpop.f32.mrf.mxu2  ;;  %v615_v1 = vpop.f32.mrf.mxu3 }
  0xe2   : > { %1175 = vst [vmem:[%s1357_s8 + $0x38] sm:$0xff] %v1127_v61   ;;  %v744_v2 = vadd.f32 %v1346_v26, %v595_v0  ;;  %v752_v3 = vadd.f32 %v1346_v26, %v615_v1 }
  0xe4   : > { %v776_v6 = vmax.f32 %v744_v2, 0.0  ;;  %v784_v7 = vmax.f32 %v752_v3, 0.0 }
  0xe6   : > { %v1147_v8 = vpack.c.bf16 %v776_v6, %v775_v4  ;;  %v1167_v9 = vpack.c.bf16 %v784_v7, %v783_v5 }
  0xe8   : > { %1179 = vst [vmem:[%s1357_s8 + $0x58] sm:$0xff] %v1147_v8  }
  0xe9   : > { %1183 = vst [vmem:[%s1357_s8 + $0x78] sm:$0xff] %v1167_v9  }
  0xea PF: > { %s13_s14 = sadd.s32 1, %s1246_s14   ;;  %s1416_s12 = smov %s1242_s13 }
  0xeb   : > { %p10_p5 = scmp.ge.s32.totalorder %s13_s14, 10   ;;  %s1417_s13 = smov %s1419_s15 }
  0xed   :  { %12 = sbr.rel (!%p10_p5) target bundleno = 2 (0x2), region = 76 }

// kernel: deyolov6_forward.12
= control target key start
LH: loop header
LB: loop body
LE: loop exit
PB: predicated region body
PF: predicated region fallthrough
CT: control target
= control target key end

     0   :  { %s2262_s15 = smov 0   ;;  %s2264_s16 = smov 0   ;;  %s3177_s0 = inlined_call_operand.vmem [shape: bf16[2048,72], index: 0, kind: input, shape index: {}]   ;;  %s3178_s1 = inlined_call_operand.vmem [shape: bf16[72,128], index: 1, kind: input, shape index: {}]   ;;  %s3179_s2 = inlined_call_operand.vmem [shape: f32[1,128], index: 2, kind: input, shape index: {}]   ;;  %s3180_s3 = inlined_call_operand.vmem [shape: bf16[2048,128], index: 3, kind: input, shape index: {}]   ;;  %s3181_s4 = inlined_call_operand.vmem [shape: bf16[2048,128], index: 4, kind: output, shape index: {}]  }
   0x1   :  { %s2266_s17 = smov 0  }
   0x2 LB: > { %s33_s18 = sadd.s32 1, %s2231_s16  ;;  %p1713_p0 = scmp.ge.s32.totalorder %s2235_s17, 1  ;;  %s2235_s17 = sphi %s2266_s17, %s14_s17   ;;  %s2231_s16 = sphi %s2264_s16, %s3251_s16   ;;  %s2227_s15 = sphi %s2262_s15, %s3250_s15  }
   0x3   : > { %p35_p1 = scmp.ge.s32.totalorder %s33_s18, 8  ;;  %p229_p2 = scmp.lt.s32.totalorder %s2235_s17, 9 }
   0x5   : > { %s3253_s18 = smov (%p35_p1, %s33_s18), 0  ;;  %p230_p3 = pnand %p1713_p0, %p229_p2 }
   0x6   : > { %s1714_s21 = sshll.u32 (!%p230_p3), %s2227_s15, 5 }
   0x7   : > { %233 = sbr.rel (%p230_p3) target bundleno = 331 (0x14b), region = 36  ;;  %p281_p4 = scmp.lt.s32.totalorder (!%p230_p3), %s1714_s21, 255 }
   0xc   : > { %v428_v0 = vld [vmem:[%s3178_s1 + $0x20] sm:$0xf]  ;;  %vm585_vm0 = vcmask 1043456   ;;  %v1869_v4 = vld [vmem:[%s3178_s1 + $0x18] sm:$0xff]  ;;  %v1868_v5 = vld [vmem:[%s3178_s1 + $0x10] sm:$0xff]  ;;  %s3255_s21 = smov (!%p281_p4, %s1714_s21), 255 }
   0xd   : > { %v526_v1 = vunpack.c.l.b16 %v428_v0  ;;  %v1867_v6 = vld [vmem:[%s3178_s1 + $0x8] sm:$0xff]  ;;  %s2292_s28 = sshll.u32 %s3255_s21, 2  ;;  %v1866_v7 = vld [vmem:[%s3178_s1] sm:$0xff]  ;;  %vm536_vm1 = vcmask 588800  }
   0xe   : > { %s2301_s7 = scalar_lea.vmem %s3177_s0, %s2292_s28  ;;  %v2338_v24 = vld [vmem:[%s3179_s2] ss:$0 sm:$0xff]  ;;  %s2352_s12 = scalar_lea.vmem %s3180_s3, %s2292_s28 }
   0xf   : > { %v531_v2 = vpack.c.b16 %v526_v1, %v526_v1  ;;  %v1850_v8 = vld [vmem:[%s2301_s7] sm:$0xff]  ;;  %v1851_v12 = vld [vmem:[%s2301_s7 + $0x8] sm:$0xff]  ;;  %v1852_v16 = vld [vmem:[%s2301_s7 + $0x10] sm:$0xff]  ;;  %s2540_s15 = scalar_lea.vmem %s3181_s4, %s2292_s28 }
  0x10   : > { %v1854_v9 = vld [vmem:[%s2301_s7 + $0x20] sm:$0xff]  ;;  %v1855_v13 = vld [vmem:[%s2301_s7 + $0x28] sm:$0xff]  ;;  %v1856_v17 = vld [vmem:[%s2301_s7 + $0x30] sm:$0xff] }
  0x11   : > { %v587_v3 = vsel %vm585_vm0, %v531_v2, 0  ;;  %v1858_v10 = vld [vmem:[%s2301_s7 + $0x40] sm:$0xff]  ;;  %v1859_v14 = vld [vmem:[%s2301_s7 + $0x48] sm:$0xff]  ;;  %v1860_v18 = vld [vmem:[%s2301_s7 + $0x50] sm:$0xff] }
  0x12   : > { %592 = vmatpush.bf16.msra.mxu0 %v587_v3  ;;  %2044 = vmatpush.bf16.msra.mxu1 %v587_v3  ;;  %v1862_v11 = vld [vmem:[%s2301_s7 + $0x60] sm:$0xff]  ;;  %v1863_v15 = vld [vmem:[%s2301_s7 + $0x68] sm:$0xff]  ;;  %v1864_v19 = vld [vmem:[%s2301_s7 + $0x70] sm:$0xff] }
  0x13   : > { %2045 = vmatpush.bf16.msra.mxu2 %v587_v3  ;;  %2046 = vmatpush.bf16.msra.mxu3 %v587_v3  ;;  %v1853_v20 = vld [vmem:[%s2301_s7 + $0x18] sm:$0xff]  ;;  %v2359_v48 = vld [vmem:[%s2352_s12] sm:$0xff]  }
  0x14   : > { %v1857_v21 = vld [vmem:[%s2301_s7 + $0x38] sm:$0xff]  ;;  %v2362_v49 = vld [vmem:[%s2352_s12 + $0x20] sm:$0xff]   ;;  %v1872_v55 = vunpack.c.l.bf16 %v2359_v48  ;;  %v1873_v2 = vunpack.c.h.bf16 %v2359_v48 }
  0x15   : > { %v1861_v22 = vld [vmem:[%s2301_s7 + $0x58] sm:$0xff]  ;;  %v2365_v50 = vld [vmem:[%s2352_s12 + $0x40] sm:$0xff]   ;;  %v1888_v56 = vunpack.c.l.bf16 %v2362_v49 }
  0x16   : > { %593 = vmatpush.bf16.msra.mxu0 %v1869_v4  ;;  %2047 = vmatpush.bf16.msra.mxu1 %v1869_v4  ;;  %v1865_v23 = vld [vmem:[%s2301_s7 + $0x78] sm:$0xff]  ;;  %v2368_v51 = vld [vmem:[%s2352_s12 + $0x60] sm:$0xff]   ;;  %v1904_v60 = vunpack.c.l.bf16 %v2365_v50 }
  0x17   : > { %2048 = vmatpush.bf16.msra.mxu2 %v1869_v4  ;;  %2049 = vmatpush.bf16.msra.mxu3 %v1869_v4  ;;  %v1920_v62 = vunpack.c.l.bf16 %v2368_v51 }
  0x1a   : > { %594 = vmatpush.bf16.msra.mxu0 %v1868_v5  ;;  %2050 = vmatpush.bf16.msra.mxu1 %v1868_v5 }
  0x1b   : > { %2051 = vmatpush.bf16.msra.mxu2 %v1868_v5  ;;  %2052 = vmatpush.bf16.msra.mxu3 %v1868_v5 }
  0x1e   : > { %595 = vmatpush.bf16.msra.mxu0 %v1867_v6  ;;  %2053 = vmatpush.bf16.msra.mxu1 %v1867_v6 }
  0x1f   : > { %2054 = vmatpush.bf16.msra.mxu2 %v1867_v6  ;;  %2055 = vmatpush.bf16.msra.mxu3 %v1867_v6 }
  0x22   : > { %596 = vmatpush.bf16.msra.mxu0 %v1866_v7  ;;  %2056 = vmatpush.bf16.msra.mxu1 %v1866_v7 }
  0x23   : > { %2057 = vmatpush.bf16.msra.mxu2 %v1866_v7  ;;  %2058 = vmatpush.bf16.msra.mxu3 %v1866_v7 }
  0x25   : > { %1800 = vmatmul.msk.bf16.vlgmr.msra.gmra.mxu0 %vm536_vm1, %v1850_v8  ;;  %1804 = vmatmul.msk.bf16.vlgmr.msra.gmra.mxu1 %vm536_vm1, %v1854_v9 }
  0x26   : > { %1808 = vmatmul.msk.bf16.vlgmr.msra.gmra.mxu2 %vm536_vm1, %v1858_v10  ;;  %1812 = vmatmul.msk.bf16.vlgmr.msra.gmra.mxu3 %vm536_vm1, %v1862_v11 }
  0x35   : > { %1801 = vmatmul.msk.bf16.gmra.mxu0 %vm536_vm1, %v1851_v12  ;;  %1805 = vmatmul.msk.bf16.gmra.mxu1 %vm536_vm1, %v1855_v13 }
  0x36   : > { %1809 = vmatmul.msk.bf16.gmra.mxu2 %vm536_vm1, %v1859_v14  ;;  %1813 = vmatmul.msk.bf16.gmra.mxu3 %vm536_vm1, %v1863_v15  ;;  %v1889_v15 = vunpack.c.h.bf16 %v2362_v49 }
  0x45   : > { %1802 = vmatmul.msk.bf16.gmra.mxu0 %vm536_vm1, %v1852_v16  ;;  %1806 = vmatmul.msk.bf16.gmra.mxu1 %vm536_vm1, %v1856_v17 }
  0x46   : > { %1810 = vmatmul.msk.bf16.gmra.mxu2 %vm536_vm1, %v1860_v18  ;;  %1814 = vmatmul.msk.bf16.gmra.mxu3 %vm536_vm1, %v1864_v19 }
  0x55   : > { %1803 = vmatmul.msk.bf16.gmra.mxu0 %vm536_vm1, %v1853_v20  ;;  %1807 = vmatmul.msk.bf16.gmra.mxu1 %vm536_vm1, %v1857_v21 }
  0x56   : > { %1811 = vmatmul.msk.bf16.gmra.mxu2 %vm536_vm1, %v1861_v22  ;;  %1815 = vmatmul.msk.bf16.gmra.mxu3 %vm536_vm1, %v1865_v23 }
  0xa2   : > { %v598_v25 = vpop.f32.mrf.mxu0  ;;  %v618_v26 = vpop.f32.mrf.mxu1 }
  0xa3   : > { %v781_v27 = vadd.f32 %v2338_v24, %v598_v25  ;;  %v789_v28 = vadd.f32 %v2338_v24, %v618_v26 }
  0xa5   : > { %v1816_v29 = vmul.f32 -1.442695, %v781_v27  ;;  %v1824_v30 = vmul.f32 -1.442695, %v789_v28 }
  0xa7   : > { %2084 = vpow2.f32 %v1816_v29 }
  0xa8   : > { %2086 = vpow2.f32 %v1824_v30 }
  0xa9   : > { %v638_v31 = vpop.f32.mrf.mxu2  ;;  %v658_v32 = vpop.f32.mrf.mxu3 }
  0xaa   : > { %v797_v33 = vadd.f32 %v2338_v24, %v638_v31  ;;  %v805_v34 = vadd.f32 %v2338_v24, %v658_v32  ;;  %v600_v35 = vpop.f32.mrf.mxu0  ;;  %v620_v36 = vpop.f32.mrf.mxu1  ;;  %v1905_v32 = vunpack.c.h.bf16 %v2365_v50 }
  0xab   : > { %v782_v37 = vadd.f32 %v2338_v24, %v600_v35  ;;  %v790_v38 = vadd.f32 %v2338_v24, %v620_v36 }
  0xac   : > { %v1832_v39 = vmul.f32 -1.442695, %v797_v33  ;;  %v1840_v40 = vmul.f32 -1.442695, %v805_v34 }
  0xad   : > { %v2085_v41 = vpop.eup %2084  ;;  %v1817_v44 = vmul.f32 -1.442695, %v782_v37  ;;  %v1825_v46 = vmul.f32 -1.442695, %v790_v38 }
  0xae   : > { %v2087_v42 = vpop.eup %2086  ;;  %v2346_v43 = vadd.f32 1.0, %v2085_v41  ;;  %2088 = vpow2.f32 %v1832_v39 }
  0xaf   : > { %v2354_v45 = vadd.f32 1.0, %v2087_v42  ;;  %2090 = vpow2.f32 %v1840_v40 }
  0xb0   : > { %2092 = vrcp.f32 %v2346_v43  ;;  %v952_v59 = vand.u32 2147483648, %v2346_v43  ;;  %v950_v1 = vand.u32 2147483647, %v2346_v43  ;;  %vm946_vm2 = vweird.f32 %v2346_v43 }
  0xb1   : > { %2094 = vrcp.f32 %v2354_v45  ;;  %v640_v47 = vpop.f32.mrf.mxu2  ;;  %v660_v3 = vpop.f32.mrf.mxu3  ;;  %v1072_v6 = vand.u32 2147483648, %v2354_v45  ;;  %vm1066_vm3 = vweird.f32 %v2354_v45  ;;  %v1070_v11 = vand.u32 2147483647, %v2354_v45 }
  0xb2   : > { %2096 = vpow2.f32 %v1817_v44  ;;  %v798_v53 = vadd.f32 %v2338_v24, %v640_v47  ;;  %v603_v8 = vpop.f32.mrf.mxu0  ;;  %v623_v12 = vpop.f32.mrf.mxu1  ;;  %v953_v13 = vor.u32 1.1754944e-38, %v952_v59  ;;  %v806_v16 = vadd.f32 %v2338_v24, %v660_v3 }
  0xb3   : > { %2098 = vpow2.f32 %v1825_v46  ;;  %vm2399_vm4 = vcmp.eq.f32.partialorder %v950_v1, 8.507059e+37  ;;  %v783_v21 = vadd.f32 %v2338_v24, %v603_v8  ;;  %v1073_v23 = vor.u32 1.1754944e-38, %v1072_v6 }
  0xb4   : > { %v2089_v52 = vpop.eup %2088  ;;  %v1833_v7 = vmul.f32 -1.442695, %v798_v53  ;;  %v791_v25 = vadd.f32 %v2338_v24, %v623_v12  ;;  %vm2414_vm6 = vcmp.eq.f32.partialorder %v1070_v11, 8.507059e+37  ;;  %v1841_v33 = vmul.f32 -1.442695, %v806_v16  ;;  %v2581_v16 = vld [vmem:[%s2352_s12 + $0x48] sm:$0xff]  }
  0xb5   : > { %v2091_v54 = vpop.eup %2090  ;;  %v2373_v57 = vadd.f32 1.0, %v2089_v52  ;;  %v1818_v36 = vmul.f32 -1.442695, %v783_v21  ;;  %v1908_v50 = vunpack.c.l.bf16 %v2581_v16 }
  0xb6   : > { %v2375_v58 = vpop.eup %2092  ;;  %v2379_v61 = vadd.f32 1.0, %v2091_v54  ;;  %v1826_v59 = vmul.f32 -1.442695, %v791_v25 }
  0xb7   : > { %v2382_v63 = vpop.eup %2094  ;;  %v942_v0 = vmul.f32 %v2375_v58, %v2346_v43  ;;  %2100 = vrcp.f32 %v2373_v57  ;;  %vm947_vm5 = vweird.f32 %v2375_v58  ;;  %v1192_v29 = vand.u32 2147483648, %v2373_v57 }
  0xb8   : > { %v2097_v4 = vpop.eup %2096  ;;  %v1062_v5 = vmul.f32 %v2382_v63, %v2354_v45  ;;  %2102 = vrcp.f32 %v2379_v61  ;;  %v1312_v31 = vand.u32 2147483648, %v2379_v61  ;;  %vm1067_vm7 = vweird.f32 %v2382_v63  ;;  %vm2431_vm8 = vmor %vm946_vm2, %vm947_vm5 }
  0xb9   : > { %v2099_v9 = vpop.eup %2098  ;;  %v943_v10 = vsub.f32 1.0, %v942_v0  ;;  %v2403_v19 = vadd.f32 1.0, %v2097_v4  ;;  %2104 = vpow2.f32 %v1833_v7  ;;  %vm1186_vm9 = vweird.f32 %v2373_v57  ;;  %vm2446_vm10 = vmor %vm1066_vm3, %vm1067_vm7 }
  0xba   : > { %v1063_v14 = vsub.f32 1.0, %v1062_v5  ;;  %v2405_v20 = vadd.f32 1.0, %v2099_v9  ;;  %v1190_v39 = vand.u32 2147483647, %v2373_v57  ;;  %v1193_v42 = vor.u32 1.1754944e-38, %v1192_v29 }
  0xbb   : > { %v944_v17 = vmul.f32 %v2375_v58, %v943_v10  ;;  %2106 = vrcp.f32 %v2403_v19  ;;  %v1310_v44 = vand.u32 2147483647, %v2379_v61  ;;  %v965_v43 = vand.u32 2147483647, %v2403_v19 }
  0xbc   : > { %v1064_v22 = vmul.f32 %v2382_v63, %v1063_v14  ;;  %2108 = vrcp.f32 %v2405_v20  ;;  %v2451_v54 = vor.u32 1.1754944e-38, %v1312_v31  ;;  %vm1306_vm11 = vweird.f32 %v2379_v61 }
  0xbd   : > { %v2410_v26 = vpop.eup %2100  ;;  %v945_v27 = vadd.f32 %v2375_v58, %v944_v17  ;;  %v967_v1 = vand.u32 2147483648, %v2403_v19  ;;  %2110 = vpow2.f32 %v1841_v33  ;;  %vm2463_vm13 = vcmp.eq.f32.partialorder %v1190_v39, 8.507059e+37 }
  0xbe   : > { %v1182_v30 = vmul.f32 %v2410_v26, %v2373_v57  ;;  %v2424_v34 = vpop.eup %2102  ;;  %v1065_v35 = vadd.f32 %v2382_v63, %v1064_v22  ;;  %vm1187_vm12 = vweird.f32 %v2410_v26  ;;  %vm961_vm14 = vweird.f32 %v2403_v19  ;;  %v643_v22 = vpop.f32.mrf.mxu2 }
  0xbf   : > { %v1302_v40 = vmul.f32 %v2424_v34, %v2379_v61  ;;  %v949_v41 = vsel %vm2431_vm8, %v2375_v58, %v945_v27  ;;  %v2105_v46 = vpop.eup %2104  ;;  %vm2471_vm15 = vcmp.eq.f32.partialorder %v965_v43, 8.507059e+37  ;;  %vm1081_vm0 = vweird.f32 %v2405_v20  ;;  %vm2488_vm2 = vmor %vm1186_vm9, %vm1187_vm12 }
  0xc0   : > { %v1183_v38 = vsub.f32 1.0, %v1182_v30  ;;  %v1069_v58 = vsel %vm2446_vm10, %v2382_v63, %v1065_v35  ;;  %v2458_v45 = vadd.f32 1.0, %v2105_v46  ;;  %v954_v3 = vsel %vm2399_vm4, %v953_v13, %v949_v41 }
  0xc1   : > { %v1303_v53 = vsub.f32 1.0, %v1302_v40  ;;  %v2107_v0 = vpop.eup %2106  ;;  %v1074_v9 = vsel %vm2414_vm6, %v1073_v23, %v1069_v58  ;;  %v1485_v12 = vmul.f32 %v1872_v55, %v954_v3  ;;  %vm1307_vm1 = vweird.f32 %v2424_v34 }
  0xc2   : > { %v1184_v52 = vmul.f32 %v2410_v26, %v1183_v38  ;;  %v957_v5 = vmul.f32 %v2107_v0, %v2403_v19  ;;  %v2109_v63 = vpop.eup %2108  ;;  %2112 = vrcp.f32 %v2458_v45  ;;  %v968_v13 = vor.u32 1.1754944e-38, %v967_v1  ;;  %vm2517_vm8 = vmor %vm1306_vm11, %vm1307_vm1 }
  0xc3   : > { %v1304_v7 = vmul.f32 %v2424_v34, %v1303_v53  ;;  %v1077_v11 = vmul.f32 %v2109_v63, %v2405_v20  ;;  %v1085_v14 = vand.u32 2147483647, %v2405_v20  ;;  %vm2492_vm3 = vcmp.eq.f32.partialorder %v1310_v44, 8.507059e+37  ;;  %v2111_v23 = vpop.eup %2110  ;;  %v663_v53 = vpop.f32.mrf.mxu3 }
  0xc4   : > { %v1185_v6 = vadd.f32 %v2410_v26, %v1184_v52  ;;  %v958_v10 = vsub.f32 1.0, %v957_v5  ;;  %vm962_vm4 = vweird.f32 %v2107_v0  ;;  %v1087_v21 = vand.u32 2147483648, %v2405_v20  ;;  %v2557_v5 = vld [vmem:[%s2352_s12 + $0x8] sm:$0xff]  }
  0xc5   : > { %v1078_v55 = vsub.f32 1.0, %v1077_v11  ;;  %v1493_v25 = vmul.f32 %v1888_v56, %v1074_v9  ;;  %v1305_v27 = vadd.f32 %v2424_v34, %v1304_v7  ;;  %2114 = vpow2.f32 %v1818_v36  ;;  %vm963_vm6 = vmor %vm961_vm14, %vm962_vm4  ;;  %v625_v9 = vpop.f32.mrf.mxu1 }
  0xc6   : > { %v959_v18 = vmul.f32 %v2107_v0, %v958_v10  ;;  %v1189_v57 = vsel %vm2488_vm2, %v2410_v26, %v1185_v6  ;;  %vm1082_vm5 = vweird.f32 %v2109_v63  ;;  %v2503_v30 = vadd.f32 1.0, %v2111_v23 }
  0xc7   : > { %v1079_v29 = vmul.f32 %v2109_v63, %v1078_v55  ;;  %vm2507_vm7 = vcmp.eq.f32.partialorder %v1085_v14, 8.507059e+37  ;;  %v1921_v56 = vunpack.c.h.bf16 %v2368_v51  ;;  %2116 = vpow2.f32 %v1826_v59  ;;  %vm1083_vm9 = vmor %vm1081_vm0, %vm1082_vm5  ;;  %v605_v59 = vpop.f32.mrf.mxu0 }
  0xc8   : > { %v960_v28 = vadd.f32 %v2107_v0, %v959_v18  ;;  %v2113_v31 = vpop.eup %2112  ;;  %v799_v26 = vadd.f32 %v2338_v24, %v643_v22  ;;  %v1088_v37 = vor.u32 1.1754944e-38, %v1087_v21  ;;  %v1194_v39 = vsel %vm2463_vm13, %v1193_v42, %v1189_v57 }
  0xc9   : > { %v1080_v36 = vadd.f32 %v2109_v63, %v1079_v29  ;;  %v1197_v38 = vmul.f32 %v2113_v31, %v2458_v45  ;;  %v1207_v61 = vand.u32 2147483648, %v2458_v45  ;;  %2118 = vrcp.f32 %v2503_v30 }
  0xca   : > { %v964_v19 = vsel %vm963_vm6, %v2107_v0, %v960_v28  ;;  %v1309_v41 = vsel %vm2517_vm8, %v2424_v34, %v1305_v27  ;;  %vm1201_vm10 = vweird.f32 %v2458_v45  ;;  %v1205_v47 = vand.u32 2147483647, %v2458_v45 }
  0xcb   : > { %v969_v40 = vsel %vm2471_vm15, %v968_v13, %v964_v19  ;;  %v1084_v43 = vsel %vm1083_vm9, %v2109_v63, %v1080_v36  ;;  %v1198_v42 = vsub.f32 1.0, %v1197_v38  ;;  %v2115_v46 = vpop.eup %2114  ;;  %v1834_v34 = vmul.f32 -1.442695, %v799_v26 }
  0xcc   : > { %v1486_v44 = vmul.f32 %v1873_v2, %v969_v40  ;;  %v1089_v20 = vsel %vm2507_vm7, %v1088_v37, %v1084_v43  ;;  %vm1202_vm11 = vweird.f32 %v2113_v31  ;;  %v1501_v58 = vmul.f32 %v1904_v60, %v1194_v39 }
  0xcd   : > { %v1494_v2 = vmul.f32 %v1889_v15, %v1089_v20  ;;  %v1199_v52 = vmul.f32 %v2113_v31, %v1198_v42  ;;  %v2117_v0 = vpop.eup %2116  ;;  %v1314_v1 = vsel %vm2492_vm3, %v2451_v54, %v1309_v41  ;;  %v2553_v3 = vadd.f32 1.0, %v2115_v46  ;;  %vm1203_vm12 = vmor %vm1201_vm10, %vm1202_vm11  ;;  %v2567_v54 = vld [vmem:[%s2352_s12 + $0x28] sm:$0xff]   ;;  %v665_v41 = vpop.f32.mrf.mxu3 }
  0xce   : > { %v1937_v48 = vpack.c.bf16 %v1486_v44, %v1485_v12  ;;  %2120 = vpow2.f32 %v1834_v34  ;;  %v1208_v4 = vor.u32 1.1754944e-38, %v1207_v61  ;;  %v2559_v63 = vadd.f32 1.0, %v2117_v0 }
  0xcf   : > { %v1957_v49 = vpack.c.bf16 %v1494_v2, %v1493_v25  ;;  %v1200_v15 = vadd.f32 %v2113_v31, %v1199_v52  ;;  %v2119_v6 = vpop.eup %2118  ;;  %v1325_v60 = vand.u32 2147483647, %v2503_v30  ;;  %2122 = vrcp.f32 %v2553_v3  ;;  %v2627_v2 = vld [vmem:[%s2352_s12 + $0x68] sm:$0xff]  }
  0xd0   : > { %1938 = vst [vmem:[%s2540_s15] sm:$0xff] %v1937_v48   ;;  %v807_v7 = vadd.f32 %v2338_v24, %v663_v53  ;;  %v784_v8 = vadd.f32 %v2338_v24, %v605_v59  ;;  %vm1206_vm13 = vcmp.eq.f32.partialorder %v1205_v47, 8.507059e+37  ;;  %v1317_v11 = vmul.f32 %v2119_v6, %v2503_v30 }
  0xd1   : > { %2032 = vst [vmem:[%s2540_s15 + $0x20] sm:$0xff] %v1957_v49   ;;  %v1204_v10 = vsel %vm1203_vm12, %v2113_v31, %v1200_v15  ;;  %2124 = vrcp.f32 %v2559_v63  ;;  %v2576_v45 = vmul.f32 %v1920_v62, %v1314_v1  ;;  %v1327_v13 = vand.u32 2147483648, %v2503_v30 }
  0xd2   : > { %v1209_v12 = vsel %vm1206_vm13, %v1208_v4, %v1204_v10  ;;  %v1876_v14 = vunpack.c.l.bf16 %v2557_v5  ;;  %v1318_v18 = vsub.f32 1.0, %v1317_v11  ;;  %v1892_v55 = vunpack.c.l.bf16 %v2567_v54 }
  0xd3   : > { %v1502_v17 = vmul.f32 %v1905_v32, %v1209_v12  ;;  %v792_v21 = vadd.f32 %v2338_v24, %v625_v9  ;;  %vm1321_vm14 = vweird.f32 %v2503_v30  ;;  %vm2588_vm15 = vcmp.eq.f32.partialorder %v1325_v60, 8.507059e+37  ;;  %v645_v32 = vpop.f32.mrf.mxu2 }
  0xd4   : > { %v2121_v22 = vpop.eup %2120  ;;  %v1842_v23 = vmul.f32 -1.442695, %v807_v7  ;;  %v1819_v25 = vmul.f32 -1.442695, %v784_v8  ;;  %v1319_v27 = vmul.f32 %v2119_v6, %v1318_v18  ;;  %vm1322_vm0 = vweird.f32 %v2119_v6 }
  0xd5   : > { %v1977_v57 = vpack.c.bf16 %v1502_v17, %v1501_v58  ;;  %v2593_v28 = vpop.eup %2122  ;;  %v1328_v29 = vor.u32 1.1754944e-38, %v1327_v13  ;;  %v980_v31 = vand.u32 2147483647, %v2553_v3  ;;  %v2596_v33 = vadd.f32 1.0, %v2121_v22  ;;  %vm1323_vm1 = vmor %vm1321_vm14, %vm1322_vm0 }
  0xd6   : > { %2126 = vpow2.f32 %v1842_v23  ;;  %v1320_v35 = vadd.f32 %v2119_v6, %v1319_v27  ;;  %v972_v19 = vmul.f32 %v2593_v28, %v2553_v3  ;;  %v1827_v36 = vmul.f32 -1.442695, %v792_v21 }
  0xd7   : > { %v2598_v26 = vpop.eup %2124  ;;  %2036 = vst [vmem:[%s2540_s15 + $0x40] sm:$0xff] %v1977_v57   ;;  %2128 = vpow2.f32 %v1819_v25  ;;  %vm976_vm2 = vweird.f32 %v2553_v3  ;;  %v800_v38 = vadd.f32 %v2338_v24, %v645_v32  ;;  %v982_v61 = vand.u32 2147483648, %v2553_v3 }
  0xd8   : > { %v1092_v37 = vmul.f32 %v2598_v26, %v2559_v63  ;;  %2130 = vrcp.f32 %v2596_v33  ;;  %v1324_v39 = vsel %vm1323_vm1, %v2119_v6, %v1320_v35  ;;  %v973_v40 = vsub.f32 1.0, %v972_v19 }
  0xd9   : > { %vm1096_vm3 = vweird.f32 %v2559_v63  ;;  %v1329_v30 = vsel %vm2588_vm15, %v1328_v29, %v1324_v39  ;;  %v1100_v43 = vand.u32 2147483647, %v2559_v63  ;;  %v1102_v42 = vand.u32 2147483648, %v2559_v63  ;;  %v628_v39 = vpop.f32.mrf.mxu1 }
  0xda   : > { %v1093_v44 = vsub.f32 1.0, %v1092_v37  ;;  %v1510_v46 = vmul.f32 %v1921_v56, %v1329_v30  ;;  %v974_v20 = vmul.f32 %v2593_v28, %v973_v40  ;;  %vm977_vm4 = vweird.f32 %v2593_v28 }
  0xdb   : > { %vm2620_vm5 = vcmp.eq.f32.partialorder %v980_v31, 8.507059e+37  ;;  %2132 = vpow2.f32 %v1827_v36  ;;  %vm1097_vm6 = vweird.f32 %v2598_v26  ;;  %v1835_v52 = vmul.f32 -1.442695, %v800_v38  ;;  %vm2646_vm7 = vmor %vm976_vm2, %vm977_vm4  ;;  %v608_v36 = vpop.f32.mrf.mxu0  ;;  %v648_v18 = vpop.f32.mrf.mxu2 }
  0xdc   : > { %v2127_v34 = vpop.eup %2126  ;;  %v1094_v48 = vmul.f32 %v2598_v26, %v1093_v44  ;;  %v808_v51 = vadd.f32 %v2338_v24, %v665_v41  ;;  %v1997_v53 = vpack.c.bf16 %v1510_v46, %v2576_v45  ;;  %v975_v59 = vadd.f32 %v2593_v28, %v974_v20  ;;  %vm2658_vm8 = vmor %vm1096_vm3, %vm1097_vm6 }
  0xdd   : > { %v2129_v56 = vpop.eup %2128  ;;  %v1220_v0 = vand.u32 2147483647, %v2596_v33  ;;  %v2633_v58 = vadd.f32 1.0, %v2127_v34  ;;  %v1222_v15 = vand.u32 2147483648, %v2596_v33  ;;  %2134 = vpow2.f32 %v1835_v52 }
  0xde   : > { %v2635_v1 = vpop.eup %2130  ;;  %v1095_v49 = vadd.f32 %v2598_v26, %v1094_v48  ;;  %v2639_v4 = vadd.f32 1.0, %v2129_v56  ;;  %2040 = vst [vmem:[%s2540_s15 + $0x60] sm:$0xff] %v1997_v53   ;;  %v983_v60 = vor.u32 1.1754944e-38, %v982_v61  ;;  %v1924_v8 = vunpack.c.l.bf16 %v2627_v2 }
  0xdf   : > { %v1212_v7 = vmul.f32 %v2635_v1, %v2596_v33  ;;  %2136 = vrcp.f32 %v2633_v58  ;;  %vm2662_vm9 = vcmp.eq.f32.partialorder %v1100_v43, 8.507059e+37  ;;  %v1103_v10 = vor.u32 1.1754944e-38, %v1102_v42 }
  0xe0   : > { %v1877_v11 = vunpack.c.h.bf16 %v2557_v5  ;;  %v1843_v45 = vmul.f32 -1.442695, %v808_v51  ;;  %v979_v13 = vsel %vm2646_vm7, %v2593_v28, %v975_v59  ;;  %v1099_v63 = vsel %vm2658_vm8, %v2598_v26, %v1095_v49 }
  0xe1   : > { %v2133_v12 = vpop.eup %2132  ;;  %v1213_v17 = vsub.f32 1.0, %v1212_v7  ;;  %vm1216_vm10 = vweird.f32 %v2596_v33  ;;  %vm2674_vm11 = vcmp.eq.f32.partialorder %v1220_v0, 8.507059e+37  ;;  %v1223_v21 = vor.u32 1.1754944e-38, %v1222_v15 }
  0xe2   : > { %2138 = vrcp.f32 %v2639_v4  ;;  %v1893_v22 = vunpack.c.h.bf16 %v2567_v54  ;;  %vm1217_vm12 = vweird.f32 %v2635_v1  ;;  %v1909_v23 = vunpack.c.h.bf16 %v2581_v16 }
  0xe3   : > { %v1214_v62 = vmul.f32 %v2635_v1, %v1213_v17  ;;  %v1925_v25 = vunpack.c.h.bf16 %v2627_v2  ;;  %v2135_v57 = vpop.eup %2134  ;;  %v984_v27 = vsel %vm2620_vm5, %v983_v60, %v979_v13  ;;  %v1104_v32 = vsel %vm2662_vm9, %v1103_v10, %v1099_v63  ;;  %vm2714_vm14 = vmor %vm1216_vm10, %vm1217_vm12  ;;  %v610_v42 = vpop.f32.mrf.mxu0  ;;  %v2839_v17 = vld [vmem:[%s2352_s12 + $0x10] sm:$0xff]  }
  0xe4   : > { %v2688_v28 = vadd.f32 1.0, %v2133_v12  ;;  %2140 = vpow2.f32 %v1843_v45  ;;  %v995_v26 = vand.u32 2147483647, %v2639_v4  ;;  %v997_v35 = vand.u32 2147483648, %v2639_v4  ;;  %v650_v2 = vpop.f32.mrf.mxu2 }
  0xe5   : > { %v2690_v29 = vpop.eup %2136  ;;  %v1215_v31 = vadd.f32 %v2635_v1, %v1214_v62  ;;  %v2695_v19 = vadd.f32 1.0, %v2135_v57  ;;  %vm1336_vm13 = vweird.f32 %v2633_v58  ;;  %v1340_v38 = vand.u32 2147483647, %v2633_v58  ;;  %v668_v57 = vpop.f32.mrf.mxu3 }
  0xe6   : > { %v1332_v37 = vmul.f32 %v2690_v29, %v2633_v58  ;;  %2142 = vrcp.f32 %v2688_v28  ;;  %v2704_v40 = vmul.f32 %v1876_v14, %v984_v27  ;;  %v2708_v61 = vmul.f32 %v1892_v55, %v1104_v32 }
  0xe7   : > { %v1342_v30 = vand.u32 2147483648, %v2633_v58  ;;  %2144 = vrcp.f32 %v2695_v19  ;;  %v1219_v14 = vsel %vm2714_vm14, %v2635_v1, %v1215_v31  ;;  %vm991_vm15 = vweird.f32 %v2639_v4 }
  0xe8   : > { %v2139_v44 = vpop.eup %2138  ;;  %v1333_v43 = vsub.f32 1.0, %v1332_v37  ;;  %v785_v55 = vadd.f32 %v2338_v24, %v608_v36  ;;  %vm2726_vm0 = vcmp.eq.f32.partialorder %v995_v26, 8.507059e+37  ;;  %v998_v46 = vor.u32 1.1754944e-38, %v997_v35 }
  0xe9   : > { %v987_v33 = vmul.f32 %v2139_v44, %v2639_v4  ;;  %v793_v20 = vadd.f32 %v2338_v24, %v628_v39  ;;  %vm1337_vm1 = vweird.f32 %v2690_v29  ;;  %v1115_v48 = vand.u32 2147483647, %v2688_v28 }
  0xea   : > { %v2141_v47 = vpop.eup %2140  ;;  %v1334_v34 = vmul.f32 %v2690_v29, %v1333_v43  ;;  %v1117_v52 = vand.u32 2147483648, %v2688_v28  ;;  %v1224_v51 = vsel %vm2674_vm11, %v1223_v21, %v1219_v14  ;;  %vm1111_vm2 = vweird.f32 %v2688_v28  ;;  %vm2761_vm6 = vmor %vm1336_vm13, %vm1337_vm1 }
  0xeb   : > { %v988_v56 = vsub.f32 1.0, %v987_v33  ;;  %v1235_v53 = vand.u32 2147483647, %v2695_v19  ;;  %v2739_v59 = vadd.f32 1.0, %v2141_v47  ;;  %vm992_vm3 = vweird.f32 %v2139_v44 }
  0xec   : > { %v2143_v0 = vpop.eup %2142  ;;  %v2742_v1 = vadd.f32 %v2690_v29, %v1334_v34  ;;  %v1237_v49 = vand.u32 2147483648, %v2695_v19  ;;  %v1820_v15 = vmul.f32 -1.442695, %v785_v55  ;;  %v1828_v9 = vmul.f32 -1.442695, %v793_v20  ;;  %vm993_vm8 = vmor %vm991_vm15, %vm992_vm3 }
  0xed   : > { %v2145_v6 = vpop.eup %2144  ;;  %v989_v60 = vmul.f32 %v2139_v44, %v988_v56  ;;  %v1107_v7 = vmul.f32 %v2143_v0, %v2688_v28  ;;  %2146 = vrcp.f32 %v2739_v59  ;;  %v2749_v3 = vmul.f32 %v1908_v50, %v1224_v51 }
  0xee   : > { %vm2751_vm4 = vcmp.eq.f32.partialorder %v1115_v48, 8.507059e+37  ;;  %v1227_v45 = vmul.f32 %v2145_v6, %v2695_v19  ;;  %vm1231_vm5 = vweird.f32 %v2695_v19  ;;  %v1118_v50 = vor.u32 1.1754944e-38, %v1117_v52 }
  0xef   : > { %v990_v13 = vadd.f32 %v2139_v44, %v989_v60  ;;  %v1108_v63 = vsub.f32 1.0, %v1107_v7  ;;  %vm2765_vm7 = vcmp.eq.f32.partialorder %v1235_v53, 8.507059e+37  ;;  %vm1112_vm9 = vweird.f32 %v2143_v0 }
  0xf0   : > { %v1228_v21 = vsub.f32 1.0, %v1227_v45  ;;  %v1238_v62 = vor.u32 1.1754944e-38, %v1237_v49  ;;  %2148 = vpow2.f32 %v1820_v15  ;;  %v1339_v27 = vsel %vm2761_vm6, %v2690_v29, %v2742_v1  ;;  %vm1113_vm11 = vmor %vm1111_vm2, %vm1112_vm9 }
  0xf1   : > { %v994_v32 = vsel %vm993_vm8, %v2139_v44, %v990_v13  ;;  %v1109_v31 = vmul.f32 %v2143_v0, %v1108_v63  ;;  %2150 = vpow2.f32 %v1828_v9  ;;  %vm1232_vm10 = vweird.f32 %v2145_v6 }
  0xf2   : > { %v999_v26 = vsel %vm2726_vm0, %v998_v46, %v994_v32  ;;  %v1229_v35 = vmul.f32 %v2145_v6, %v1228_v21  ;;  %v801_v4 = vadd.f32 %v2338_v24, %v648_v18  ;;  %v1355_v41 = vand.u32 2147483647, %v2739_v59  ;;  %vm1233_vm12 = vmor %vm1231_vm5, %vm1232_vm10  ;;  %v2842_v18 = vld [vmem:[%s2352_s12 + $0x30] sm:$0xff]  }
  0xf3   : > { %v2147_v36 = vpop.eup %2146  ;;  %v1488_v37 = vmul.f32 %v1877_v11, %v999_v26  ;;  %v1110_v39 = vadd.f32 %v2143_v0, %v1109_v31  ;;  %v809_v14 = vadd.f32 %v2338_v24, %v668_v57  ;;  %v1357_v43 = vand.u32 2147483648, %v2739_v59  ;;  %v2845_v21 = vld [vmem:[%s2352_s12 + $0x50] sm:$0xff]   ;;  %v670_v31 = vpop.f32.mrf.mxu3 }
  0xf4   : > { %v1230_v29 = vadd.f32 %v2145_v6, %v1229_v35  ;;  %v1347_v44 = vmul.f32 %v2147_v36, %v2739_v59  ;;  %v1836_v55 = vmul.f32 -1.442695, %v801_v4  ;;  %vm1352_vm13 = vweird.f32 %v2147_v36  ;;  %v2852_v32 = vld [vmem:[%s2352_s12 + $0x70] sm:$0xff]  }
  0xf5   : > { %v1942_v33 = vpack.c.bf16 %v1488_v37, %v2704_v40  ;;  %v1114_v5 = vsel %vm1113_vm11, %v2143_v0, %v1110_v39  ;;  %v1844_v11 = vmul.f32 -1.442695, %v809_v14  ;;  %v786_v53 = vadd.f32 %v2338_v24, %v610_v42 }
  0xf6   : > { %v2149_v46 = vpop.eup %2148  ;;  %v1119_v28 = vsel %vm2751_vm4, %v1118_v50, %v1114_v5  ;;  %v1234_v20 = vsel %vm1233_vm12, %v2145_v6, %v1230_v29  ;;  %v1348_v47 = vsub.f32 1.0, %v1347_v44  ;;  %2152 = vpow2.f32 %v1836_v55 }
  0xf7   : > { %v2151_v34 = vpop.eup %2150  ;;  %2029 = vst [vmem:[%s2540_s15 + $0x8] sm:$0xff] %v1942_v33   ;;  %v1496_v48 = vmul.f32 %v1893_v22, %v1119_v28  ;;  %v1239_v40 = vsel %vm2765_vm7, %v1238_v62, %v1234_v20  ;;  %v2798_v19 = vadd.f32 1.0, %v2149_v46  ;;  %2154 = vpow2.f32 %v1844_v11  ;;  %v613_v11 = vpop.f32.mrf.mxu0 }
  0xf8   : > { %v1504_v52 = vmul.f32 %v1909_v23, %v1239_v40  ;;  %v1349_v51 = vmul.f32 %v2147_v36, %v1348_v47  ;;  %v2802_v56 = vadd.f32 1.0, %v2151_v34  ;;  %vm1341_vm14 = vcmp.eq.f32.partialorder %v1340_v38, 8.507059e+37 }
  0xf9   : > { %v1343_v54 = vor.u32 1.1754944e-38, %v1342_v30  ;;  %v1962_v22 = vpack.c.bf16 %v1496_v48, %v2708_v61  ;;  %2156 = vrcp.f32 %v2798_v19  ;;  %vm1351_vm15 = vweird.f32 %v2739_v59  ;;  %v630_v30 = vpop.f32.mrf.mxu1 }
  0xfa   : > { %v1982_v0 = vpack.c.bf16 %v1504_v52, %v2749_v3  ;;  %v1350_v16 = vadd.f32 %v2147_v36, %v1349_v51  ;;  %2158 = vrcp.f32 %v2802_v56  ;;  %vm1353_vm0 = vmor %vm1351_vm15, %vm1352_vm13  ;;  %v1358_v1 = vor.u32 1.1754944e-38, %v1357_v43 }
  0xfb   : > { %v1344_v23 = vsel %vm1341_vm14, %v1343_v54, %v1339_v27  ;;  %2033 = vst [vmem:[%s2540_s15 + $0x28] sm:$0xff] %v1962_v22   ;;  %vm1356_vm1 = vcmp.eq.f32.partialorder %v1355_v41, 8.507059e+37  ;;  %v1821_v61 = vmul.f32 -1.442695, %v786_v53  ;;  %v794_v9 = vadd.f32 %v2338_v24, %v630_v30 }
  0xfc   : > { %v2153_v38 = vpop.eup %2152  ;;  %2037 = vst [vmem:[%s2540_s15 + $0x48] sm:$0xff] %v1982_v0   ;;  %v1354_v58 = vsel %vm1353_vm0, %v2147_v36, %v1350_v16  ;;  %v1511_v6 = vmul.f32 %v1924_v8, %v1344_v23  ;;  %v802_v63 = vadd.f32 %v2338_v24, %v650_v2  ;;  %v1010_v27 = vand.u32 2147483647, %v2798_v19 }
  0xfd   : > { %v2155_v49 = vpop.eup %2154  ;;  %v1359_v15 = vsel %vm1356_vm1, %v1358_v1, %v1354_v58  ;;  %v2821_v60 = vadd.f32 1.0, %v2153_v38  ;;  %2160 = vpow2.f32 %v1821_v61  ;;  %v1829_v13 = vmul.f32 -1.442695, %v794_v9 }
  0xfe   : > { %v1512_v59 = vmul.f32 %v1925_v25, %v1359_v15  ;;  %v2830_v8 = vadd.f32 1.0, %v2155_v49  ;;  %v1837_v35 = vmul.f32 -1.442695, %v802_v63  ;;  %v1012_v36 = vand.u32 2147483648, %v2798_v19 }
  0xff   : > { %v2823_v7 = vpop.eup %2156  ;;  %2162 = vrcp.f32 %v2821_v60  ;;  %v1880_v37 = vunpack.c.l.bf16 %v2839_v17  ;;  %v1896_v39 = vunpack.c.l.bf16 %v2842_v18  ;;  %v1912_v41 = vunpack.c.l.bf16 %v2845_v21 }
 0x100   : > { %v2826_v3 = vpop.eup %2158  ;;  %v2002_v10 = vpack.c.bf16 %v1512_v59, %v1511_v6  ;;  %v1002_v45 = vmul.f32 %v2823_v7, %v2798_v19  ;;  %2164 = vrcp.f32 %v2830_v8  ;;  %v1130_v14 = vand.u32 2147483647, %v2802_v56 }
 0x101   : > { %v1122_v12 = vmul.f32 %v2826_v3, %v2802_v56  ;;  %2166 = vpow2.f32 %v1829_v13  ;;  %v1132_v29 = vand.u32 2147483648, %v2802_v56  ;;  %v1928_v44 = vunpack.c.l.bf16 %v2852_v32  ;;  %v633_v40 = vpop.f32.mrf.mxu1 }
 0x102   : > { %2041 = vst [vmem:[%s2540_s15 + $0x68] sm:$0xff] %v2002_v10   ;;  %v1003_v25 = vsub.f32 1.0, %v1002_v45  ;;  %v810_v43 = vadd.f32 %v2338_v24, %v670_v31  ;;  %vm1006_vm2 = vweird.f32 %v2798_v19  ;;  %vm1007_vm3 = vweird.f32 %v2823_v7 }
 0x103   : > { %v2161_v50 = vpop.eup %2160  ;;  %v1123_v26 = vsub.f32 1.0, %v1122_v12  ;;  %vm2870_vm4 = vcmp.eq.f32.partialorder %v1010_v27, 8.507059e+37  ;;  %vm1126_vm5 = vweird.f32 %v2802_v56  ;;  %v1013_v20 = vor.u32 1.1754944e-38, %v1012_v36  ;;  %vm2884_vm6 = vmor %vm1006_vm2, %vm1007_vm3  ;;  %v653_v12 = vpop.f32.mrf.mxu2 }
 0x104   : > { %v2847_v62 = vadd.f32 1.0, %v2161_v50  ;;  %v1004_v57 = vmul.f32 %v2823_v7, %v1003_v25  ;;  %v1252_v47 = vand.u32 2147483648, %v2821_v60  ;;  %v1881_v34 = vunpack.c.h.bf16 %v2839_v17 }
 0x105   : > { %v2855_v4 = vpop.eup %2162  ;;  %v1124_v46 = vmul.f32 %v2826_v3, %v1123_v26  ;;  %vm2888_vm7 = vcmp.eq.f32.partialorder %v1130_v14, 8.507059e+37  ;;  %v1133_v54 = vor.u32 1.1754944e-38, %v1132_v29  ;;  %v1250_v22 = vand.u32 2147483647, %v2821_v60 }
 0x106   : > { %2168 = vrcp.f32 %v2847_v62  ;;  %v2865_v55 = vpop.eup %2164  ;;  %v1005_v33 = vadd.f32 %v2823_v7, %v1004_v57  ;;  %v1242_v28 = vmul.f32 %v2855_v4, %v2821_v60  ;;  %v1845_v0 = vmul.f32 -1.442695, %v810_v43 }
 0x107   : > { %v2167_v42 = vpop.eup %2166  ;;  %2170 = vpow2.f32 %v1837_v35  ;;  %v787_v16 = vadd.f32 %v2338_v24, %v613_v11  ;;  %v1362_v19 = vmul.f32 %v2865_v55, %v2830_v8  ;;  %v1125_v38 = vadd.f32 %v2826_v3, %v1124_v46 }
 0x108   : > { %v2880_v48 = vadd.f32 1.0, %v2167_v42  ;;  %v1009_v23 = vsel %vm2884_vm6, %v2823_v7, %v1005_v33  ;;  %vm1127_vm8 = vweird.f32 %v2826_v3  ;;  %v1243_v58 = vsub.f32 1.0, %v1242_v28 }
 0x109   : > { %v795_v61 = vadd.f32 %v2338_v24, %v633_v40  ;;  %v2904_v30 = vor.u32 1.1754944e-38, %v1252_v47  ;;  %v1025_v15 = vand.u32 2147483647, %v2847_v62  ;;  %v1897_v6 = vunpack.c.h.bf16 %v2842_v18  ;;  %vm2913_vm9 = vmor %vm1126_vm5, %vm1127_vm8 }
 0x10a   : > { %2172 = vrcp.f32 %v2880_v48  ;;  %v1014_v7 = vsel %vm2870_vm4, %v1013_v20, %v1009_v23  ;;  %v1027_v9 = vand.u32 2147483648, %v2847_v62  ;;  %v1822_v10 = vmul.f32 -1.442695, %v787_v16  ;;  %v615_v20 = vpop.f32.mrf.mxu0 }
 0x10b   : > { %2174 = vpow2.f32 %v1845_v0  ;;  %vm1246_vm10 = vweird.f32 %v2821_v60  ;;  %v1363_v24 = vsub.f32 1.0, %v1362_v19  ;;  %v1129_v13 = vsel %vm2913_vm9, %v2826_v3, %v1125_v38  ;;  %v2933_v3 = vld [vmem:[%s3179_s2] ss:$0 sm:$0xff] }
 0x10c   : > { %v2169_v52 = vpop.eup %2168  ;;  %v1244_v63 = vmul.f32 %v2855_v4, %v1243_v58  ;;  %2176 = vpow2.f32 %v1822_v10  ;;  %v1830_v56 = vmul.f32 -1.442695, %v795_v61  ;;  %vm1247_vm12 = vweird.f32 %v2855_v4 }
 0x10d   : > { %v1017_v1 = vmul.f32 %v2169_v52, %v2847_v62  ;;  %v2171_v59 = vpop.eup %2170  ;;  %vm1022_vm11 = vweird.f32 %v2169_v52  ;;  %vm1021_vm13 = vweird.f32 %v2847_v62  ;;  %v1489_v27 = vmul.f32 %v1880_v37, %v1014_v7  ;;  %v673_v37 = vpop.f32.mrf.mxu3  ;;  %vm2961_vm4 = vmor %vm1246_vm10, %vm1247_vm12 }
 0x10e   : > { %v2918_v25 = vadd.f32 1.0, %v2171_v59  ;;  %vm1023_vm14 = vmor %vm1021_vm13, %vm1022_vm11  ;;  %v1028_v31 = vor.u32 1.1754944e-38, %v1027_v9  ;;  %v803_v35 = vadd.f32 %v2933_v3, %v653_v12  ;;  %v1134_v36 = vsel %vm2888_vm7, %v1133_v54, %v1129_v13 }
 0x10f   : > { %v1018_v49 = vsub.f32 1.0, %v1017_v1  ;;  %v1364_v62 = vmul.f32 %v2865_v55, %v1363_v24  ;;  %vm1367_vm15 = vweird.f32 %v2865_v55  ;;  %vm1026_vm0 = vcmp.eq.f32.partialorder %v1025_v15, 8.507059e+37 }
 0x110   : > { %v2173_v50 = vpop.eup %2172  ;;  %2178 = vrcp.f32 %v2918_v25  ;;  %v1245_v29 = vadd.f32 %v2855_v4, %v1244_v63  ;;  %vm2941_vm1 = vcmp.eq.f32.partialorder %v1250_v22, 8.507059e+37  ;;  %vm1366_vm2 = vweird.f32 %v2830_v8 }
 0x111   : > { %v1019_v2 = vmul.f32 %v2169_v52, %v1018_v49  ;;  %v1137_v26 = vmul.f32 %v2173_v50, %v2880_v48  ;;  %v2175_v14 = vpop.eup %2174  ;;  %2180 = vpow2.f32 %v1830_v56  ;;  %v1145_v42 = vand.u32 2147483647, %v2880_v48  ;;  %vm2991_vm10 = vmor %vm1366_vm2, %vm1367_vm15 }
 0x112   : > { %v1147_v46 = vand.u32 2147483648, %v2880_v48  ;;  %v2948_v28 = vadd.f32 1.0, %v2175_v14  ;;  %v2177_v47 = vpop.eup %2176  ;;  %vm1142_vm3 = vweird.f32 %v2173_v50  ;;  %v811_v51 = vadd.f32 %v2933_v3, %v673_v37 }
 0x113   : > { %v1020_v57 = vadd.f32 %v2169_v52, %v1019_v2  ;;  %v1138_v5 = vsub.f32 1.0, %v1137_v26  ;;  %v1497_v54 = vmul.f32 %v1896_v39, %v1134_v36  ;;  %vm1141_vm5 = vweird.f32 %v2880_v48 }
 0x114   : > { %2182 = vrcp.f32 %v2948_v28  ;;  %v788_v39 = vadd.f32 %v2933_v3, %v615_v20  ;;  %v1249_v19 = vsel %vm2961_vm4, %v2855_v4, %v1245_v29  ;;  %vm1143_vm6 = vmor %vm1141_vm5, %vm1142_vm3  ;;  %vm1146_vm7 = vcmp.eq.f32.partialorder %v1145_v42, 8.507059e+37 }
 0x115   : > { %v1024_v17 = vsel %vm1023_vm14, %v2169_v52, %v1020_v57  ;;  %v1139_v40 = vmul.f32 %v2173_v50, %v1138_v5  ;;  %v1838_v52 = vmul.f32 -1.442695, %v803_v35  ;;  %v1148_v60 = vor.u32 1.1754944e-38, %v1147_v46 }
 0x116   : > { %v1029_v33 = vsel %vm1026_vm0, %v1028_v31, %v1024_v17  ;;  %v2179_v53 = vpop.eup %2178  ;;  %v2973_v1 = vadd.f32 1.0, %v2177_v47  ;;  %v1846_v48 = vmul.f32 -1.442695, %v811_v51  ;;  %v1265_v15 = vand.u32 2147483647, %v2918_v25  ;;  %v635_v17 = vpop.f32.mrf.mxu1 }
 0x117   : > { %v1490_v11 = vmul.f32 %v1881_v34, %v1029_v33  ;;  %v2954_v34 = vadd.f32 %v2865_v55, %v1364_v62  ;;  %v1140_v16 = vadd.f32 %v2173_v50, %v1139_v40  ;;  %v1257_v23 = vmul.f32 %v2179_v53, %v2918_v25  ;;  %v2181_v38 = vpop.eup %2180 }
 0x118   : > { %2184 = vpow2.f32 %v1838_v52  ;;  %v1267_v59 = vand.u32 2147483648, %v2918_v25  ;;  %vm1262_vm8 = vweird.f32 %v2179_v53  ;;  %v1823_v9 = vmul.f32 -1.442695, %v788_v39  ;;  %v675_v39 = vpop.f32.mrf.mxu3 }
 0x119   : > { %v1947_v22 = vpack.c.bf16 %v1490_v11, %v1489_v27  ;;  %v1144_v58 = vsel %vm1143_vm6, %v2173_v50, %v1140_v16  ;;  %v1258_v61 = vsub.f32 1.0, %v1257_v23  ;;  %2186 = vrcp.f32 %v2973_v1  ;;  %v655_v23 = vpop.f32.mrf.mxu2 }
 0x11a   : > { %v1149_v49 = vsel %vm1146_vm7, %v1148_v60, %v1144_v58  ;;  %v2183_v10 = vpop.eup %2182  ;;  %v1254_v45 = vsel %vm2941_vm1, %v2904_v30, %v1249_v19  ;;  %vm1261_vm9 = vweird.f32 %v2918_v25  ;;  %v1913_v24 = vunpack.c.h.bf16 %v2845_v21  ;;  %v3038_v60 = vld [vmem:[%s2352_s12 + $0x38] sm:$0xff]  }
 0x11b   : > { %2030 = vst [vmem:[%s2540_s15 + $0x10] sm:$0xff] %v1947_v22   ;;  %v1498_v4 = vmul.f32 %v1897_v6, %v1149_v49  ;;  %v1259_v7 = vmul.f32 %v2179_v53, %v1258_v61  ;;  %v2985_v2 = vadd.f32 1.0, %v2181_v38  ;;  %v1377_v13 = vmul.f32 %v2183_v10, %v2948_v28  ;;  %vm1263_vm11 = vmor %vm1261_vm9, %vm1262_vm8 }
 0x11c   : > { %2188 = vpow2.f32 %v1846_v48  ;;  %v1369_v30 = vsel %vm2991_vm10, %v2865_v55, %v2954_v34  ;;  %v1370_v25 = vand.u32 2147483647, %v2830_v8  ;;  %v1372_v63 = vand.u32 2147483648, %v2830_v8 }
 0x11d   : > { %v1967_v6 = vpack.c.bf16 %v1498_v4, %v1497_v54  ;;  %v1260_v12 = vadd.f32 %v2179_v53, %v1259_v7  ;;  %v1268_v56 = vor.u32 1.1754944e-38, %v1267_v59  ;;  %vm1266_vm12 = vcmp.eq.f32.partialorder %v1265_v15, 8.507059e+37 }
 0x11e   : > { %v2185_v50 = vpop.eup %2184  ;;  %v1378_v27 = vsub.f32 1.0, %v1377_v13  ;;  %2190 = vpow2.f32 %v1823_v9  ;;  %v1505_v26 = vmul.f32 %v1912_v41, %v1254_v45  ;;  %v1387_v55 = vand.u32 2147483648, %v2948_v28 }
 0x11f   : > { %2034 = vst [vmem:[%s2540_s15 + $0x30] sm:$0xff] %v1967_v6   ;;  %v1264_v57 = vsel %vm1263_vm11, %v2179_v53, %v1260_v12  ;;  %v3004_v31 = vpop.eup %2186  ;;  %2192 = vrcp.f32 %v2985_v2  ;;  %vm1382_vm13 = vweird.f32 %v2183_v10  ;;  %v1385_v62 = vand.u32 2147483647, %v2948_v28  ;;  %v3059_v6 = vld [vmem:[%s2352_s12 + $0x58] sm:$0xff]  }
 0x120   : > { %v1269_v35 = vsel %vm1266_vm12, %v1268_v56, %v1264_v57  ;;  %v1379_v36 = vmul.f32 %v2183_v10, %v1378_v27  ;;  %vm1371_vm14 = vcmp.eq.f32.partialorder %v1370_v25, 8.507059e+37  ;;  %v1373_v37 = vor.u32 1.1754944e-38, %v1372_v63 }
 0x121   : > { %v1506_v8 = vmul.f32 %v1913_v24, %v1269_v35  ;;  %v1929_v14 = vunpack.c.h.bf16 %v2852_v32  ;;  %v1032_v21 = vmul.f32 %v3004_v31, %v2973_v1  ;;  %vm1381_vm15 = vweird.f32 %v2948_v28  ;;  %v2016_v32 = vld [vmem:[%s2352_s12 + $0x18] sm:$0xff]  }
 0x122   : > { %v2189_v41 = vpop.eup %2188  ;;  %v1380_v43 = vadd.f32 %v2183_v10, %v1379_v36  ;;  %v3015_v33 = vadd.f32 1.0, %v2185_v50  ;;  %v1374_v5 = vsel %vm1371_vm14, %v1373_v37, %v1369_v30  ;;  %vm1383_vm0 = vmor %vm1381_vm15, %vm1382_vm13  ;;  %v1388_v11 = vor.u32 1.1754944e-38, %v1387_v55  ;;  %v3077_v37 = vld [vmem:[%s2352_s12 + $0x78] sm:$0xff]  }
 0x123   : > { %v1987_v29 = vpack.c.bf16 %v1506_v8, %v1505_v26  ;;  %v796_v42 = vadd.f32 %v2933_v3, %v635_v17  ;;  %vm1386_vm1 = vcmp.eq.f32.partialorder %v1385_v62, 8.507059e+37  ;;  %v1033_v52 = vsub.f32 1.0, %v1032_v21 }
 0x124   : > { %v2191_v46 = vpop.eup %2190  ;;  %v1384_v20 = vsel %vm1383_vm0, %v2183_v10, %v1380_v43  ;;  %v3021_v51 = vadd.f32 1.0, %v2189_v41  ;;  %v1513_v53 = vmul.f32 %v1928_v44, %v1374_v5  ;;  %2194 = vrcp.f32 %v3015_v33 }
 0x125   : > { %2038 = vst [vmem:[%s2540_s15 + $0x50] sm:$0xff] %v1987_v29   ;;  %v3019_v47 = vpop.eup %2192  ;;  %v1389_v40 = vsel %vm1386_vm1, %v1388_v11, %v1384_v20  ;;  %v3023_v28 = vadd.f32 1.0, %v2191_v46  ;;  %v1831_v34 = vmul.f32 -1.442695, %v796_v42  ;;  %v1034_v16 = vmul.f32 %v3004_v31, %v1033_v52 }
 0x126   : > { %v1514_v54 = vmul.f32 %v1929_v14, %v1389_v40  ;;  %v1152_v0 = vmul.f32 %v3019_v47, %v2985_v2  ;;  %v804_v38 = vadd.f32 %v2933_v3, %v655_v23  ;;  %vm1036_vm2 = vweird.f32 %v2973_v1 }
 0x127   : > { %2196 = vrcp.f32 %v3023_v28  ;;  %v1035_v61 = vadd.f32 %v3004_v31, %v1034_v16  ;;  %vm1037_vm3 = vweird.f32 %v3004_v31  ;;  %v812_v48 = vadd.f32 %v2933_v3, %v675_v39 }
 0x128   : > { %v2007_v22 = vpack.c.bf16 %v1514_v54, %v1513_v53  ;;  %2198 = vrcp.f32 %v3021_v51  ;;  %v1153_v19 = vsub.f32 1.0, %v1152_v0  ;;  %v1884_v49 = vunpack.c.l.bf16 %v2016_v32  ;;  %vm3051_vm4 = vmor %vm1036_vm2, %vm1037_vm3 }
 0x129   : > { %2200 = vpow2.f32 %v1831_v34  ;;  %v1839_v59 = vmul.f32 -1.442695, %v804_v38  ;;  %v1040_v7 = vand.u32 2147483647, %v2973_v1  ;;  %v1042_v9 = vand.u32 2147483648, %v2973_v1 }
 0x12a   : > { %2042 = vst [vmem:[%s2540_s15 + $0x70] sm:$0xff] %v2007_v22   ;;  %v3035_v44 = vpop.eup %2194  ;;  %v1900_v10 = vunpack.c.l.bf16 %v3038_v60  ;;  %v1847_v45 = vmul.f32 -1.442695, %v812_v48  ;;  %v1154_v18 = vmul.f32 %v3019_v47, %v1153_v19  ;;  %v1039_v1 = vsel %vm3051_vm4, %v3004_v31, %v1035_v61 }
 0x12b   : > { %v1272_v3 = vmul.f32 %v3035_v44, %v3015_v33  ;;  %2202 = vpow2.f32 %v1839_v59  ;;  %v1055_v30 = vand.u32 2147483647, %v3023_v28  ;;  %v1057_v25 = vand.u32 2147483648, %v3023_v28 }
 0x12c   : > { %2204 = vpow2.f32 %v1847_v45  ;;  %vm1041_vm6 = vcmp.eq.f32.partialorder %v1040_v7, 8.507059e+37  ;;  %v1043_v57 = vor.u32 1.1754944e-38, %v1042_v9  ;;  %v1916_v27 = vunpack.c.l.bf16 %v3059_v6 }
 0x12d   : > { %v2197_v58 = vpop.eup %2196  ;;  %v1885_v26 = vunpack.c.h.bf16 %v2016_v32  ;;  %vm1156_vm7 = vweird.f32 %v2985_v2  ;;  %vm1051_vm8 = vweird.f32 %v3023_v28  ;;  %vm1157_vm9 = vweird.f32 %v3019_v47 }
 0x12e   : > { %v1047_v15 = vmul.f32 %v2197_v58, %v3023_v28  ;;  %v3046_v4 = vpop.eup %2198  ;;  %vm1052_vm5 = vweird.f32 %v2197_v58  ;;  %v1044_v35 = vsel %vm1041_vm6, %v1043_v57, %v1039_v1  ;;  %v1273_v55 = vsub.f32 1.0, %v1272_v3  ;;  %vm3090_vm12 = vmor %vm1156_vm7, %vm1157_vm9 }
 0x12f   : > { %v2201_v13 = vpop.eup %2200  ;;  %v1392_v63 = vmul.f32 %v3046_v4, %v3021_v51  ;;  %vm1053_vm10 = vmor %vm1051_vm8, %vm1052_vm5  ;;  %v1058_v8 = vor.u32 1.1754944e-38, %v1057_v25  ;;  %v1155_v62 = vadd.f32 %v3019_v47, %v1154_v18  ;;  %vm1056_vm11 = vcmp.eq.f32.partialorder %v1055_v30, 8.507059e+37 }
 0x130   : > { %v1048_v12 = vsub.f32 1.0, %v1047_v15  ;;  %v3068_v50 = vadd.f32 1.0, %v2201_v13  ;;  %v1160_v41 = vand.u32 2147483647, %v2985_v2  ;;  %v1162_v29 = vand.u32 2147483648, %v2985_v2 }
 0x131   : > { %v2203_v36 = vpop.eup %2202  ;;  %v1393_v17 = vsub.f32 1.0, %v1392_v63  ;;  %v1491_v11 = vmul.f32 %v1884_v49, %v1044_v35  ;;  %v1282_v42 = vand.u32 2147483648, %v3015_v33  ;;  %v1274_v52 = vmul.f32 %v3035_v44, %v1273_v55 }
 0x132   : > { %v1049_v56 = vmul.f32 %v2197_v58, %v1048_v12  ;;  %2206 = vrcp.f32 %v3068_v50  ;;  %v2205_v21 = vpop.eup %2204  ;;  %v3081_v5 = vadd.f32 1.0, %v2203_v36  ;;  %v1280_v28 = vand.u32 2147483647, %v3015_v33 }
 0x133   : > { %v3084_v20 = vadd.f32 1.0, %v2205_v21  ;;  %v1932_v53 = vunpack.c.l.bf16 %v3077_v37  ;;  %v1159_v34 = vsel %vm3090_vm12, %v3019_v47, %v1155_v62  ;;  %v1394_v2 = vmul.f32 %v3046_v4, %v1393_v17 }
 0x134   : > { %v1050_v31 = vadd.f32 %v2197_v58, %v1049_v56  ;;  %2208 = vrcp.f32 %v3081_v5  ;;  %v1163_v0 = vor.u32 1.1754944e-38, %v1162_v29  ;;  %v1400_v16 = vand.u32 2147483647, %v3021_v51 }
 0x135   : > { %2210 = vrcp.f32 %v3084_v20  ;;  %v1402_v23 = vand.u32 2147483648, %v3021_v51  ;;  %vm1161_vm13 = vcmp.eq.f32.partialorder %v1160_v41, 8.507059e+37  ;;  %vm1276_vm14 = vweird.f32 %v3015_v33 }
 0x136   : > { %v1054_v14 = vsel %vm1053_vm10, %v2197_v58, %v1050_v31  ;;  %v1283_v32 = vor.u32 1.1754944e-38, %v1282_v42  ;;  %vm1396_vm15 = vweird.f32 %v3021_v51  ;;  %v1164_v47 = vsel %vm1161_vm13, %v1163_v0, %v1159_v34 }
 0x137   : > { %v1059_v43 = vsel %vm1056_vm11, %v1058_v8, %v1054_v14  ;;  %v1275_v19 = vadd.f32 %v3035_v44, %v1274_v52  ;;  %vm1277_vm0 = vweird.f32 %v3035_v44  ;;  %vm3111_vm1 = vcmp.eq.f32.partialorder %v1280_v28, 8.507059e+37 }
 0x138   : > { %v1492_v46 = vmul.f32 %v1885_v26, %v1059_v43  ;;  %v2207_v54 = vpop.eup %2206  ;;  %v1395_v61 = vadd.f32 %v3046_v4, %v1394_v2  ;;  %vm1397_vm2 = vweird.f32 %v3046_v4  ;;  %v1175_v48 = vand.u32 2147483647, %v3068_v50  ;;  %vm3127_vm5 = vmor %vm1276_vm14, %vm1277_vm0 }
 0x139   : > { %v1167_v39 = vmul.f32 %v2207_v54, %v3068_v50  ;;  %v1177_v49 = vand.u32 2147483648, %v3068_v50  ;;  %vm3119_vm3 = vcmp.eq.f32.partialorder %v1400_v16, 8.507059e+37  ;;  %v1403_v7 = vor.u32 1.1754944e-38, %v1402_v23  ;;  %vm3141_vm6 = vmor %vm1396_vm15, %vm1397_vm2 }
 0x13a   : > { %v1952_v22 = vpack.c.bf16 %v1492_v46, %v1491_v11  ;;  %v2209_v15 = vpop.eup %2208  ;;  %vm1172_vm4 = vweird.f32 %v2207_v54  ;;  %v1499_v24 = vmul.f32 %v1900_v10, %v1164_v47  ;;  %v1901_v3 = vunpack.c.h.bf16 %v3038_v60 }
 0x13b   : > { %v1168_v58 = vsub.f32 1.0, %v1167_v39  ;;  %v2211_v45 = vpop.eup %2210  ;;  %v1287_v12 = vmul.f32 %v2209_v15, %v3081_v5  ;;  %v1917_v13 = vunpack.c.h.bf16 %v3059_v6  ;;  %v1279_v1 = vsel %vm3127_vm5, %v3035_v44, %v1275_v19 }
 0x13c   : > { %2031 = vst [vmem:[%s2540_s15 + $0x18] sm:$0xff] %v1952_v22   ;;  %vm1171_vm7 = vweird.f32 %v3068_v50  ;;  %v1407_v60 = vmul.f32 %v2211_v45, %v3084_v20  ;;  %v1399_v30 = vsel %vm3141_vm6, %v3046_v4, %v1395_v61  ;;  %vm1176_vm9 = vcmp.eq.f32.partialorder %v1175_v48, 8.507059e+37 }
 0x13d   : > { %v1169_v9 = vmul.f32 %v2207_v54, %v1168_v58  ;;  %vm1173_vm8 = vmor %vm1171_vm7, %vm1172_vm4  ;;  %v1178_v44 = vor.u32 1.1754944e-38, %v1177_v49  ;;  %v1288_v25 = vsub.f32 1.0, %v1287_v12  ;;  %v1295_v51 = vand.u32 2147483647, %v3081_v5 }
 0x13e   : > { %v1297_v56 = vand.u32 2147483648, %v3081_v5  ;;  %v1408_v57 = vsub.f32 1.0, %v1407_v60  ;;  %vm1292_vm10 = vweird.f32 %v2209_v15  ;;  %v1417_v50 = vand.u32 2147483648, %v3084_v20 }
 0x13f   : > { %v1170_v10 = vadd.f32 %v2207_v54, %v1169_v9  ;;  %v1289_v31 = vmul.f32 %v2209_v15, %v1288_v25  ;;  %vm1412_vm11 = vweird.f32 %v2211_v45  ;;  %v1415_v4 = vand.u32 2147483647, %v3084_v20 }
 0x140   : > { %v1409_v55 = vmul.f32 %v2211_v45, %v1408_v57  ;;  %v1284_v8 = vsel %vm3111_vm1, %v1283_v32, %v1279_v1  ;;  %vm1291_vm12 = vweird.f32 %v3081_v5  ;;  %v1933_v62 = vunpack.c.h.bf16 %v3077_v37 }
 0x141   : > { %v1174_v63 = vsel %vm1173_vm8, %v2207_v54, %v1170_v10  ;;  %v1290_v36 = vadd.f32 %v2209_v15, %v1289_v31  ;;  %vm1293_vm13 = vmor %vm1291_vm12, %vm1292_vm10  ;;  %v1298_v14 = vor.u32 1.1754944e-38, %v1297_v56  ;;  %vm1411_vm14 = vweird.f32 %v3084_v20 }
 0x142   : > { %v1179_v26 = vsel %vm1176_vm9, %v1178_v44, %v1174_v63  ;;  %v1410_v21 = vadd.f32 %v2211_v45, %v1409_v55  ;;  %v1404_v41 = vsel %vm3119_vm3, %v1403_v7, %v1399_v30  ;;  %vm1296_vm15 = vcmp.eq.f32.partialorder %v1295_v51, 8.507059e+37  ;;  %vm1413_vm0 = vmor %vm1411_vm14, %vm1412_vm11 }
 0x143   : > { %v1500_v35 = vmul.f32 %v1901_v3, %v1179_v26  ;;  %v1294_v29 = vsel %vm1293_vm13, %v2209_v15, %v1290_v36  ;;  %v1418_v43 = vor.u32 1.1754944e-38, %v1417_v50  ;;  %vm1416_vm1 = vcmp.eq.f32.partialorder %v1415_v4, 8.507059e+37 }
 0x144   : > { %v1299_v11 = vsel %vm1296_vm15, %v1298_v14, %v1294_v29  ;;  %v1414_v5 = vsel %vm1413_vm0, %v2211_v45, %v1410_v21  ;;  %v1507_v42 = vmul.f32 %v1916_v27, %v1284_v8  ;;  %v1515_v20 = vmul.f32 %v1932_v53, %v1404_v41 }
 0x145   : > { %v1972_v17 = vpack.c.bf16 %v1500_v35, %v1499_v24  ;;  %v1508_v46 = vmul.f32 %v1917_v13, %v1299_v11  ;;  %v1419_v40 = vsel %vm1416_vm1, %v1418_v43, %v1414_v5 }
 0x146   : > { %v1516_v52 = vmul.f32 %v1933_v62, %v1419_v40 }
 0x147   : > { %2035 = vst [vmem:[%s2540_s15 + $0x38] sm:$0xff] %v1972_v17   ;;  %v1992_v28 = vpack.c.bf16 %v1508_v46, %v1507_v42 }
 0x148   : > { %v2012_v54 = vpack.c.bf16 %v1516_v52, %v1515_v20 }
 0x149   : > { %2039 = vst [vmem:[%s2540_s15 + $0x58] sm:$0xff] %v1992_v28  }
 0x14a   : > { %2043 = vst [vmem:[%s2540_s15 + $0x78] sm:$0xff] %v2012_v54  }
 0x14b PF: > { %s14_s17 = sadd.s32 1, %s2235_s17   ;;  %s3250_s15 = smov %s2231_s16 }
 0x14c   : > { %p11_p5 = scmp.ge.s32.totalorder %s14_s17, 10   ;;  %s3251_s16 = smov %s3253_s18 }
 0x14e   :  { %13 = sbr.rel (!%p11_p5) target bundleno = 2 (0x2), region = 83 }

// kernel: deyolov6_forward.13
= control target key start
LH: loop header
LB: loop body
LE: loop exit
PB: predicated region body
PF: predicated region fallthrough
CT: control target
= control target key end

     0   :  { %s2002_s12 = smov 0   ;;  %s2004_s13 = smov 0   ;;  %s2906_s0 = inlined_call_operand.vmem [shape: bf16[512,27], index: 0, kind: input, shape index: {}]   ;;  %s2907_s1 = inlined_call_operand.vmem [shape: bf16[27,128], index: 1, kind: input, shape index: {}]   ;;  %s2908_s2 = inlined_call_operand.vmem [shape: f32[1,128], index: 2, kind: input, shape index: {}]   ;;  %s2909_s3 = inlined_call_operand.vmem [shape: bf16[512,128], index: 3, kind: output, shape index: {}]  }
   0x1   :  { %s2006_s14 = smov 0  }
   0x2 LB: > { %s32_s15 = sadd.s32 1, %s1975_s13  ;;  %p1556_p0 = scmp.ge.s32.totalorder %s1979_s14, 1  ;;  %s1979_s14 = sphi %s2006_s14, %s13_s14   ;;  %s1975_s13 = sphi %s2004_s13, %s2983_s13   ;;  %s1971_s12 = sphi %s2002_s12, %s2982_s12  }
   0x3   : > { %p34_p1 = scmp.ge.s32.totalorder %s32_s15, 2  ;;  %p188_p2 = scmp.lt.s32.totalorder %s1979_s14, 3 }
   0x5   : > { %s2985_s15 = smov (%p34_p1, %s32_s15), 0  ;;  %p189_p3 = pnand %p1556_p0, %p188_p2 }
   0x6   : > { %s1557_s20 = sshll.u32 (!%p189_p3), %s1971_s12, 5 }
   0x7   : > { %192 = sbr.rel (%p189_p3) target bundleno = 316 (0x13c), region = 32  ;;  %p230_p4 = scmp.lt.s32.totalorder (!%p189_p3), %s1557_s20, 63 }
   0xc   : > { %v1631_v0 = vld [vmem:[%s2907_s1 + $0x8] sm:$0xf]  ;;  %v1700_v1 = vld [vmem:[%s2907_s1 + $0x8] sm:$0x30]  ;;  %vm504_vm0 = vcmask 1044480   ;;  %vm505_vm1 = vcmask 1045504  }
   0xd   : > { %v1632_v2 = vor.u32 %v1700_v1, %v1631_v0  ;;  %v1981_v3 = vmov 65535   ;;  %s2987_s20 = smov (!%p230_p4, %s1557_s20), 63  ;;  %v1699_v7 = vld [vmem:[%s2907_s1] sm:$0xff]  ;;  %vm455_vm2 = vcmask 220160  }
   0xe   : > { %v506_v4 = vsel %vm504_vm0, 4294967295, %v1981_v3  ;;  %s1558_s23 = sshll.u32 %s2987_s20, 2  ;;  %v2074_v24 = vld [vmem:[%s2908_s2] ss:$0 sm:$0xff] }
   0xf   : > { %v507_v5 = vsel %vm505_vm1, %v506_v4, 0  ;;  %s2037_s26 = scalar_lea.vmem %s2906_s0, %s1558_s23  ;;  %s2296_s4 = scalar_lea.vmem %s2909_s3, %s1558_s23 }
  0x10   : > { %v509_v6 = vand.u32 %v1632_v2, %v507_v5  ;;  %v1683_v8 = vld [vmem:[%s2037_s26] sm:$0xff]  ;;  %v1684_v12 = vld [vmem:[%s2037_s26 + $0x8] sm:$0xff]  ;;  %v1685_v16 = vld [vmem:[%s2037_s26 + $0x10] sm:$0xff] }
  0x11   : > { %v1687_v9 = vld [vmem:[%s2037_s26 + $0x20] sm:$0xff]  ;;  %v1688_v13 = vld [vmem:[%s2037_s26 + $0x28] sm:$0xff]  ;;  %v1689_v17 = vld [vmem:[%s2037_s26 + $0x30] sm:$0xff] }
  0x12   : > { %517 = vmatpush.bf16.msra.mxu0 %v509_v6  ;;  %1796 = vmatpush.bf16.msra.mxu1 %v509_v6  ;;  %v1691_v10 = vld [vmem:[%s2037_s26 + $0x40] sm:$0xff]  ;;  %v1692_v14 = vld [vmem:[%s2037_s26 + $0x48] sm:$0xff]  ;;  %v1693_v18 = vld [vmem:[%s2037_s26 + $0x50] sm:$0xff] }
  0x13   : > { %1797 = vmatpush.bf16.msra.mxu2 %v509_v6  ;;  %1798 = vmatpush.bf16.msra.mxu3 %v509_v6  ;;  %v1695_v11 = vld [vmem:[%s2037_s26 + $0x60] sm:$0xff]  ;;  %v1696_v15 = vld [vmem:[%s2037_s26 + $0x68] sm:$0xff]  ;;  %v1697_v19 = vld [vmem:[%s2037_s26 + $0x70] sm:$0xff] }
  0x14   : > { %v1686_v20 = vld [vmem:[%s2037_s26 + $0x18] sm:$0xff] }
  0x15   : > { %v1690_v21 = vld [vmem:[%s2037_s26 + $0x38] sm:$0xff] }
  0x16   : > { %518 = vmatpush.bf16.msra.mxu0 %v1699_v7  ;;  %1799 = vmatpush.bf16.msra.mxu1 %v1699_v7  ;;  %v1694_v22 = vld [vmem:[%s2037_s26 + $0x58] sm:$0xff] }
  0x17   : > { %1800 = vmatpush.bf16.msra.mxu2 %v1699_v7  ;;  %1801 = vmatpush.bf16.msra.mxu3 %v1699_v7  ;;  %v1698_v23 = vld [vmem:[%s2037_s26 + $0x78] sm:$0xff] }
  0x19   : > { %1633 = vmatmul.msk.bf16.vlgmr.msra.gmra.mxu0 %vm455_vm2, %v1683_v8  ;;  %1637 = vmatmul.msk.bf16.vlgmr.msra.gmra.mxu1 %vm455_vm2, %v1687_v9 }
  0x1a   : > { %1641 = vmatmul.msk.bf16.vlgmr.msra.gmra.mxu2 %vm455_vm2, %v1691_v10  ;;  %1645 = vmatmul.msk.bf16.vlgmr.msra.gmra.mxu3 %vm455_vm2, %v1695_v11 }
  0x29   : > { %1634 = vmatmul.msk.bf16.gmra.mxu0 %vm455_vm2, %v1684_v12  ;;  %1638 = vmatmul.msk.bf16.gmra.mxu1 %vm455_vm2, %v1688_v13 }
  0x2a   : > { %1642 = vmatmul.msk.bf16.gmra.mxu2 %vm455_vm2, %v1692_v14  ;;  %1646 = vmatmul.msk.bf16.gmra.mxu3 %vm455_vm2, %v1696_v15 }
  0x39   : > { %1635 = vmatmul.msk.bf16.gmra.mxu0 %vm455_vm2, %v1685_v16  ;;  %1639 = vmatmul.msk.bf16.gmra.mxu1 %vm455_vm2, %v1689_v17 }
  0x3a   : > { %1643 = vmatmul.msk.bf16.gmra.mxu2 %vm455_vm2, %v1693_v18  ;;  %1647 = vmatmul.msk.bf16.gmra.mxu3 %vm455_vm2, %v1697_v19 }
  0x49   : > { %1636 = vmatmul.msk.bf16.gmra.mxu0 %vm455_vm2, %v1686_v20  ;;  %1640 = vmatmul.msk.bf16.gmra.mxu1 %vm455_vm2, %v1690_v21 }
  0x4a   : > { %1644 = vmatmul.msk.bf16.gmra.mxu2 %vm455_vm2, %v1694_v22  ;;  %1648 = vmatmul.msk.bf16.gmra.mxu3 %vm455_vm2, %v1698_v23 }
  0x96   : > { %v520_v25 = vpop.f32.mrf.mxu0  ;;  %v540_v26 = vpop.f32.mrf.mxu1 }
  0x97   : > { %v2077_v27 = vadd.f32 %v2074_v24, %v520_v25  ;;  %v2080_v28 = vadd.f32 %v2074_v24, %v540_v26 }
  0x99   : > { %v1649_v29 = vmul.f32 -1.442695, %v2077_v27  ;;  %v1657_v30 = vmul.f32 -1.442695, %v2080_v28 }
  0x9b   : > { %1828 = vpow2.f32 %v1649_v29 }
  0x9c   : > { %1830 = vpow2.f32 %v1657_v30 }
  0x9d   : > { %v560_v31 = vpop.f32.mrf.mxu2  ;;  %v580_v32 = vpop.f32.mrf.mxu3 }
  0x9e   : > { %v2085_v33 = vadd.f32 %v2074_v24, %v560_v31  ;;  %v2088_v34 = vadd.f32 %v2074_v24, %v580_v32  ;;  %v522_v35 = vpop.f32.mrf.mxu0  ;;  %v542_v36 = vpop.f32.mrf.mxu1 }
  0x9f   : > { %v2091_v37 = vadd.f32 %v2074_v24, %v522_v35  ;;  %v2094_v38 = vadd.f32 %v2074_v24, %v542_v36 }
  0xa0   : > { %v1665_v39 = vmul.f32 -1.442695, %v2085_v33  ;;  %v1673_v40 = vmul.f32 -1.442695, %v2088_v34 }
  0xa1   : > { %v1829_v41 = vpop.eup %1828  ;;  %v1650_v44 = vmul.f32 -1.442695, %v2091_v37  ;;  %v1658_v46 = vmul.f32 -1.442695, %v2094_v38 }
  0xa2   : > { %v1831_v42 = vpop.eup %1830  ;;  %v2098_v43 = vadd.f32 1.0, %v1829_v41  ;;  %1832 = vpow2.f32 %v1665_v39 }
  0xa3   : > { %v2101_v45 = vadd.f32 1.0, %v1831_v42  ;;  %1834 = vpow2.f32 %v1673_v40 }
  0xa4   : > { %1836 = vrcp.f32 %v2098_v43  ;;  %v872_v59 = vand.u32 2147483647, %v2098_v43  ;;  %v874_v60 = vand.u32 2147483648, %v2098_v43  ;;  %vm868_vm3 = vweird.f32 %v2098_v43 }
  0xa5   : > { %1838 = vrcp.f32 %v2101_v45  ;;  %v562_v47 = vpop.f32.mrf.mxu2  ;;  %v582_v48 = vpop.f32.mrf.mxu3  ;;  %vm988_vm4 = vweird.f32 %v2101_v45  ;;  %v992_v4 = vand.u32 2147483647, %v2101_v45  ;;  %v994_v5 = vand.u32 2147483648, %v2101_v45 }
  0xa6   : > { %1840 = vpow2.f32 %v1650_v44  ;;  %v2107_v49 = vadd.f32 %v2074_v24, %v562_v47  ;;  %v2110_v51 = vadd.f32 %v2074_v24, %v582_v48  ;;  %v525_v61 = vpop.f32.mrf.mxu0  ;;  %v545_v62 = vpop.f32.mrf.mxu1  ;;  %vm2141_vm5 = vcmp.eq.f32.partialorder %v872_v59, 8.507059e+37 }
  0xa7   : > { %1842 = vpow2.f32 %v1658_v46  ;;  %v2135_v7 = vadd.f32 %v2074_v24, %v525_v61  ;;  %v2138_v8 = vadd.f32 %v2074_v24, %v545_v62  ;;  %v875_v11 = vor.u32 1.1754944e-38, %v874_v60 }
  0xa8   : > { %v1833_v50 = vpop.eup %1832  ;;  %v1666_v56 = vmul.f32 -1.442695, %v2107_v49  ;;  %v1674_v1 = vmul.f32 -1.442695, %v2110_v51  ;;  %vm2155_vm7 = vcmp.eq.f32.partialorder %v992_v4, 8.507059e+37  ;;  %v995_v21 = vor.u32 1.1754944e-38, %v994_v5 }
  0xa9   : > { %v1835_v52 = vpop.eup %1834  ;;  %v2112_v53 = vadd.f32 1.0, %v1833_v50  ;;  %v1651_v23 = vmul.f32 -1.442695, %v2135_v7  ;;  %v2166_v25 = vmul.f32 -1.442695, %v2138_v8 }
  0xaa   : > { %v2114_v54 = vpop.eup %1836  ;;  %v2116_v55 = vadd.f32 1.0, %v1835_v52 }
  0xab   : > { %v2119_v57 = vpop.eup %1838  ;;  %v864_v58 = vmul.f32 %v2114_v54, %v2098_v43  ;;  %1844 = vrcp.f32 %v2112_v53  ;;  %vm869_vm6 = vweird.f32 %v2114_v54  ;;  %v1112_v15 = vand.u32 2147483647, %v2112_v53 }
  0xac   : > { %v1841_v63 = vpop.eup %1840  ;;  %v984_v0 = vmul.f32 %v2119_v57, %v2101_v45  ;;  %1846 = vrcp.f32 %v2116_v55  ;;  %v1114_v19 = vand.u32 2147483648, %v2112_v53  ;;  %v1234_v20 = vand.u32 2147483648, %v2116_v55  ;;  %vm2178_vm10 = vmor %vm868_vm3, %vm869_vm6 }
  0xad   : > { %v1843_v2 = vpop.eup %1842  ;;  %v865_v3 = vsub.f32 1.0, %v864_v58  ;;  %1848 = vpow2.f32 %v1666_v56  ;;  %v2145_v12 = vadd.f32 1.0, %v1841_v63  ;;  %v565_v26 = vpop.f32.mrf.mxu2  ;;  %vm989_vm8 = vweird.f32 %v2119_v57 }
  0xae   : > { %v985_v6 = vsub.f32 1.0, %v984_v0  ;;  %v2147_v13 = vadd.f32 1.0, %v1843_v2  ;;  %1850 = vpow2.f32 %v1674_v1  ;;  %vm1108_vm9 = vweird.f32 %v2112_v53  ;;  %vm2203_vm13 = vmor %vm988_vm4, %vm989_vm8 }
  0xaf   : > { %v866_v9 = vmul.f32 %v2114_v54, %v865_v3  ;;  %1852 = vrcp.f32 %v2145_v12  ;;  %v1232_v39 = vand.u32 2147483647, %v2116_v55  ;;  %v887_v40 = vand.u32 2147483647, %v2145_v12 }
  0xb0   : > { %v986_v14 = vmul.f32 %v2119_v57, %v985_v6  ;;  %1854 = vrcp.f32 %v2147_v13  ;;  %vm2189_vm11 = vcmp.eq.f32.partialorder %v1112_v15, 8.507059e+37  ;;  %v1115_v43 = vor.u32 1.1754944e-38, %v1114_v19 }
  0xb1   : > { %v2152_v16 = vpop.eup %1844  ;;  %v867_v17 = vadd.f32 %v2114_v54, %v866_v9  ;;  %vm1228_vm12 = vweird.f32 %v2116_v55  ;;  %v2194_v44 = vor.u32 1.1754944e-38, %v1234_v20  ;;  %v2197_v46 = vadd.f32 %v2074_v24, %v565_v26 }
  0xb2   : > { %v1104_v22 = vmul.f32 %v2152_v16, %v2112_v53  ;;  %v2168_v29 = vpop.eup %1846  ;;  %v987_v30 = vadd.f32 %v2119_v57, %v986_v14  ;;  %vm1109_vm14 = vweird.f32 %v2152_v16  ;;  %vm883_vm15 = vweird.f32 %v2145_v12 }
  0xb3   : > { %v1849_v31 = vpop.eup %1848  ;;  %v1224_v36 = vmul.f32 %v2168_v29, %v2116_v55  ;;  %v871_v41 = vsel %vm2178_vm10, %v2114_v54, %v867_v17  ;;  %v889_v58 = vand.u32 2147483648, %v2145_v12  ;;  %1856 = vpow2.f32 %v1651_v23  ;;  %vm2240_vm2 = vmor %vm1108_vm9, %vm1109_vm14 }
  0xb4   : > { %v1105_v35 = vsub.f32 1.0, %v1104_v22  ;;  %v1851_v47 = vpop.eup %1850  ;;  %v991_v56 = vsel %vm2203_vm13, %v2119_v57, %v987_v30  ;;  %v2214_v59 = vadd.f32 1.0, %v1849_v31  ;;  %v876_v45 = vsel %vm2141_vm5, %v875_v11, %v871_v41 }
  0xb5   : > { %v1225_v52 = vsub.f32 1.0, %v1224_v36  ;;  %v1853_v54 = vpop.eup %1852  ;;  %vm2221_vm0 = vcmp.eq.f32.partialorder %v887_v40, 8.507059e+37  ;;  %vm2225_vm1 = vcmp.eq.f32.partialorder %v1232_v39, 8.507059e+37  ;;  %v1007_v1 = vand.u32 2147483647, %v2147_v13 }
  0xb6   : > { %v1106_v50 = vmul.f32 %v2152_v16, %v1105_v35  ;;  %v879_v62 = vmul.f32 %v1853_v54, %v2145_v12  ;;  %v1855_v0 = vpop.eup %1854  ;;  %v1009_v2 = vand.u32 2147483648, %v2147_v13  ;;  %1858 = vrcp.f32 %v2214_v59 }
  0xb7   : > { %v1226_v61 = vmul.f32 %v2168_v29, %v1225_v52  ;;  %v2232_v3 = vadd.f32 1.0, %v1851_v47  ;;  %v996_v4 = vsel %vm2155_vm7, %v995_v21, %v991_v56  ;;  %v999_v9 = vmul.f32 %v1855_v0, %v2147_v13  ;;  %v527_v47 = vpop.f32.mrf.mxu0 }
  0xb8   : > { %v1107_v60 = vadd.f32 %v2152_v16, %v1106_v50  ;;  %v880_v6 = vsub.f32 1.0, %v879_v62  ;;  %vm1003_vm3 = vweird.f32 %v2147_v13  ;;  %v1343_v10 = vmul.f32 %v876_v45, %v2077_v27 }
  0xb9   : > { %v1227_v14 = vadd.f32 %v2168_v29, %v1226_v61  ;;  %vm1229_vm4 = vweird.f32 %v2168_v29  ;;  %vm884_vm5 = vweird.f32 %v1853_v54  ;;  %v890_v15 = vor.u32 1.1754944e-38, %v889_v58  ;;  %v1857_v18 = vpop.eup %1856 }
  0xba   : > { %v1111_v11 = vsel %vm2240_vm2, %v2152_v16, %v1107_v60  ;;  %v881_v53 = vmul.f32 %v1853_v54, %v880_v6  ;;  %v1000_v17 = vsub.f32 1.0, %v999_v9  ;;  %v1351_v19 = vmul.f32 %v996_v4, %v2080_v28  ;;  %vm2262_vm7 = vmor %vm1228_vm12, %vm1229_vm4  ;;  %v567_v4 = vpop.f32.mrf.mxu2 }
  0xbb   : > { %vm2253_vm6 = vcmp.eq.f32.partialorder %v1007_v1, 8.507059e+37  ;;  %v1010_v27 = vor.u32 1.1754944e-38, %v1009_v2  ;;  %1860 = vrcp.f32 %v2232_v3  ;;  %v1116_v16 = vsel %vm2189_vm11, %v1115_v43, %v1111_v11  ;;  %vm885_vm9 = vmor %vm883_vm15, %vm884_vm5 }
  0xbc   : > { %v882_v22 = vadd.f32 %v1853_v54, %v881_v53  ;;  %v1001_v23 = vmul.f32 %v1855_v0, %v1000_v17  ;;  %vm1004_vm8 = vweird.f32 %v1855_v0  ;;  %v1859_v28 = vpop.eup %1858  ;;  %v1231_v26 = vsel %vm2262_vm7, %v2168_v29, %v1227_v14 }
  0xbd   : > { %vm1123_vm10 = vweird.f32 %v2214_v59  ;;  %v2273_v30 = vadd.f32 1.0, %v1857_v18  ;;  %1862 = vpow2.f32 %v2166_v25  ;;  %v1119_v32 = vmul.f32 %v1859_v28, %v2214_v59  ;;  %vm1005_vm11 = vmor %vm1003_vm3, %vm1004_vm8  ;;  %v585_v25 = vpop.f32.mrf.mxu3 }
  0xbe   : > { %v886_v55 = vsel %vm885_vm9, %v1853_v54, %v882_v22  ;;  %v1002_v31 = vadd.f32 %v1855_v0, %v1001_v23  ;;  %v1127_v35 = vand.u32 2147483647, %v2214_v59  ;;  %v2279_v36 = vmul.f32 %v1116_v16, %v2085_v33 }
  0xbf   : > { %v891_v12 = vsel %vm2221_vm0, %v890_v15, %v886_v55  ;;  %v1129_v29 = vand.u32 2147483648, %v2214_v59  ;;  %1864 = vrcp.f32 %v2273_v30  ;;  %v1236_v39 = vsel %vm2225_vm1, %v2194_v44, %v1231_v26  ;;  %v530_v55 = vpop.f32.mrf.mxu0 }
  0xc0   : > { %v1344_v40 = vmul.f32 %v891_v12, %v2091_v37  ;;  %v1006_v41 = vsel %vm1005_vm11, %v1855_v0, %v1002_v31  ;;  %v1120_v33 = vsub.f32 1.0, %v1119_v32  ;;  %vm1124_vm12 = vweird.f32 %v1859_v28 }
  0xc1   : > { %v1861_v42 = vpop.eup %1860  ;;  %v1011_v13 = vsel %vm2253_vm6, %v1010_v27, %v1006_v41  ;;  %v1247_v43 = vand.u32 2147483647, %v2232_v3  ;;  %v1667_v44 = vmul.f32 -1.442695, %v2197_v46  ;;  %vm2304_vm13 = vcmp.eq.f32.partialorder %v1127_v35, 8.507059e+37  ;;  %vm1125_vm14 = vmor %vm1123_vm10, %vm1124_vm12 }
  0xc2   : > { %v1704_v37 = vpack.c.bf16 %v1344_v40, %v1343_v10  ;;  %v1352_v48 = vmul.f32 %v1011_v13, %v2094_v38  ;;  %v1121_v50 = vmul.f32 %v1859_v28, %v1120_v33  ;;  %v1239_v52 = vmul.f32 %v1861_v42, %v2232_v3  ;;  %v547_v38 = vpop.f32.mrf.mxu1 }
  0xc3   : > { %v1863_v54 = vpop.eup %1862  ;;  %v1130_v58 = vor.u32 1.1754944e-38, %v1129_v29  ;;  %v1249_v45 = vand.u32 2147483648, %v2232_v3  ;;  %1866 = vpow2.f32 %v1667_v44  ;;  %vm1243_vm15 = vweird.f32 %v2232_v3 }
  0xc4   : > { %1705 = vst [vmem:[%s2296_s4] sm:$0xff] %v1704_v37   ;;  %v1724_v60 = vpack.c.bf16 %v1352_v48, %v1351_v19  ;;  %v1122_v61 = vadd.f32 %v1859_v28, %v1121_v50  ;;  %v1240_v62 = vsub.f32 1.0, %v1239_v52  ;;  %v2310_v63 = vadd.f32 1.0, %v1863_v54 }
  0xc5   : > { %v2312_v0 = vpop.eup %1864  ;;  %vm2318_vm0 = vcmp.eq.f32.partialorder %v1247_v43, 8.507059e+37  ;;  %v2323_v1 = vadd.f32 %v2074_v24, %v585_v25  ;;  %v2326_v2 = vadd.f32 %v2074_v24, %v527_v47  ;;  %vm1244_vm1 = vweird.f32 %v1861_v42  ;;  %v587_v21 = vpop.f32.mrf.mxu3 }
  0xc6   : > { %1784 = vst [vmem:[%s2296_s4 + $0x20] sm:$0xff] %v1724_v60   ;;  %v1126_v5 = vsel %vm1125_vm14, %v1859_v28, %v1122_v61  ;;  %v1241_v6 = vmul.f32 %v1861_v42, %v1240_v62  ;;  %v894_v59 = vmul.f32 %v2312_v0, %v2273_v30  ;;  %v1250_v10 = vor.u32 1.1754944e-38, %v1249_v45  ;;  %vm1245_vm2 = vmor %vm1243_vm15, %vm1244_vm1 }
  0xc7   : > { %v1131_v9 = vsel %vm2304_vm13, %v1130_v58, %v1126_v5  ;;  %1868 = vrcp.f32 %v2310_v63  ;;  %v2335_v11 = vadd.f32 %v2074_v24, %v547_v38  ;;  %v2339_v17 = vadd.f32 %v2074_v24, %v567_v4  ;;  %v570_v38 = vpop.f32.mrf.mxu2 }
  0xc8   : > { %v1360_v14 = vmul.f32 %v1131_v9, %v2107_v49  ;;  %v1242_v53 = vadd.f32 %v1861_v42, %v1241_v6  ;;  %v895_v15 = vsub.f32 1.0, %v894_v59  ;;  %v1367_v19 = vmul.f32 %v1236_v39, %v2088_v34  ;;  %v532_v59 = vpop.f32.mrf.mxu0 }
  0xc9   : > { %v1867_v18 = vpop.eup %1866  ;;  %v902_v20 = vand.u32 2147483647, %v2273_v30  ;;  %v1675_v27 = vmul.f32 -1.442695, %v2323_v1  ;;  %v1652_v16 = vmul.f32 -1.442695, %v2326_v2  ;;  %v2359_v35 = vadd.f32 %v2074_v24, %v587_v21 }
  0xca   : > { %v1744_v49 = vpack.c.bf16 %v1360_v14, %v2279_v36  ;;  %v1246_v22 = vsel %vm1245_vm2, %v1861_v42, %v1242_v53  ;;  %v896_v23 = vmul.f32 %v2312_v0, %v895_v15  ;;  %v904_v28 = vand.u32 2147483648, %v2273_v30  ;;  %v550_v40 = vpop.f32.mrf.mxu1 }
  0xcb   : > { %v1251_v34 = vsel %vm2318_vm0, %v1250_v10, %v1246_v22  ;;  %v2352_v26 = vadd.f32 1.0, %v1867_v18  ;;  %1870 = vpow2.f32 %v1675_v27  ;;  %v1660_v3 = vmul.f32 -1.442695, %v2335_v11 }
  0xcc   : > { %1788 = vst [vmem:[%s2296_s4 + $0x40] sm:$0xff] %v1744_v49   ;;  %v1368_v31 = vmul.f32 %v1251_v34, %v2110_v51  ;;  %1872 = vpow2.f32 %v1652_v16  ;;  %v1668_v32 = vmul.f32 -1.442695, %v2339_v17  ;;  %v897_v12 = vadd.f32 %v2312_v0, %v896_v23 }
  0xcd   : > { %v2361_v36 = vpop.eup %1868  ;;  %vm898_vm3 = vweird.f32 %v2273_v30  ;;  %vm899_vm4 = vweird.f32 %v2312_v0  ;;  %1874 = vrcp.f32 %v2352_v26  ;;  %vm2369_vm5 = vcmp.eq.f32.partialorder %v902_v20, 8.507059e+37 }
  0xce   : > { %v1764_v29 = vpack.c.bf16 %v1368_v31, %v1367_v19  ;;  %v1014_v51 = vmul.f32 %v2361_v36, %v2310_v63  ;;  %v1022_v39 = vand.u32 2147483647, %v2310_v63  ;;  %1876 = vpow2.f32 %v1660_v3  ;;  %vm2375_vm6 = vmor %vm898_vm3, %vm899_vm4 }
  0xcf   : > { %v905_v30 = vor.u32 1.1754944e-38, %v904_v28  ;;  %1878 = vpow2.f32 %v1668_v32  ;;  %v1676_v42 = vmul.f32 -1.442695, %v2359_v35  ;;  %v901_v43 = vsel %vm2375_vm6, %v2312_v0, %v897_v12  ;;  %v590_v0 = vpop.f32.mrf.mxu3 }
  0xd0   : > { %1792 = vst [vmem:[%s2296_s4 + $0x60] sm:$0xff] %v1764_v29   ;;  %v1015_v33 = vsub.f32 1.0, %v1014_v51  ;;  %v1024_v44 = vand.u32 2147483648, %v2310_v63  ;;  %v1142_v47 = vand.u32 2147483647, %v2352_v26  ;;  %v2386_v37 = vadd.f32 %v2074_v24, %v530_v55  ;;  %v535_v10 = vpop.f32.mrf.mxu0 }
  0xd1   : > { %v1871_v13 = vpop.eup %1870  ;;  %v1144_v52 = vand.u32 2147483648, %v2352_v26  ;;  %1880 = vpow2.f32 %v1676_v42  ;;  %vm1018_vm7 = vweird.f32 %v2310_v63  ;;  %vm1019_vm8 = vweird.f32 %v2361_v36 }
  0xd2   : > { %v1873_v48 = vpop.eup %1872  ;;  %v1016_v50 = vmul.f32 %v2361_v36, %v1015_v33  ;;  %v2390_v54 = vadd.f32 1.0, %v1871_v13  ;;  %vm2394_vm9 = vcmp.eq.f32.partialorder %v1022_v39, 8.507059e+37  ;;  %v906_v60 = vsel %vm2369_vm5, %v905_v30, %v901_v43  ;;  %vm2414_vm10 = vmor %vm1018_vm7, %vm1019_vm8  ;;  %v552_v28 = vpop.f32.mrf.mxu1 }
  0xd3   : > { %v1875_v56 = vpop.eup %1874  ;;  %v2398_v45 = vadd.f32 1.0, %v1873_v48  ;;  %v1025_v4 = vor.u32 1.1754944e-38, %v1024_v44  ;;  %v1653_v5 = vmul.f32 -1.442695, %v2386_v37  ;;  %v2408_v6 = vadd.f32 %v2074_v24, %v550_v40 }
  0xd4   : > { %v1017_v61 = vadd.f32 %v2361_v36, %v1016_v50  ;;  %v1134_v62 = vmul.f32 %v1875_v56, %v2352_v26  ;;  %1882 = vrcp.f32 %v2390_v54  ;;  %v1877_v57 = vpop.eup %1876  ;;  %vm1138_vm11 = vweird.f32 %v2352_v26 }
  0xd5   : > { %1884 = vrcp.f32 %v2398_v45  ;;  %v1879_v9 = vpop.eup %1878  ;;  %vm2419_vm12 = vcmp.eq.f32.partialorder %v1142_v47, 8.507059e+37  ;;  %v1145_v15 = vor.u32 1.1754944e-38, %v1144_v52  ;;  %v2424_v18 = vmul.f32 %v906_v60, %v2135_v7 }
  0xd6   : > { %v1135_v14 = vsub.f32 1.0, %v1134_v62  ;;  %v1021_v19 = vsel %vm2414_vm10, %v2361_v36, %v1017_v61  ;;  %v2430_v63 = vadd.f32 %v2074_v24, %v570_v38  ;;  %v2433_v20 = vadd.f32 %v2074_v24, %v590_v0 }
  0xd7   : > { %v1881_v27 = vpop.eup %1880  ;;  %vm1139_vm13 = vweird.f32 %v1875_v56  ;;  %v2435_v21 = vadd.f32 1.0, %v1877_v57  ;;  %v2438_v49 = vadd.f32 %v2074_v24, %v532_v59  ;;  %v1264_v7 = vand.u32 2147483648, %v2390_v54 }
  0xd8   : > { %v1136_v16 = vmul.f32 %v1875_v56, %v1135_v14  ;;  %v2441_v22 = vadd.f32 1.0, %v1879_v9  ;;  %1886 = vpow2.f32 %v1653_v5  ;;  %v1661_v23 = vmul.f32 -1.442695, %v2408_v6  ;;  %vm1140_vm14 = vmor %vm1138_vm11, %vm1139_vm13 }
  0xd9   : > { %v1026_v3 = vsel %vm2394_vm9, %v1025_v4, %v1021_v19  ;;  %v917_v31 = vand.u32 2147483647, %v2398_v45  ;;  %1888 = vrcp.f32 %v2435_v21  ;;  %v919_v12 = vand.u32 2147483648, %v2398_v45 }
  0xda   : > { %v2444_v34 = vpop.eup %1882  ;;  %v1137_v55 = vadd.f32 %v1875_v56, %v1136_v16  ;;  %1890 = vrcp.f32 %v2441_v22  ;;  %v2456_v29 = vadd.f32 1.0, %v1881_v27  ;;  %v1262_v25 = vand.u32 2147483647, %v2390_v54 }
  0xdb   : > { %v1885_v32 = vpop.eup %1884  ;;  %v1254_v36 = vmul.f32 %v2444_v34, %v2390_v54  ;;  %v2461_v40 = vadd.f32 %v2074_v24, %v552_v28  ;;  %vm913_vm15 = vweird.f32 %v2398_v45  ;;  %v1037_v26 = vand.u32 2147483647, %v2435_v21 }
  0xdc   : > { %v1141_v51 = vsel %vm1140_vm14, %v1875_v56, %v1137_v55  ;;  %v909_v39 = vmul.f32 %v1885_v32, %v2398_v45  ;;  %v1039_v30 = vand.u32 2147483648, %v2435_v21  ;;  %v2467_v33 = vmul.f32 %v1026_v3, %v2138_v8 }
  0xdd   : > { %v1255_v41 = vsub.f32 1.0, %v1254_v36  ;;  %v1146_v42 = vsel %vm2419_vm12, %v1145_v15, %v1141_v51  ;;  %vm1258_vm0 = vweird.f32 %v2390_v54  ;;  %v2472_v13 = vor.u32 1.1754944e-38, %v1264_v7 }
  0xde   : > { %v910_v43 = vsub.f32 1.0, %v909_v39  ;;  %v1887_v44 = vpop.eup %1886  ;;  %vm2474_vm1 = vcmp.eq.f32.partialorder %v917_v31, 8.507059e+37  ;;  %v920_v48 = vor.u32 1.1754944e-38, %v919_v12  ;;  %vm1033_vm2 = vweird.f32 %v2435_v21 }
  0xdf   : > { %1892 = vrcp.f32 %v2456_v29  ;;  %v1889_v8 = vpop.eup %1888  ;;  %v1256_v50 = vmul.f32 %v2444_v34, %v1255_v41  ;;  %vm1259_vm3 = vweird.f32 %v2444_v34  ;;  %vm914_vm4 = vweird.f32 %v1885_v32 }
  0xe0   : > { %v911_v52 = vmul.f32 %v1885_v32, %v910_v43  ;;  %v1891_v56 = vpop.eup %1890  ;;  %v2483_v58 = vmul.f32 %v1146_v42, %v2197_v46  ;;  %v1029_v60 = vmul.f32 %v1889_v8, %v2435_v21  ;;  %vm2486_vm5 = vcmp.eq.f32.partialorder %v1037_v26, 8.507059e+37  ;;  %vm915_vm7 = vmor %vm913_vm15, %vm914_vm4 }
  0xe1   : > { %v1040_v62 = vor.u32 1.1754944e-38, %v1039_v30  ;;  %vm1153_vm6 = vweird.f32 %v2441_v22  ;;  %v1149_v0 = vmul.f32 %v1891_v56, %v2441_v22  ;;  %v1157_v57 = vand.u32 2147483647, %v2441_v22  ;;  %vm2514_vm11 = vmor %vm1258_vm0, %vm1259_vm3 }
  0xe2   : > { %v912_v38 = vadd.f32 %v1885_v32, %v911_v52  ;;  %v1159_v4 = vand.u32 2147483648, %v2441_v22  ;;  %v1030_v46 = vsub.f32 1.0, %v1029_v60  ;;  %v1277_v5 = vand.u32 2147483647, %v2456_v29 }
  0xe3   : > { %v2497_v59 = vadd.f32 1.0, %v1887_v44  ;;  %1894 = vpow2.f32 %v1661_v23  ;;  %v1257_v9 = vadd.f32 %v2444_v34, %v1256_v50  ;;  %vm2500_vm8 = vcmp.eq.f32.partialorder %v1262_v25, 8.507059e+37 }
  0xe4   : > { %v916_v14 = vsel %vm915_vm7, %v1885_v32, %v912_v38  ;;  %v1150_v53 = vsub.f32 1.0, %v1149_v0  ;;  %v1669_v15 = vmul.f32 -1.442695, %v2430_v63  ;;  %v1031_v27 = vmul.f32 %v1889_v8, %v1030_v46 }
  0xe5   : > { %v1893_v19 = vpop.eup %1892  ;;  %v921_v45 = vsel %vm2474_vm1, %v920_v48, %v916_v14  ;;  %vm1034_vm9 = vweird.f32 %v1889_v8  ;;  %1896 = vrcp.f32 %v2497_v59  ;;  %vm1154_vm10 = vweird.f32 %v1891_v56 }
  0xe6   : > { %v1346_v16 = vmul.f32 %v921_v45, %v2326_v2  ;;  %v1151_v7 = vmul.f32 %v1891_v56, %v1150_v53  ;;  %v1269_v23 = vmul.f32 %v1893_v19, %v2456_v29  ;;  %v1032_v3 = vadd.f32 %v1889_v8, %v1031_v27  ;;  %vm1035_vm13 = vmor %vm1033_vm2, %vm1034_vm9 }
  0xe7   : > { %vm2518_vm12 = vcmp.eq.f32.partialorder %v1157_v57, 8.507059e+37  ;;  %v1160_v31 = vor.u32 1.1754944e-38, %v1159_v4  ;;  %v1279_v2 = vand.u32 2147483648, %v2456_v29  ;;  %1898 = vpow2.f32 %v1669_v15  ;;  %vm1155_vm14 = vmor %vm1153_vm6, %vm1154_vm10 }
  0xe8   : > { %v1709_v32 = vpack.c.bf16 %v1346_v16, %v2424_v18  ;;  %v1152_v36 = vadd.f32 %v1891_v56, %v1151_v7  ;;  %v1270_v54 = vsub.f32 1.0, %v1269_v23  ;;  %v1261_v51 = vsel %vm2514_vm11, %v2444_v34, %v1257_v9 }
  0xe9   : > { %v1895_v12 = vpop.eup %1894  ;;  %v1036_v25 = vsel %vm1035_vm13, %v1889_v8, %v1032_v3  ;;  %vm1274_vm15 = vweird.f32 %v1893_v19  ;;  %v1677_v39 = vmul.f32 -1.442695, %v2433_v20  ;;  %v1654_v22 = vmul.f32 -1.442695, %v2438_v49 }
  0xea   : > { %1781 = vst [vmem:[%s2296_s4 + $0x8] sm:$0xff] %v1709_v32   ;;  %v1041_v18 = vsel %vm2486_vm5, %v1040_v62, %v1036_v25  ;;  %v1156_v21 = vsel %vm1155_vm14, %v1891_v56, %v1152_v36  ;;  %v1271_v41 = vmul.f32 %v1893_v19, %v1270_v54  ;;  %v2536_v26 = vadd.f32 1.0, %v1895_v12  ;;  %v572_v62 = vpop.f32.mrf.mxu2  ;;  %v555_v12 = vpop.f32.mrf.mxu1 }
  0xeb   : > { %v2538_v30 = vpop.eup %1896  ;;  %v1354_v34 = vmul.f32 %v1041_v18, %v2335_v11  ;;  %v1161_v42 = vsel %vm2518_vm12, %v1160_v31, %v1156_v21  ;;  %1900 = vpow2.f32 %v1677_v39  ;;  %vm1273_vm0 = vweird.f32 %v2456_v29 }
  0xec   : > { %v1362_v43 = vmul.f32 %v1161_v42, %v2339_v17  ;;  %v1272_v44 = vadd.f32 %v1893_v19, %v1271_v41  ;;  %v924_v47 = vmul.f32 %v2538_v30, %v2497_v59  ;;  %v1266_v11 = vsel %vm2500_vm8, %v2472_v13, %v1261_v51  ;;  %vm1275_vm1 = vmor %vm1273_vm0, %vm1274_vm15 }
  0xed   : > { %v1729_v48 = vpack.c.bf16 %v1354_v34, %v2467_v33  ;;  %v1280_v8 = vor.u32 1.1754944e-38, %v1279_v2  ;;  %1902 = vrcp.f32 %v2536_v26  ;;  %v1899_v50 = vpop.eup %1898  ;;  %vm1278_vm2 = vcmp.eq.f32.partialorder %v1277_v5, 8.507059e+37 }
  0xee   : > { %v1749_v17 = vpack.c.bf16 %v1362_v43, %v2483_v58  ;;  %v1276_v52 = vsel %vm1275_vm1, %v1893_v19, %v1272_v44  ;;  %v925_v29 = vsub.f32 1.0, %v924_v47  ;;  %v2556_v60 = vadd.f32 1.0, %v1899_v50 }
  0xef   : > { %1785 = vst [vmem:[%s2296_s4 + $0x28] sm:$0xff] %v1729_v48   ;;  %v1281_v56 = vsel %vm1278_vm2, %v1280_v8, %v1276_v52  ;;  %1904 = vpow2.f32 %v1654_v22  ;;  %v1369_v13 = vmul.f32 %v1266_v11, %v2323_v1  ;;  %v1662_v61 = vmul.f32 -1.442695, %v2461_v40  ;;  %v592_v1 = vpop.f32.mrf.mxu3 }
  0xf0   : > { %1789 = vst [vmem:[%s2296_s4 + $0x48] sm:$0xff] %v1749_v17   ;;  %v1370_v33 = vmul.f32 %v1281_v56, %v2359_v35  ;;  %v926_v58 = vmul.f32 %v2538_v30, %v925_v29  ;;  %v2569_v46 = vadd.f32 %v2074_v24, %v572_v62  ;;  %vm928_vm3 = vweird.f32 %v2497_v59 }
  0xf1   : > { %v1901_v38 = vpop.eup %1900  ;;  %1906 = vpow2.f32 %v1662_v61  ;;  %vm929_vm4 = vweird.f32 %v2538_v30  ;;  %v2581_v19 = vadd.f32 %v2074_v24, %v592_v1  ;;  %v932_v45 = vand.u32 2147483647, %v2497_v59 }
  0xf2   : > { %v1769_v0 = vpack.c.bf16 %v1370_v33, %v1369_v13  ;;  %1908 = vrcp.f32 %v2556_v60  ;;  %v2566_v4 = vadd.f32 1.0, %v1901_v38  ;;  %v927_v9 = vadd.f32 %v2538_v30, %v926_v58  ;;  %vm2595_vm5 = vmor %vm928_vm3, %vm929_vm4 }
  0xf3   : > { %v2563_v57 = vpop.eup %1902  ;;  %v1670_v15 = vmul.f32 -1.442695, %v2569_v46  ;;  %v934_v27 = vand.u32 2147483648, %v2497_v59  ;;  %v1052_v7 = vand.u32 2147483647, %v2536_v26  ;;  %v2589_v23 = vadd.f32 %v2074_v24, %v535_v10 }
  0xf4   : > { %1793 = vst [vmem:[%s2296_s4 + $0x68] sm:$0xff] %v1769_v0   ;;  %v1044_v35 = vmul.f32 %v2563_v57, %v2536_v26  ;;  %1910 = vrcp.f32 %v2566_v4  ;;  %v1054_v55 = vand.u32 2147483648, %v2536_v26  ;;  %v931_v2 = vsel %vm2595_vm5, %v2538_v30, %v927_v9  ;;  %v575_v0 = vpop.f32.mrf.mxu2 }
  0xf5   : > { %v1905_v5 = vpop.eup %1904  ;;  %v1678_v36 = vmul.f32 -1.442695, %v2581_v19  ;;  %vm933_vm6 = vcmp.eq.f32.partialorder %v932_v45, 8.507059e+37  ;;  %v935_v54 = vor.u32 1.1754944e-38, %v934_v27  ;;  %vm1048_vm7 = vweird.f32 %v2536_v26 }
  0xf6   : > { %v1045_v14 = vsub.f32 1.0, %v1044_v35  ;;  %v2577_v53 = vadd.f32 1.0, %v1905_v5  ;;  %v1174_v59 = vand.u32 2147483648, %v2556_v60  ;;  %vm2609_vm8 = vcmp.eq.f32.partialorder %v1052_v7, 8.507059e+37 }
  0xf7   : > { %v1907_v16 = vpop.eup %1906  ;;  %v1655_v39 = vmul.f32 -1.442695, %v2589_v23  ;;  %v936_v21 = vsel %vm933_vm6, %v935_v54, %v931_v2  ;;  %vm1049_vm9 = vweird.f32 %v2563_v57  ;;  %v1055_v41 = vor.u32 1.1754944e-38, %v1054_v55  ;;  %v595_v1 = vpop.f32.mrf.mxu3 }
  0xf8   : > { %1912 = vrcp.f32 %v2577_v53  ;;  %v2591_v28 = vpop.eup %1908  ;;  %v2600_v31 = vadd.f32 1.0, %v1907_v16  ;;  %v1046_v32 = vmul.f32 %v2563_v57, %v1045_v14  ;;  %v1172_v30 = vand.u32 2147483647, %v2556_v60  ;;  %vm2641_vm10 = vmor %vm1048_vm7, %vm1049_vm9 }
  0xf9   : > { %1914 = vpow2.f32 %v1670_v15  ;;  %v1164_v25 = vmul.f32 %v2591_v28, %v2556_v60  ;;  %v947_v22 = vand.u32 2147483647, %v2577_v53  ;;  %v2624_v43 = vadd.f32 %v2074_v24, %v555_v12 }
  0xfa   : > { %1916 = vrcp.f32 %v2600_v31  ;;  %v2617_v18 = vpop.eup %1910  ;;  %v1047_v42 = vadd.f32 %v2563_v57, %v1046_v32  ;;  %v2626_v44 = vor.u32 1.1754944e-38, %v1174_v59  ;;  %v1292_v47 = vand.u32 2147483647, %v2566_v4 }
  0xfb   : > { %1918 = vpow2.f32 %v1678_v36  ;;  %v949_v48 = vand.u32 2147483648, %v2577_v53  ;;  %v1165_v50 = vsub.f32 1.0, %v1164_v25  ;;  %v1284_v17 = vmul.f32 %v2617_v18, %v2566_v4 }
  0xfc   : > { %1920 = vpow2.f32 %v1655_v39  ;;  %v1663_v52 = vmul.f32 -1.442695, %v2624_v43  ;;  %v2635_v29 = vmul.f32 %v936_v21, %v2386_v37  ;;  %v1294_v13 = vand.u32 2147483648, %v2566_v4 }
  0xfd   : > { %v1051_v38 = vsel %vm2641_vm10, %v2563_v57, %v1047_v42  ;;  %vm1168_vm11 = vweird.f32 %v2556_v60  ;;  %vm1169_vm12 = vweird.f32 %v2591_v28  ;;  %vm943_vm13 = vweird.f32 %v2577_v53 }
  0xfe   : > { %v1913_v34 = vpop.eup %1912  ;;  %vm2654_vm14 = vcmp.eq.f32.partialorder %v947_v22, 8.507059e+37  ;;  %1922 = vpow2.f32 %v1663_v52  ;;  %v1166_v57 = vmul.f32 %v2591_v28, %v1165_v50  ;;  %v1285_v5 = vsub.f32 1.0, %v1284_v17  ;;  %v537_v22 = vpop.f32.mrf.mxu0 }
  0xff   : > { %v939_v11 = vmul.f32 %v1913_v34, %v2577_v53  ;;  %v1915_v8 = vpop.eup %1914  ;;  %vm944_vm15 = vweird.f32 %v1913_v34  ;;  %vm1289_vm0 = vweird.f32 %v2617_v18  ;;  %v950_v9 = vor.u32 1.1754944e-38, %v949_v48 }
 0x100   : > { %v2646_v61 = vadd.f32 1.0, %v1915_v8  ;;  %v1917_v62 = vpop.eup %1916  ;;  %v1056_v10 = vsel %vm2609_vm8, %v1055_v41, %v1051_v38  ;;  %v1067_v45 = vand.u32 2147483647, %v2600_v31  ;;  %vm1288_vm1 = vweird.f32 %v2566_v4  ;;  %vm945_vm2 = vmor %vm943_vm13, %vm944_vm15 }
 0x101   : > { %v940_v33 = vsub.f32 1.0, %v939_v11  ;;  %v1059_v58 = vmul.f32 %v1917_v62, %v2600_v31  ;;  %v1919_v35 = vpop.eup %1918  ;;  %v1069_v16 = vand.u32 2147483648, %v2600_v31  ;;  %v2673_v3 = vadd.f32 %v2074_v24, %v575_v0  ;;  %vm2698_vm8 = vmor %vm1168_vm11, %vm1169_vm12  ;;  %v557_v11 = vpop.f32.mrf.mxu1 }
 0x102   : > { %1924 = vrcp.f32 %v2646_v61  ;;  %v1921_v27 = vpop.eup %1920  ;;  %v2670_v7 = vadd.f32 1.0, %v1919_v35  ;;  %v2676_v55 = vadd.f32 %v2074_v24, %v595_v1  ;;  %vm2678_vm3 = vcmp.eq.f32.partialorder %v1172_v30, 8.507059e+37  ;;  %vm2732_vm11 = vmor %vm1288_vm1, %vm1289_vm0 }
 0x103   : > { %v941_v26 = vmul.f32 %v1913_v34, %v940_v33  ;;  %v1060_v15 = vsub.f32 1.0, %v1059_v58  ;;  %vm1064_vm4 = vweird.f32 %v1917_v62  ;;  %v2682_v54 = vadd.f32 1.0, %v1921_v27 }
 0x104   : > { %v1167_v53 = vadd.f32 %v2591_v28, %v1166_v57  ;;  %v1286_v59 = vmul.f32 %v2617_v18, %v1285_v5  ;;  %1926 = vrcp.f32 %v2670_v7  ;;  %v1923_v24 = vpop.eup %1922  ;;  %v1355_v51 = vmul.f32 %v1056_v10, %v2408_v6 }
 0x105   : > { %v942_v14 = vadd.f32 %v1913_v34, %v941_v26  ;;  %v1061_v36 = vmul.f32 %v1917_v62, %v1060_v15  ;;  %vm1063_vm5 = vweird.f32 %v2600_v31  ;;  %vm1068_vm7 = vcmp.eq.f32.partialorder %v1067_v45, 8.507059e+37 }
 0x106   : > { %vm1065_vm6 = vmor %vm1063_vm5, %vm1064_vm4  ;;  %v1070_v41 = vor.u32 1.1754944e-38, %v1069_v16  ;;  %1928 = vrcp.f32 %v2682_v54  ;;  %v1671_v30 = vmul.f32 -1.442695, %v2673_v3  ;;  %v1679_v42 = vmul.f32 -1.442695, %v2676_v55 }
 0x107   : > { %v946_v32 = vsel %vm945_vm2, %v1913_v34, %v942_v14  ;;  %v1062_v39 = vadd.f32 %v1917_v62, %v1061_v36  ;;  %v1171_v48 = vsel %vm2698_vm8, %v2591_v28, %v1167_v53  ;;  %v1287_v8 = vadd.f32 %v2617_v18, %v1286_v59 }
 0x108   : > { %v951_v12 = vsel %vm2654_vm14, %v950_v9, %v946_v32  ;;  %v1925_v21 = vpop.eup %1924  ;;  %v1187_v50 = vand.u32 2147483647, %v2646_v61  ;;  %vm2712_vm9 = vcmp.eq.f32.partialorder %v1292_v47, 8.507059e+37  ;;  %v1189_v56 = vand.u32 2147483648, %v2646_v61 }
 0x109   : > { %v1348_v25 = vmul.f32 %v951_v12, %v2438_v49  ;;  %v1066_v31 = vsel %vm1065_vm6, %v1917_v62, %v1062_v39  ;;  %v1179_v34 = vmul.f32 %v1925_v21, %v2646_v61  ;;  %v2719_v33 = vadd.f32 1.0, %v1923_v24  ;;  %v1956_v62 = vld [vmem:[%s2908_s2] ss:$0 sm:$0xff]  ;;  %v577_v39 = vpop.f32.mrf.mxu2 }
 0x10a   : > { %v1071_v60 = vsel %vm1068_vm7, %v1070_v41, %v1066_v31  ;;  %v1927_v28 = vpop.eup %1926  ;;  %vm1184_vm10 = vweird.f32 %v1925_v21  ;;  %1930 = vpow2.f32 %v1671_v30  ;;  %v2724_v47 = vadd.f32 %v1956_v62, %v537_v22 }
 0x10b   : > { %v1714_v49 = vpack.c.bf16 %v1348_v25, %v2635_v29  ;;  %v1356_v52 = vmul.f32 %v1071_v60, %v2461_v40  ;;  %v1180_v29 = vsub.f32 1.0, %v1179_v34  ;;  %v2726_v38 = vadd.f32 %v1956_v62, %v557_v11 }
 0x10c   : > { %v1299_v58 = vmul.f32 %v1927_v28, %v2670_v7  ;;  %1932 = vpow2.f32 %v1679_v42  ;;  %v2737_v0 = vpop.eup %1928  ;;  %v1176_v1 = vsel %vm2678_vm3, %v2626_v44, %v1171_v48  ;;  %v1291_v35 = vsel %vm2732_vm11, %v2617_v18, %v1287_v8 }
 0x10d   : > { %1782 = vst [vmem:[%s2296_s4 + $0x10] sm:$0xff] %v1714_v49   ;;  %v1734_v37 = vpack.c.bf16 %v1356_v52, %v1355_v51  ;;  %v1181_v26 = vmul.f32 %v1925_v21, %v1180_v29  ;;  %vm1183_vm12 = vweird.f32 %v2646_v61  ;;  %1934 = vrcp.f32 %v2719_v33 }
 0x10e   : > { %vm1188_vm13 = vcmp.eq.f32.partialorder %v1187_v50, 8.507059e+37  ;;  %v1300_v5 = vsub.f32 1.0, %v1299_v58  ;;  %v1307_v9 = vand.u32 2147483647, %v2670_v7  ;;  %vm1185_vm14 = vmor %vm1183_vm12, %vm1184_vm10  ;;  %v1190_v10 = vor.u32 1.1754944e-38, %v1189_v56 }
 0x10f   : > { %1786 = vst [vmem:[%s2296_s4 + $0x30] sm:$0xff] %v1734_v37   ;;  %v1182_v57 = vadd.f32 %v1925_v21, %v1181_v26  ;;  %v1309_v14 = vand.u32 2147483648, %v2670_v7  ;;  %v1656_v44 = vmul.f32 -1.442695, %v2724_v47  ;;  %v1664_v15 = vmul.f32 -1.442695, %v2726_v38 }
 0x110   : > { %v1301_v45 = vmul.f32 %v1927_v28, %v1300_v5  ;;  %vm1304_vm15 = vweird.f32 %v1927_v28  ;;  %v954_v61 = vmul.f32 %v2737_v0, %v2682_v54  ;;  %v1931_v27 = vpop.eup %1930  ;;  %v1363_v16 = vmul.f32 %v1176_v1, %v2430_v63 }
 0x111   : > { %v1186_v18 = vsel %vm1185_vm14, %v1925_v21, %v1182_v57  ;;  %v1295_v2 = vor.u32 1.1754944e-38, %v1294_v13  ;;  %1936 = vpow2.f32 %v1656_v44  ;;  %vm1303_vm0 = vweird.f32 %v2670_v7 }
 0x112   : > { %v1191_v32 = vsel %vm1188_vm13, %v1190_v10, %v1186_v18  ;;  %v1933_v36 = vpop.eup %1932  ;;  %v1302_v59 = vadd.f32 %v1927_v28, %v1301_v45  ;;  %1938 = vpow2.f32 %v1664_v15  ;;  %vm1305_vm1 = vmor %vm1303_vm0, %vm1304_vm15  ;;  %vm1308_vm2 = vcmp.eq.f32.partialorder %v1307_v9, 8.507059e+37 }
 0x113   : > { %v1364_v53 = vmul.f32 %v1191_v32, %v2569_v46  ;;  %v2760_v12 = vpop.eup %1934  ;;  %v1296_v24 = vsel %vm2712_vm9, %v1295_v2, %v1291_v35  ;;  %v1310_v63 = vor.u32 1.1754944e-38, %v1309_v14  ;;  %v955_v51 = vsub.f32 1.0, %v954_v61  ;;  %v597_v46 = vpop.f32.mrf.mxu3 }
 0x114   : > { %v1306_v13 = vsel %vm1305_vm1, %v1927_v28, %v1302_v59  ;;  %v2764_v25 = vadd.f32 1.0, %v1931_v27  ;;  %v1074_v7 = vmul.f32 %v2760_v12, %v2719_v33  ;;  %v1371_v41 = vmul.f32 %v1296_v24, %v2433_v20 }
 0x115   : > { %v1754_v4 = vpack.c.bf16 %v1364_v53, %v1363_v16  ;;  %v1311_v21 = vsel %vm1308_vm2, %v1310_v63, %v1306_v13  ;;  %v2771_v6 = vadd.f32 1.0, %v1933_v36  ;;  %v2773_v31 = vadd.f32 %v1956_v62, %v577_v39 }
 0x116   : > { %v1372_v30 = vmul.f32 %v1311_v21, %v2581_v19  ;;  %v2775_v34 = vadd.f32 %v1956_v62, %v597_v46  ;;  %v956_v11 = vmul.f32 %v2737_v0, %v955_v51  ;;  %1940 = vrcp.f32 %v2764_v25 }
 0x117   : > { %1790 = vst [vmem:[%s2296_s4 + $0x50] sm:$0xff] %v1754_v4   ;;  %v1937_v49 = vpop.eup %1936  ;;  %v1075_v8 = vsub.f32 1.0, %v1074_v7  ;;  %1942 = vrcp.f32 %v2771_v6  ;;  %vm958_vm3 = vweird.f32 %v2682_v54  ;;  %v964_v19 = vand.u32 2147483648, %v2682_v54 }
 0x118   : > { %v1939_v42 = vpop.eup %1938  ;;  %v1774_v22 = vpack.c.bf16 %v1372_v30, %v1371_v41  ;;  %v2779_v48 = vadd.f32 1.0, %v1937_v49  ;;  %v1672_v60 = vmul.f32 -1.442695, %v2773_v31  ;;  %v957_v50 = vadd.f32 %v2737_v0, %v956_v11 }
 0x119   : > { %v2781_v20 = vadd.f32 1.0, %v1939_v42  ;;  %vm959_vm4 = vweird.f32 %v2737_v0  ;;  %v1680_v17 = vmul.f32 -1.442695, %v2775_v34  ;;  %v1076_v52 = vmul.f32 %v2760_v12, %v1075_v8 }
 0x11a   : > { %1794 = vst [vmem:[%s2296_s4 + $0x70] sm:$0xff] %v1774_v22   ;;  %1944 = vrcp.f32 %v2779_v48  ;;  %v962_v56 = vand.u32 2147483647, %v2682_v54  ;;  %vm2797_vm5 = vmor %vm958_vm3, %vm959_vm4  ;;  %v1082_v62 = vand.u32 2147483647, %v2719_v33  ;;  %v1084_v40 = vand.u32 2147483648, %v2719_v33 }
 0x11b   : > { %1946 = vrcp.f32 %v2781_v20  ;;  %v961_v26 = vsel %vm2797_vm5, %v2737_v0, %v957_v50  ;;  %v965_v58 = vor.u32 1.1754944e-38, %v964_v19  ;;  %v1077_v54 = vadd.f32 %v2760_v12, %v1076_v52 }
 0x11c   : > { %v2794_v29 = vpop.eup %1940  ;;  %1948 = vpow2.f32 %v1672_v60  ;;  %vm1078_vm6 = vweird.f32 %v2719_v33  ;;  %vm1079_vm7 = vweird.f32 %v2760_v12  ;;  %vm963_vm8 = vcmp.eq.f32.partialorder %v962_v56, 8.507059e+37 }
 0x11d   : > { %v2803_v37 = vpop.eup %1942  ;;  %1950 = vpow2.f32 %v1680_v17  ;;  %v1194_v35 = vmul.f32 %v2794_v29, %v2764_v25  ;;  %v966_v9 = vsel %vm963_vm8, %v965_v58, %v961_v26  ;;  %vm2814_vm9 = vcmp.eq.f32.partialorder %v1082_v62, 8.507059e+37  ;;  %vm2819_vm10 = vmor %vm1078_vm6, %vm1079_vm7 }
 0x11e   : > { %v1085_v0 = vor.u32 1.1754944e-38, %v1084_v40  ;;  %v1314_v33 = vmul.f32 %v2803_v37, %v2771_v6  ;;  %vm973_vm11 = vweird.f32 %v2779_v48  ;;  %v977_v18 = vand.u32 2147483647, %v2779_v48 }
 0x11f   : > { %v1081_v61 = vsel %vm2819_vm10, %v2760_v12, %v1077_v54  ;;  %v1195_v27 = vsub.f32 1.0, %v1194_v35  ;;  %v979_v16 = vand.u32 2147483648, %v2779_v48  ;;  %v1099_v53 = vand.u32 2147483648, %v2781_v20 }
 0x120   : > { %v1945_v1 = vpop.eup %1944  ;;  %v1097_v63 = vand.u32 2147483647, %v2781_v20  ;;  %v1315_v13 = vsub.f32 1.0, %v1314_v33  ;;  %vm1093_vm14 = vweird.f32 %v2781_v20  ;;  %v1086_v12 = vsel %vm2814_vm9, %v1085_v0, %v1081_v61 }
 0x121   : > { %v1947_v57 = vpop.eup %1946  ;;  %v969_v5 = vmul.f32 %v1945_v1, %v2779_v48  ;;  %vm974_vm12 = vweird.f32 %v1945_v1  ;;  %v980_v39 = vor.u32 1.1754944e-38, %v979_v16  ;;  %v1196_v21 = vmul.f32 %v2794_v29, %v1195_v27 }
 0x122   : > { %v1089_v14 = vmul.f32 %v1947_v57, %v2781_v20  ;;  %v1949_v45 = vpop.eup %1948  ;;  %vm1094_vm13 = vweird.f32 %v1947_v57  ;;  %vm975_vm15 = vmor %vm973_vm11, %vm974_vm12  ;;  %vm978_vm0 = vcmp.eq.f32.partialorder %v977_v18, 8.507059e+37  ;;  %v1100_v41 = vor.u32 1.1754944e-38, %v1099_v53 }
 0x123   : > { %v970_v15 = vsub.f32 1.0, %v969_v5  ;;  %v1951_v32 = vpop.eup %1950  ;;  %v2832_v59 = vadd.f32 1.0, %v1949_v45  ;;  %vm1095_vm1 = vmor %vm1093_vm14, %vm1094_vm13  ;;  %v1202_v30 = vand.u32 2147483647, %v2764_v25  ;;  %vm1098_vm2 = vcmp.eq.f32.partialorder %v1097_v63, 8.507059e+37 }
 0x124   : > { %v1090_v2 = vsub.f32 1.0, %v1089_v14  ;;  %v2835_v4 = vadd.f32 1.0, %v1951_v32  ;;  %v1349_v22 = vmul.f32 %v966_v9, %v2589_v23  ;;  %v1316_v11 = vmul.f32 %v2803_v37, %v1315_v13 }
 0x125   : > { %v971_v36 = vmul.f32 %v1945_v1, %v970_v15  ;;  %1952 = vrcp.f32 %v2832_v59  ;;  %v1357_v20 = vmul.f32 %v1086_v12, %v2624_v43  ;;  %v1204_v19 = vand.u32 2147483648, %v2764_v25 }
 0x126   : > { %v1091_v24 = vmul.f32 %v1947_v57, %v1090_v2  ;;  %1954 = vrcp.f32 %v2835_v4  ;;  %v1197_v17 = vadd.f32 %v2794_v29, %v1196_v21  ;;  %vm1199_vm3 = vweird.f32 %v2794_v29 }
 0x127   : > { %v972_v51 = vadd.f32 %v1945_v1, %v971_v36  ;;  %vm1198_vm4 = vweird.f32 %v2764_v25  ;;  %vm2857_vm5 = vcmp.eq.f32.partialorder %v1202_v30, 8.507059e+37  ;;  %v1317_v43 = vadd.f32 %v2803_v37, %v1316_v11 }
 0x128   : > { %v1092_v46 = vadd.f32 %v1947_v57, %v1091_v24  ;;  %vm1319_vm6 = vweird.f32 %v2803_v37  ;;  %vm2865_vm7 = vmor %vm1198_vm4, %vm1199_vm3  ;;  %v1205_v40 = vor.u32 1.1754944e-38, %v1204_v19  ;;  %v1322_v25 = vand.u32 2147483647, %v2771_v6 }
 0x129   : > { %v976_v7 = vsel %vm975_vm15, %v1945_v1, %v972_v51  ;;  %v1324_v26 = vand.u32 2147483648, %v2771_v6  ;;  %v1201_v1 = vsel %vm2865_vm7, %v2794_v29, %v1197_v17  ;;  %vm1318_vm8 = vweird.f32 %v2771_v6 }
 0x12a   : > { %v981_v49 = vsel %vm978_vm0, %v980_v39, %v976_v7  ;;  %v1096_v42 = vsel %vm1095_vm1, %v1947_v57, %v1092_v46  ;;  %v1219_v54 = vand.u32 2147483648, %v2832_v59  ;;  %vm2877_vm9 = vmor %vm1318_vm8, %vm1319_vm6  ;;  %v1217_v9 = vand.u32 2147483647, %v2832_v59 }
 0x12b   : > { %v1350_v48 = vmul.f32 %v981_v49, %v2724_v47  ;;  %v1101_v8 = vsel %vm1098_vm2, %v1100_v41, %v1096_v42  ;;  %v1953_v50 = vpop.eup %1952  ;;  %v1339_v10 = vand.u32 2147483648, %v2835_v4  ;;  %v1321_v0 = vsel %vm2877_vm9, %v2803_v37, %v1317_v43 }
 0x12c   : > { %v1358_v60 = vmul.f32 %v1101_v8, %v2726_v38  ;;  %v1955_v23 = vpop.eup %1954  ;;  %v1209_v47 = vmul.f32 %v1953_v50, %v2832_v59  ;;  %vm1214_vm10 = vweird.f32 %v1953_v50  ;;  %v1337_v6 = vand.u32 2147483647, %v2835_v4 }
 0x12d   : > { %v1719_v52 = vpack.c.bf16 %v1350_v48, %v1349_v22  ;;  %v1329_v38 = vmul.f32 %v1955_v23, %v2835_v4  ;;  %vm1334_vm11 = vweird.f32 %v1955_v23  ;;  %vm1323_vm12 = vcmp.eq.f32.partialorder %v1322_v25, 8.507059e+37 }
 0x12e   : > { %v1739_v56 = vpack.c.bf16 %v1358_v60, %v1357_v20  ;;  %v1210_v58 = vsub.f32 1.0, %v1209_v47  ;;  %v1325_v14 = vor.u32 1.1754944e-38, %v1324_v26  ;;  %vm1213_vm13 = vweird.f32 %v2832_v59 }
 0x12f   : > { %1783 = vst [vmem:[%s2296_s4 + $0x18] sm:$0xff] %v1719_v52   ;;  %v1330_v35 = vsub.f32 1.0, %v1329_v38  ;;  %v1206_v33 = vsel %vm2857_vm5, %v1205_v40, %v1201_v1  ;;  %vm1215_vm14 = vmor %vm1213_vm13, %vm1214_vm10  ;;  %v1220_v15 = vor.u32 1.1754944e-38, %v1219_v54  ;;  %vm1333_vm15 = vweird.f32 %v2835_v4 }
 0x130   : > { %1787 = vst [vmem:[%s2296_s4 + $0x38] sm:$0xff] %v1739_v56   ;;  %v1211_v5 = vmul.f32 %v1953_v50, %v1210_v58  ;;  %v1326_v45 = vsel %vm1323_vm12, %v1325_v14, %v1321_v0  ;;  %vm1218_vm0 = vcmp.eq.f32.partialorder %v1217_v9, 8.507059e+37  ;;  %vm1335_vm1 = vmor %vm1333_vm15, %vm1334_vm11  ;;  %v1340_v61 = vor.u32 1.1754944e-38, %v1339_v10 }
 0x131   : > { %v1331_v29 = vmul.f32 %v1955_v23, %v1330_v35  ;;  %vm1338_vm2 = vcmp.eq.f32.partialorder %v1337_v6, 8.507059e+37  ;;  %v1365_v2 = vmul.f32 %v1206_v33, %v2673_v3  ;;  %v1373_v53 = vmul.f32 %v1326_v45, %v2676_v55 }
 0x132   : > { %v1212_v44 = vadd.f32 %v1953_v50, %v1211_v5 }
 0x133   : > { %v1332_v18 = vadd.f32 %v1955_v23, %v1331_v29 }
 0x134   : > { %v1216_v37 = vsel %vm1215_vm14, %v1953_v50, %v1212_v44 }
 0x135   : > { %v1221_v27 = vsel %vm1218_vm0, %v1220_v15, %v1216_v37  ;;  %v1336_v16 = vsel %vm1335_vm1, %v1955_v23, %v1332_v18 }
 0x136   : > { %v1366_v32 = vmul.f32 %v1221_v27, %v2773_v31  ;;  %v1341_v36 = vsel %vm1338_vm2, %v1340_v61, %v1336_v16 }
 0x137   : > { %v1374_v59 = vmul.f32 %v1341_v36, %v2775_v34 }
 0x138   : > { %v1759_v24 = vpack.c.bf16 %v1366_v32, %v1365_v2 }
 0x139   : > { %v1779_v63 = vpack.c.bf16 %v1374_v59, %v1373_v53 }
 0x13a   : > { %1791 = vst [vmem:[%s2296_s4 + $0x58] sm:$0xff] %v1759_v24  }
 0x13b   : > { %1795 = vst [vmem:[%s2296_s4 + $0x78] sm:$0xff] %v1779_v63  }
 0x13c PF: > { %s13_s14 = sadd.s32 1, %s1979_s14   ;;  %s2982_s12 = smov %s1975_s13 }
 0x13d   : > { %p10_p5 = scmp.ge.s32.totalorder %s13_s14, 4   ;;  %s2983_s13 = smov %s2985_s15 }
 0x13f   :  { %12 = sbr.rel (!%p10_p5) target bundleno = 2 (0x2), region = 76 }

// kernel: deyolov6_forward.14
= control target key start
LH: loop header
LB: loop body
LE: loop exit
PB: predicated region body
PF: predicated region fallthrough
CT: control target
= control target key end

     0   :  { %vm211_vm0 = vcmask 130048   ;;  %s1522_s1 = inlined_call_operand.vmem [shape: bf16[144,128], index: 1, kind: input, shape index: {}]   ;;  %s1523_s0 = inlined_call_operand.vmem [shape: bf16[128,144], index: 0, kind: input, shape index: {}]   ;;  %s1524_s2 = inlined_call_operand.vmem [shape: f32[1,128], index: 2, kind: input, shape index: {}]   ;;  %s1525_s3 = inlined_call_operand.vmem [shape: bf16[128,128], index: 3, kind: output, shape index: {}]  }
   0x1   :  { %v908_v0 = vld [vmem:[%s1522_s1 + $0x38] sm:$0xff]  ;;  %v909_v1 = vld [vmem:[%s1522_s1 + $0x40] sm:$0xff]  ;;  %v765_v3 = vld [vmem:[%s1523_s0 + $0x8] sm:$0xf0] }
   0x2   :  { %v885_v2 = vld [vmem:[%s1523_s0 + $0x4] sm:$0xf]  ;;  %236 = vmatpush.bf16.msra.mxu0 %v908_v0  ;;  %957 = vmatpush.bf16.msra.mxu2 %v908_v0  ;;  %v907_v5 = vld [vmem:[%s1522_s1 + $0x30] sm:$0xff]  ;;  %v906_v6 = vld [vmem:[%s1522_s1 + $0x28] sm:$0xff] }
   0x3   :  { %v768_v4 = vor.u32 %v885_v2, %v765_v3  ;;  %292 = vmatpush.bf16.msra.mxu1 %v909_v1  ;;  %965 = vmatpush.bf16.msra.mxu3 %v909_v1  ;;  %v895_v7 = vld [vmem:[%s1523_s0 + $0x54] sm:$0xf]  ;;  %v805_v8 = vld [vmem:[%s1523_s0 + $0x58] sm:$0xf0]  ;;  %v905_v10 = vld [vmem:[%s1522_s1 + $0x20] sm:$0xff] }
   0x4   :  { %v808_v9 = vor.u32 %v895_v7, %v805_v8  ;;  %v904_v11 = vld [vmem:[%s1522_s1 + $0x18] sm:$0xff]  ;;  %v887_v12 = vld [vmem:[%s1523_s0 + $0x14] sm:$0xf]  ;;  %v902_v16 = vld [vmem:[%s1522_s1 + $0x8] sm:$0xff] }
   0x5   :  { %v773_v13 = vld [vmem:[%s1523_s0 + $0x18] sm:$0xf0]  ;;  %v903_v15 = vld [vmem:[%s1522_s1 + $0x10] sm:$0xff]  ;;  %v897_v17 = vld [vmem:[%s1523_s0 + $0x64] sm:$0xf] }
   0x6   :  { %861 = vmatmul.msk.bf16.vlgmr.msra.gmra.mxu1 %vm211_vm0, %v768_v4  ;;  %237 = vmatpush.bf16.msra.mxu0 %v907_v5  ;;  %v776_v14 = vor.u32 %v887_v12, %v773_v13  ;;  %v813_v18 = vld [vmem:[%s1523_s0 + $0x68] sm:$0xf0]  ;;  %v901_v20 = vld [vmem:[%s1522_s1] sm:$0xff]  ;;  %v886_v22 = vld [vmem:[%s1523_s0 + $0x4] sm:$0xf0] }
   0x7   :  { %958 = vmatpush.bf16.msra.mxu2 %v907_v5  ;;  %866 = vmatmul.msk.bf16.vlgmr.msra.gmra.mxu3 %vm211_vm0, %v808_v9  ;;  %v816_v19 = vor.u32 %v897_v17, %v813_v18  ;;  %v763_v21 = vld [vmem:[%s1523_s0] sm:$0xf]  ;;  %v894_v24 = vld [vmem:[%s1523_s0 + $0x44] sm:$0xf0]  ;;  %v889_v27 = vld [vmem:[%s1523_s0 + $0x24] sm:$0xf] }
   0x8   :  { %v795_v23 = vld [vmem:[%s1523_s0 + $0x40] sm:$0xf]  ;;  %v764_v25 = vor.u32 %v886_v22, %v763_v21  ;;  %v781_v28 = vld [vmem:[%s1523_s0 + $0x28] sm:$0xf0]  ;;  %v899_v30 = vld [vmem:[%s1523_s0 + $0x74] sm:$0xf] }
   0x9   :  { %v796_v26 = vor.u32 %v894_v24, %v795_v23  ;;  %v784_v29 = vor.u32 %v889_v27, %v781_v28  ;;  %v821_v31 = vld [vmem:[%s1523_s0 + $0x78] sm:$0xf0]  ;;  %v771_v33 = vld [vmem:[%s1523_s0 + $0x10] sm:$0xf]  ;;  %v888_v34 = vld [vmem:[%s1523_s0 + $0x14] sm:$0xf0] }
   0xa   :  { %238 = vmatpush.bf16.msra.mxu0 %v906_v6  ;;  %v824_v32 = vor.u32 %v899_v30, %v821_v31  ;;  %v803_v35 = vld [vmem:[%s1523_s0 + $0x50] sm:$0xf]  ;;  %v896_v36 = vld [vmem:[%s1523_s0 + $0x54] sm:$0xf0]  ;;  %v772_v37 = vor.u32 %v888_v34, %v771_v33  ;;  %v891_v39 = vld [vmem:[%s1523_s0 + $0x34] sm:$0xf] }
   0xb   :  { %959 = vmatpush.bf16.msra.mxu2 %v906_v6  ;;  %v804_v38 = vor.u32 %v896_v36, %v803_v35  ;;  %v789_v40 = vld [vmem:[%s1523_s0 + $0x38] sm:$0xf0]  ;;  %v779_v42 = vld [vmem:[%s1523_s0 + $0x20] sm:$0xf]  ;;  %v890_v43 = vld [vmem:[%s1523_s0 + $0x24] sm:$0xf0] }
   0xc   :  { %v792_v41 = vor.u32 %v891_v39, %v789_v40  ;;  %v811_v44 = vld [vmem:[%s1523_s0 + $0x60] sm:$0xf]  ;;  %v898_v45 = vld [vmem:[%s1523_s0 + $0x64] sm:$0xf0]  ;;  %v780_v46 = vor.u32 %v890_v43, %v779_v42  ;;  %v893_v48 = vld [vmem:[%s1523_s0 + $0x44] sm:$0xf] }
   0xd   :  { %v812_v47 = vor.u32 %v898_v45, %v811_v44  ;;  %v797_v49 = vld [vmem:[%s1523_s0 + $0x48] sm:$0xf0]  ;;  %v787_v51 = vld [vmem:[%s1523_s0 + $0x30] sm:$0xf]  ;;  %v892_v52 = vld [vmem:[%s1523_s0 + $0x34] sm:$0xf0] }
   0xe   :  { %239 = vmatpush.bf16.msra.mxu0 %v905_v10  ;;  %v800_v50 = vor.u32 %v893_v48, %v797_v49  ;;  %v819_v53 = vld [vmem:[%s1523_s0 + $0x70] sm:$0xf]  ;;  %v900_v54 = vld [vmem:[%s1523_s0 + $0x74] sm:$0xf0]  ;;  %v788_v55 = vor.u32 %v892_v52, %v787_v51  ;;  %v1185_v61 = vld [vmem:[%s1524_s2] ss:$0 sm:$0xff] }
   0xf   :  { %960 = vmatpush.bf16.msra.mxu2 %v905_v10  ;;  %v820_v56 = vor.u32 %v900_v54, %v819_v53 }
  0x12   :  { %240 = vmatpush.bf16.msra.mxu0 %v904_v11 }
  0x13   :  { %961 = vmatpush.bf16.msra.mxu2 %v904_v11 }
  0x16   :  { %862 = vmatmul.msk.bf16.gmra.mxu1 %vm211_vm0, %v776_v14  ;;  %241 = vmatpush.bf16.msra.mxu0 %v903_v15 }
  0x17   :  { %962 = vmatpush.bf16.msra.mxu2 %v903_v15  ;;  %867 = vmatmul.msk.bf16.gmra.mxu3 %vm211_vm0, %v816_v19 }
  0x1a   :  { %242 = vmatpush.bf16.msra.mxu0 %v902_v16 }
  0x1b   :  { %963 = vmatpush.bf16.msra.mxu2 %v902_v16 }
  0x1e   :  { %243 = vmatpush.bf16.msra.mxu0 %v901_v20 }
  0x1f   :  { %964 = vmatpush.bf16.msra.mxu2 %v901_v20 }
  0x21   :  { %244 = vmatmul.bf16.vlgmr.msra.gmra.mxu0 %v764_v25 }
  0x22   :  { %264 = vmatmul.bf16.vlgmr.msra.gmra.mxu2 %v796_v26 }
  0x26   :  { %863 = vmatmul.msk.bf16.gmra.mxu1 %vm211_vm0, %v784_v29 }
  0x27   :  { %868 = vmatmul.msk.bf16.gmra.mxu3 %vm211_vm0, %v824_v32 }
  0x31   :  { %249 = vmatmul.bf16.gmra.mxu0 %v772_v37 }
  0x32   :  { %269 = vmatmul.bf16.gmra.mxu2 %v804_v38 }
  0x36   :  { %864 = vmatmul.msk.bf16.gmra.mxu1 %vm211_vm0, %v792_v41 }
  0x41   :  { %254 = vmatmul.bf16.gmra.mxu0 %v780_v46 }
  0x42   :  { %274 = vmatmul.bf16.gmra.mxu2 %v812_v47 }
  0x46   :  { %865 = vmatmul.msk.bf16.gmra.mxu1 %vm211_vm0, %v800_v50 }
  0x51   :  { %259 = vmatmul.bf16.gmra.mxu0 %v788_v55 }
  0x52   :  { %279 = vmatmul.bf16.gmra.mxu2 %v820_v56 }
  0x83   :  { %v294_v57 = vpop.f32.mrf.mxu1 }
  0x8a   :  { %v319_v14 = vpop.f32.mrf.mxu3 }
  0x8b   :  { %v296_v58 = vpop.f32.mrf.mxu1 }
  0x92   :  { %v321_v30 = vpop.f32.mrf.mxu3 }
  0x93   :  { %v299_v59 = vpop.f32.mrf.mxu1 }
  0x9b   :  { %v301_v60 = vpop.f32.mrf.mxu1 }
  0x9e   :  { %v245_v62 = vpop.f32.mrf.mxu0 }
  0x9f   :  { %v295_v63 = vadd.f32 %v294_v57, %v245_v62 }
  0xa1   :  { %v1188_v0 = vadd.f32 %v1185_v61, %v295_v63  ;;  %v324_v63 = vpop.f32.mrf.mxu3 }
  0xa3   :  { %v869_v1 = vmul.f32 -1.442695, %v1188_v0  ;;  %v304_v2 = vpop.f32.mrf.mxu1 }
  0xa5   :  { %967 = vpow2.f32 %v869_v1  ;;  %v1191_v3 = vpop.f32.mrf.mxu2 }
  0xa6   :  { %v247_v4 = vpop.f32.mrf.mxu0 }
  0xa7   :  { %v297_v5 = vadd.f32 %v296_v58, %v247_v4 }
  0xa9   :  { %v1194_v6 = vadd.f32 %v1185_v61, %v297_v5 }
  0xab   :  { %v968_v7 = vpop.eup %967  ;;  %v870_v8 = vmul.f32 -1.442695, %v1194_v6  ;;  %v1197_v9 = vpop.f32.mrf.mxu1 }
  0xac   :  { %v453_v10 = vadd.f32 1.0, %v968_v7 }
  0xad   :  { %969 = vpow2.f32 %v870_v8  ;;  %v1199_v11 = vpop.f32.mrf.mxu2 }
  0xae   :  { %971 = vrcp.f32 %v453_v10  ;;  %v250_v12 = vpop.f32.mrf.mxu0  ;;  %vm474_vm2 = vweird.f32 %v453_v10  ;;  %v480_v40 = vand.u32 2147483648, %v453_v10  ;;  %v478_v42 = vand.u32 2147483647, %v453_v10 }
  0xaf   :  { %v300_v13 = vadd.f32 %v299_v59, %v250_v12 }
  0xb0   :  { %v481_v51 = vor.u32 1.1754944e-38, %v480_v40  ;;  %vm479_vm5 = vcmp.eq.f32.partialorder %v478_v42, 8.507059e+37 }
  0xb1   :  { %v1202_v15 = vadd.f32 %v1185_v61, %v300_v13 }
  0xb3   :  { %v970_v16 = vpop.eup %969  ;;  %v871_v17 = vmul.f32 -1.442695, %v1202_v15  ;;  %v1205_v18 = vpop.f32.mrf.mxu1 }
  0xb4   :  { %v972_v19 = vpop.eup %971  ;;  %v454_v20 = vadd.f32 1.0, %v970_v16 }
  0xb5   :  { %v470_v21 = vmul.f32 %v972_v19, %v453_v10  ;;  %973 = vpow2.f32 %v871_v17  ;;  %v270_v22 = vpop.f32.mrf.mxu2  ;;  %vm475_vm1 = vweird.f32 %v972_v19 }
  0xb6   :  { %975 = vrcp.f32 %v454_v20  ;;  %v252_v23 = vpop.f32.mrf.mxu0  ;;  %v320_v25 = vadd.f32 %v319_v14, %v270_v22  ;;  %v495_v44 = vand.u32 2147483648, %v454_v20  ;;  %vm1220_vm3 = vmor %vm474_vm2, %vm475_vm1  ;;  %v493_v50 = vand.u32 2147483647, %v454_v20 }
  0xb7   :  { %v471_v24 = vsub.f32 1.0, %v470_v21  ;;  %v302_v26 = vadd.f32 %v301_v60, %v252_v23  ;;  %vm489_vm6 = vweird.f32 %v454_v20 }
  0xb8   :  { %v1208_v28 = vadd.f32 %v1185_v61, %v320_v25  ;;  %v496_v56 = vor.u32 1.1754944e-38, %v495_v44  ;;  %vm494_vm8 = vcmp.eq.f32.partialorder %v493_v50, 8.507059e+37 }
  0xb9   :  { %v472_v27 = vmul.f32 %v972_v19, %v471_v24  ;;  %v1211_v29 = vadd.f32 %v1185_v61, %v302_v26 }
  0xba   :  { %v879_v32 = vmul.f32 -1.442695, %v1208_v28 }
  0xbb   :  { %v974_v31 = vpop.eup %973  ;;  %v872_v33 = vmul.f32 -1.442695, %v1211_v29  ;;  %v1215_v34 = vpop.f32.mrf.mxu1  ;;  %v473_v37 = vadd.f32 %v972_v19, %v472_v27 }
  0xbc   :  { %v976_v35 = vpop.eup %975  ;;  %v1217_v36 = vadd.f32 1.0, %v974_v31  ;;  %977 = vpow2.f32 %v879_v32 }
  0xbd   :  { %v485_v38 = vmul.f32 %v976_v35, %v454_v20  ;;  %v272_v39 = vpop.f32.mrf.mxu2  ;;  %v477_v48 = vsel %vm1220_vm3, %v972_v19, %v473_v37  ;;  %vm490_vm4 = vweird.f32 %v976_v35 }
  0xbe   :  { %979 = vrcp.f32 %v1217_v36  ;;  %v255_v41 = vpop.f32.mrf.mxu0  ;;  %v322_v46 = vadd.f32 %v321_v30, %v272_v39  ;;  %v482_v59 = vsel %vm479_vm5, %v481_v51, %v477_v48  ;;  %vm491_vm7 = vmor %vm489_vm6, %vm490_vm4  ;;  %v510_v23 = vand.u32 2147483648, %v1217_v36  ;;  %v326_v39 = vpop.f32.mrf.mxu3 }
  0xbf   :  { %v486_v43 = vsub.f32 1.0, %v485_v38  ;;  %981 = vpow2.f32 %v872_v33  ;;  %v305_v47 = vadd.f32 %v304_v2, %v255_v41  ;;  %v709_v12 = vmul.f32 %v482_v59, %v1188_v0 }
  0xc0   :  { %v1227_v52 = vadd.f32 %v1185_v61, %v322_v46  ;;  %vm504_vm9 = vweird.f32 %v1217_v36  ;;  %v511_v32 = vor.u32 1.1754944e-38, %v510_v23 }
  0xc1   :  { %v487_v49 = vmul.f32 %v976_v35, %v486_v43  ;;  %v1230_v53 = vadd.f32 %v1185_v61, %v305_v47 }
  0xc2   :  { %v978_v54 = vpop.eup %977  ;;  %v880_v62 = vmul.f32 -1.442695, %v1227_v52 }
  0xc3   :  { %v488_v55 = vadd.f32 %v976_v35, %v487_v49  ;;  %v314_v57 = vpop.f32.mrf.mxu1  ;;  %v1234_v60 = vadd.f32 1.0, %v978_v54  ;;  %v873_v10 = vmul.f32 -1.442695, %v1230_v53 }
  0xc4   :  { %v1232_v58 = vpop.eup %979  ;;  %v315_v1 = vadd.f32 %v314_v57, %v1191_v3  ;;  %v508_v3 = vand.u32 2147483647, %v1217_v36 }
  0xc5   :  { %v982_v2 = vpop.eup %981  ;;  %v492_v4 = vsel %vm491_vm7, %v976_v35, %v488_v55  ;;  %v500_v5 = vmul.f32 %v1232_v58, %v1217_v36  ;;  %v275_v7 = vpop.f32.mrf.mxu2  ;;  %983 = vrcp.f32 %v1234_v60  ;;  %vm505_vm10 = vweird.f32 %v1232_v58 }
  0xc6   :  { %v497_v8 = vsel %vm494_vm8, %v496_v56, %v492_v4  ;;  %v1244_v16 = vadd.f32 1.0, %v982_v2  ;;  %985 = vpow2.f32 %v880_v62  ;;  %v1248_v17 = vadd.f32 %v1185_v61, %v315_v1  ;;  %v257_v20 = vpop.f32.mrf.mxu0  ;;  %vm1281_vm13 = vmor %vm504_vm9, %vm505_vm10 }
  0xc7   :  { %v710_v13 = vmul.f32 %v497_v8, %v1194_v6  ;;  %v501_v14 = vsub.f32 1.0, %v500_v5  ;;  %v325_v19 = vadd.f32 %v324_v63, %v275_v7  ;;  %v307_v24 = vadd.f32 %v1197_v9, %v257_v20 }
  0xc8   :  { %987 = vrcp.f32 %v1244_v16  ;;  %v877_v0 = vmul.f32 -1.442695, %v1248_v17  ;;  %vm1267_vm11 = vcmp.eq.f32.partialorder %v508_v3, 8.507059e+37  ;;  %vm624_vm12 = vweird.f32 %v1234_v60 }
  0xc9   :  { %v913_v21 = vpack.c.bf16 %v710_v13, %v709_v12  ;;  %v502_v22 = vmul.f32 %v1232_v58, %v501_v14  ;;  %989 = vpow2.f32 %v873_v10  ;;  %v1258_v6 = vadd.f32 %v1185_v61, %v325_v19 }
  0xca   :  { %991 = vpow2.f32 %v877_v0  ;;  %v628_v37 = vand.u32 2147483647, %v1234_v60  ;;  %v630_v50 = vand.u32 2147483648, %v1234_v60  ;;  %v523_v51 = vand.u32 2147483647, %v1244_v16 }
  0xcb   :  { %914 = vst [vmem:[%s1525_s3] sm:$0xff] %v913_v21   ;;  %v316_v25 = vpop.f32.mrf.mxu1  ;;  %v1261_v26 = vpop.eup %983  ;;  %v503_v27 = vadd.f32 %v1232_v58, %v502_v22  ;;  %v881_v38 = vmul.f32 -1.442695, %v1258_v6  ;;  %v525_v56 = vand.u32 2147483648, %v1244_v16  ;;  %vm519_vm1 = vweird.f32 %v1244_v16 }
  0xcc   :  { %v317_v30 = vadd.f32 %v316_v25, %v1199_v11  ;;  %v620_v33 = vmul.f32 %v1261_v26, %v1234_v60  ;;  %v986_v35 = vpop.eup %985  ;;  %v1277_v11 = vadd.f32 %v1185_v61, %v307_v24  ;;  %vm1299_vm14 = vcmp.eq.f32.partialorder %v628_v37, 8.507059e+37 }
  0xcd   :  { %v277_v9 = vpop.f32.mrf.mxu2  ;;  %v1285_v43 = vadd.f32 1.0, %v986_v35  ;;  %v507_v47 = vsel %vm1281_vm13, %v1232_v58, %v503_v27  ;;  %993 = vpow2.f32 %v881_v38  ;;  %vm625_vm15 = vweird.f32 %v1261_v26 }
  0xce   :  { %v988_v40 = vpop.eup %987  ;;  %v621_v42 = vsub.f32 1.0, %v620_v33  ;;  %v1288_v44 = vadd.f32 %v1185_v61, %v317_v30  ;;  %v327_v45 = vadd.f32 %v326_v39, %v277_v9  ;;  %v874_v36 = vmul.f32 -1.442695, %v1277_v11  ;;  %vm1321_vm2 = vmor %vm624_vm12, %vm625_vm15 }
  0xcf   :  { %v990_v46 = vpop.eup %989  ;;  %v515_v48 = vmul.f32 %v988_v40, %v1244_v16  ;;  %995 = vrcp.f32 %v1285_v43  ;;  %v512_v59 = vsel %vm1267_vm11, %v511_v32, %v507_v47  ;;  %vm520_vm0 = vweird.f32 %v988_v40  ;;  %v260_v47 = vpop.f32.mrf.mxu0 }
  0xd0   :  { %v622_v49 = vmul.f32 %v1261_v26, %v621_v42  ;;  %v1304_v57 = vadd.f32 1.0, %v990_v46  ;;  %997 = vpow2.f32 %v874_v36  ;;  %v992_v58 = vpop.eup %991  ;;  %v878_v62 = vmul.f32 -1.442695, %v1288_v44  ;;  %vm521_vm4 = vmor %vm519_vm1, %vm520_vm0 }
  0xd1   :  { %v516_v55 = vsub.f32 1.0, %v515_v48  ;;  %v1311_v63 = vadd.f32 %v1185_v61, %v327_v45  ;;  %v631_v4 = vor.u32 1.1754944e-38, %v630_v50  ;;  %v643_v5 = vand.u32 2147483647, %v1285_v43 }
  0xd2   :  { %v623_v1 = vadd.f32 %v1261_v26, %v622_v49  ;;  %999 = vrcp.f32 %v1304_v57  ;;  %v1317_v7 = vadd.f32 1.0, %v992_v58  ;;  %vm524_vm3 = vcmp.eq.f32.partialorder %v523_v51, 8.507059e+37 }
  0xd3   :  { %v517_v2 = vmul.f32 %v988_v40, %v516_v55  ;;  %v994_v8 = vpop.eup %993  ;;  %1001 = vpow2.f32 %v878_v62  ;;  %v882_v13 = vmul.f32 -1.442695, %v1311_v63  ;;  %v711_v3 = vmul.f32 %v512_v59, %v1202_v15 }
  0xd4   :  { %v526_v16 = vor.u32 1.1754944e-38, %v525_v56  ;;  %v645_v19 = vand.u32 2147483648, %v1285_v43  ;;  %1003 = vrcp.f32 %v1317_v7  ;;  %v627_v60 = vsel %vm1321_vm2, %v1261_v26, %v623_v1 }
  0xd5   :  { %v518_v12 = vadd.f32 %v988_v40, %v517_v2  ;;  %v996_v14 = vpop.eup %995  ;;  %vm639_vm5 = vweird.f32 %v1285_v43  ;;  %vm1334_vm6 = vcmp.eq.f32.partialorder %v643_v5, 8.507059e+37  ;;  %v538_v15 = vand.u32 2147483647, %v1304_v57 }
  0xd6   :  { %v998_v20 = vpop.eup %997  ;;  %v635_v22 = vmul.f32 %v996_v14, %v1285_v43  ;;  %v1339_v24 = vadd.f32 1.0, %v994_v8  ;;  %1005 = vpow2.f32 %v882_v13  ;;  %v632_v26 = vsel %vm1299_vm14, %v631_v4, %v627_v60  ;;  %v280_v4 = vpop.f32.mrf.mxu2 }
  0xd7   :  { %v522_v21 = vsel %vm521_vm4, %v988_v40, %v518_v12  ;;  %v1342_v31 = vadd.f32 1.0, %v998_v20  ;;  %v646_v32 = vor.u32 1.1754944e-38, %v645_v19  ;;  %v540_v9 = vand.u32 2147483648, %v1304_v57 }
  0xd8   :  { %v527_v23 = vsel %vm524_vm3, %v526_v16, %v522_v21  ;;  %v1000_v25 = vpop.eup %999  ;;  %v636_v30 = vsub.f32 1.0, %v635_v22  ;;  %vm640_vm7 = vweird.f32 %v996_v14  ;;  %1007 = vrcp.f32 %v1339_v24  ;;  %v329_v16 = vpop.f32.mrf.mxu3 }
  0xd9   :  { %v712_v27 = vmul.f32 %v527_v23, %v1211_v29  ;;  %v530_v33 = vmul.f32 %v1000_v25, %v1304_v57  ;;  %v1002_v35 = vpop.eup %1001  ;;  %vm534_vm8 = vweird.f32 %v1304_v57  ;;  %v598_v40 = vand.u32 2147483647, %v1317_v7  ;;  %vm641_vm10 = vmor %vm639_vm5, %vm640_vm7 }
  0xda   :  { %v637_v38 = vmul.f32 %v996_v14, %v636_v30  ;;  %v1349_v39 = vpop.eup %1003  ;;  %1009 = vrcp.f32 %v1342_v31  ;;  %v719_v41 = vmul.f32 %v632_v26, %v1208_v28  ;;  %vm1358_vm9 = vcmp.eq.f32.partialorder %v538_v15, 8.507059e+37 }
  0xdb   :  { %v918_v37 = vpack.c.bf16 %v712_v27, %v711_v3  ;;  %v531_v29 = vsub.f32 1.0, %v530_v33  ;;  %v590_v46 = vmul.f32 %v1349_v39, %v1317_v7  ;;  %vm535_vm11 = vweird.f32 %v1000_v25  ;;  %v262_v33 = vpop.f32.mrf.mxu0 }
  0xdc   :  { %v638_v42 = vadd.f32 %v996_v14, %v637_v38  ;;  %v541_v36 = vor.u32 1.1754944e-38, %v540_v9  ;;  %vm594_vm12 = vweird.f32 %v1317_v7  ;;  %v1006_v28 = vpop.eup %1005  ;;  %v600_v51 = vand.u32 2147483648, %v1317_v7  ;;  %vm1382_vm15 = vmor %vm534_vm8, %vm535_vm11 }
  0xdd   :  { %950 = vst [vmem:[%s1525_s3 + $0x8] sm:$0xff] %v918_v37   ;;  %v532_v48 = vmul.f32 %v1000_v25, %v531_v29  ;;  %v591_v50 = vsub.f32 1.0, %v590_v46  ;;  %v1368_v54 = vadd.f32 1.0, %v1002_v35  ;;  %vm595_vm13 = vweird.f32 %v1349_v39 }
  0xde   :  { %v642_v49 = vsel %vm641_vm10, %v996_v14, %v638_v42  ;;  %vm1373_vm14 = vcmp.eq.f32.partialorder %v598_v40, 8.507059e+37  ;;  %v1377_v58 = vpop.eup %1007  ;;  %v1388_v2 = vadd.f32 1.0, %v1006_v28  ;;  %v553_v57 = vand.u32 2147483647, %v1342_v31  ;;  %vm1404_vm0 = vmor %vm594_vm12, %vm595_vm13 }
  0xdf   :  { %v647_v55 = vsel %vm1334_vm6, %v646_v32, %v642_v49  ;;  %v533_v56 = vadd.f32 %v1000_v25, %v532_v48  ;;  %v592_v1 = vmul.f32 %v1349_v39, %v591_v50  ;;  %1011 = vrcp.f32 %v1368_v54  ;;  %v282_v49 = vpop.f32.mrf.mxu2 }
  0xe0   :  { %v720_v59 = vmul.f32 %v647_v55, %v1227_v52  ;;  %v1010_v5 = vpop.eup %1009  ;;  %v650_v52 = vmul.f32 %v1377_v58, %v1339_v24  ;;  %v555_v10 = vand.u32 2147483648, %v1342_v31  ;;  %v601_v14 = vor.u32 1.1754944e-38, %v600_v51 }
  0xe1   :  { %v537_v8 = vsel %vm1382_vm15, %v1000_v25, %v533_v56  ;;  %v593_v13 = vadd.f32 %v1349_v39, %v592_v1  ;;  %v545_v3 = vmul.f32 %v1010_v5, %v1342_v31  ;;  %v658_v21 = vand.u32 2147483647, %v1339_v24 }
  0xe2   :  { %v938_v12 = vpack.c.bf16 %v720_v59, %v719_v41  ;;  %v542_v19 = vsel %vm1358_vm9, %v541_v36, %v537_v8  ;;  %v651_v60 = vsub.f32 1.0, %v650_v52  ;;  %v660_v22 = vand.u32 2147483648, %v1339_v24  ;;  %v331_v59 = vpop.f32.mrf.mxu3 }
  0xe3   :  { %v597_v23 = vsel %vm1404_vm0, %v1349_v39, %v593_v13  ;;  %vm654_vm1 = vweird.f32 %v1339_v24  ;;  %v546_v7 = vsub.f32 1.0, %v545_v3  ;;  %v613_v0 = vand.u32 2147483647, %v1368_v54 }
  0xe4   :  { %954 = vst [vmem:[%s1525_s3 + $0x28] sm:$0xff] %v938_v12   ;;  %1013 = vrcp.f32 %v1388_v2  ;;  %vm549_vm2 = vweird.f32 %v1342_v31  ;;  %vm1420_vm3 = vcmp.eq.f32.partialorder %v553_v57, 8.507059e+37  ;;  %v556_v25 = vor.u32 1.1754944e-38, %v555_v10 }
  0xe5   :  { %v615_v27 = vand.u32 2147483648, %v1368_v54  ;;  %v1012_v30 = vpop.eup %1011  ;;  %v652_v26 = vmul.f32 %v1377_v58, %v651_v60  ;;  %vm655_vm4 = vweird.f32 %v1377_v58  ;;  %v547_v32 = vmul.f32 %v1010_v5, %v546_v7 }
  0xe6   :  { %vm550_vm5 = vweird.f32 %v1010_v5  ;;  %v713_v9 = vmul.f32 %v542_v19, %v1230_v53  ;;  %v602_v35 = vsel %vm1373_vm14, %v601_v14, %v597_v23  ;;  %v605_v37 = vmul.f32 %v1012_v30, %v1368_v54  ;;  %vm1463_vm11 = vmor %vm654_vm1, %vm655_vm4 }
  0xe7   :  { %vm609_vm6 = vweird.f32 %v1368_v54  ;;  %v548_v38 = vadd.f32 %v1010_v5, %v547_v32  ;;  %vm1432_vm7 = vcmp.eq.f32.partialorder %v613_v0, 8.507059e+37  ;;  %v310_v29 = vadd.f32 %v1205_v18, %v260_v47  ;;  %vm551_vm9 = vmor %vm549_vm2, %vm550_vm5 }
  0xe8   :  { %v330_v40 = vadd.f32 %v329_v16, %v280_v4  ;;  %vm1437_vm8 = vcmp.eq.f32.partialorder %v658_v21, 8.507059e+37  ;;  %v606_v53 = vsub.f32 1.0, %v605_v37  ;;  %v616_v42 = vor.u32 1.1754944e-38, %v615_v27 }
  0xe9   :  { %v673_v45 = vand.u32 2147483647, %v1388_v2  ;;  %v312_v46 = vadd.f32 %v1215_v34, %v262_v33  ;;  %v653_v36 = vadd.f32 %v1377_v58, %v652_v26  ;;  %v552_v28 = vsel %vm551_vm9, %v1010_v5, %v548_v38 }
  0xea   :  { %v1014_v48 = vpop.eup %1013  ;;  %v1447_v18 = vadd.f32 %v1185_v61, %v310_v29  ;;  %v1450_v47 = vadd.f32 %v1185_v61, %v330_v40  ;;  %v557_v31 = vsel %vm1420_vm3, %v556_v25, %v552_v28  ;;  %v607_v50 = vmul.f32 %v1012_v30, %v606_v53 }
  0xeb   :  { %vm610_vm10 = vweird.f32 %v1012_v30  ;;  %v665_v51 = vmul.f32 %v1014_v48, %v1388_v2  ;;  %v714_v34 = vmul.f32 %v557_v31, %v1277_v11  ;;  %v675_v55 = vand.u32 2147483648, %v1388_v2 }
  0xec   :  { %v875_v56 = vmul.f32 -1.442695, %v1447_v18  ;;  %v883_v43 = vmul.f32 -1.442695, %v1450_v47  ;;  %v608_v1 = vadd.f32 %v1012_v30, %v607_v50  ;;  %v1468_v5 = vadd.f32 %v1185_v61, %v312_v46  ;;  %vm611_vm12 = vmor %vm609_vm6, %vm610_vm10 }
  0xed   :  { %v666_v4 = vsub.f32 1.0, %v665_v51  ;;  %v332_v11 = vadd.f32 %v331_v59, %v282_v49  ;;  %v657_v8 = vsel %vm1463_vm11, %v1377_v58, %v653_v36  ;;  %v923_v52 = vpack.c.bf16 %v714_v34, %v713_v9 }
  0xee   :  { %vm670_vm13 = vweird.f32 %v1014_v48  ;;  %1015 = vpow2.f32 %v875_v56  ;;  %v612_v24 = vsel %vm611_vm12, %v1012_v30, %v608_v1  ;;  %v876_v10 = vmul.f32 -1.442695, %v1468_v5 }
  0xef   :  { %v667_v57 = vmul.f32 %v1014_v48, %v666_v4  ;;  %1017 = vpow2.f32 %v883_v43  ;;  %v661_v12 = vor.u32 1.1754944e-38, %v660_v22  ;;  %951 = vst [vmem:[%s1525_s3 + $0x10] sm:$0xff] %v923_v52   ;;  %v617_v13 = vsel %vm1432_vm7, %v616_v42, %v612_v24 }
  0xf0   :  { %vm669_vm14 = vweird.f32 %v1388_v2  ;;  %v1483_v54 = vadd.f32 %v1185_v61, %v332_v11  ;;  %v717_v58 = vmul.f32 %v602_v35, %v1248_v17  ;;  %v718_v14 = vmul.f32 %v617_v13, %v1288_v44 }
  0xf1   :  { %v668_v3 = vadd.f32 %v1014_v48, %v667_v57  ;;  %1019 = vpow2.f32 %v876_v10  ;;  %v662_v16 = vsel %vm1437_vm8, %v661_v12, %v657_v8  ;;  %vm671_vm15 = vmor %vm669_vm14, %vm670_vm13  ;;  %v676_v19 = vor.u32 1.1754944e-38, %v675_v55 }
  0xf2   :  { %v884_v20 = vmul.f32 -1.442695, %v1483_v54  ;;  %v933_v60 = vpack.c.bf16 %v718_v14, %v717_v58  ;;  %vm674_vm0 = vcmp.eq.f32.partialorder %v673_v45, 8.507059e+37  ;;  %v721_v17 = vmul.f32 %v662_v16, %v1258_v6 }
  0xf3   :  { %v672_v21 = vsel %vm671_vm15, %v1014_v48, %v668_v3 }
  0xf4   :  { %v1016_v2 = vpop.eup %1015  ;;  %v677_v61 = vsel %vm674_vm0, %v676_v19, %v672_v21  ;;  %1021 = vpow2.f32 %v884_v20  ;;  %953 = vst [vmem:[%s1525_s3 + $0x20] sm:$0xff] %v933_v60  }
  0xf5   :  { %v1018_v22 = vpop.eup %1017  ;;  %v722_v44 = vmul.f32 %v677_v61, %v1311_v63  ;;  %v459_v23 = vadd.f32 1.0, %v1016_v2 }
  0xf6   :  { %v467_v7 = vadd.f32 1.0, %v1018_v22 }
  0xf7   :  { %v1020_v0 = vpop.eup %1019  ;;  %v943_v15 = vpack.c.bf16 %v722_v44, %v721_v17  ;;  %1023 = vrcp.f32 %v459_v23  ;;  %vm564_vm1 = vweird.f32 %v459_v23  ;;  %v568_v39 = vand.u32 2147483647, %v459_v23 }
  0xf8   :  { %1025 = vrcp.f32 %v467_v7  ;;  %v460_v25 = vadd.f32 1.0, %v1020_v0  ;;  %v570_v29 = vand.u32 2147483648, %v459_v23  ;;  %vm684_vm3 = vweird.f32 %v467_v7 }
  0xf9   :  { %955 = vst [vmem:[%s1525_s3 + $0x30] sm:$0xff] %v943_v15   ;;  %v688_v42 = vand.u32 2147483647, %v467_v7  ;;  %v690_v28 = vand.u32 2147483648, %v467_v7  ;;  %vm569_vm7 = vcmp.eq.f32.partialorder %v568_v39, 8.507059e+37 }
  0xfa   :  { %v1022_v27 = vpop.eup %1021  ;;  %1027 = vrcp.f32 %v460_v25  ;;  %v585_v46 = vand.u32 2147483648, %v460_v25  ;;  %v583_v51 = vand.u32 2147483647, %v460_v25  ;;  %v571_v34 = vor.u32 1.1754944e-38, %v570_v29 }
  0xfb   :  { %v468_v6 = vadd.f32 1.0, %v1022_v27  ;;  %vm579_vm8 = vweird.f32 %v460_v25  ;;  %v691_v52 = vor.u32 1.1754944e-38, %v690_v28  ;;  %vm689_vm13 = vcmp.eq.f32.partialorder %v688_v42, 8.507059e+37 }
  0xfc   :  { %v586_v59 = vor.u32 1.1754944e-38, %v585_v46  ;;  %vm584_vm12 = vcmp.eq.f32.partialorder %v583_v51, 8.507059e+37 }
  0xfd   :  { %v1024_v30 = vpop.eup %1023  ;;  %1029 = vrcp.f32 %v468_v6  ;;  %v703_v62 = vand.u32 2147483647, %v468_v6  ;;  %v705_v1 = vand.u32 2147483648, %v468_v6  ;;  %vm699_vm14 = vweird.f32 %v468_v6 }
  0xfe   :  { %v1026_v26 = vpop.eup %1025  ;;  %v560_v32 = vmul.f32 %v1024_v30, %v459_v23  ;;  %vm565_vm2 = vweird.f32 %v1024_v30 }
  0xff   :  { %v680_v33 = vmul.f32 %v1026_v26, %v467_v7  ;;  %vm1499_vm4 = vmor %vm564_vm1, %vm565_vm2  ;;  %vm685_vm5 = vweird.f32 %v1026_v26  ;;  %v706_v14 = vor.u32 1.1754944e-38, %v705_v1  ;;  %vm704_vm0 = vcmp.eq.f32.partialorder %v703_v62, 8.507059e+37 }
 0x100   :  { %v561_v63 = vsub.f32 1.0, %v560_v32  ;;  %v1028_v9 = vpop.eup %1027  ;;  %vm1506_vm9 = vmor %vm684_vm3, %vm685_vm5 }
 0x101   :  { %v681_v35 = vsub.f32 1.0, %v680_v33  ;;  %v575_v38 = vmul.f32 %v1028_v9, %v460_v25  ;;  %vm580_vm6 = vweird.f32 %v1028_v9 }
 0x102   :  { %v562_v37 = vmul.f32 %v1024_v30, %v561_v63  ;;  %vm581_vm10 = vmor %vm579_vm8, %vm580_vm6 }
 0x103   :  { %v682_v40 = vmul.f32 %v1026_v26, %v681_v35  ;;  %v1030_v41 = vpop.eup %1029  ;;  %v576_v45 = vsub.f32 1.0, %v575_v38 }
 0x104   :  { %v563_v53 = vadd.f32 %v1024_v30, %v562_v37  ;;  %v695_v49 = vmul.f32 %v1030_v41, %v468_v6  ;;  %vm700_vm11 = vweird.f32 %v1030_v41 }
 0x105   :  { %v683_v36 = vadd.f32 %v1026_v26, %v682_v40  ;;  %v577_v50 = vmul.f32 %v1028_v9, %v576_v45  ;;  %vm701_vm15 = vmor %vm699_vm14, %vm700_vm11 }
 0x106   :  { %v567_v31 = vsel %vm1499_vm4, %v1024_v30, %v563_v53  ;;  %v696_v55 = vsub.f32 1.0, %v695_v49 }
 0x107   :  { %v578_v43 = vadd.f32 %v1028_v9, %v577_v50  ;;  %v572_v4 = vsel %vm569_vm7, %v571_v34, %v567_v31  ;;  %v687_v11 = vsel %vm1506_vm9, %v1026_v26, %v683_v36 }
 0x108   :  { %v697_v8 = vmul.f32 %v1030_v41, %v696_v55  ;;  %v715_v12 = vmul.f32 %v572_v4, %v1447_v18  ;;  %v692_v13 = vsel %vm689_vm13, %v691_v52, %v687_v11 }
 0x109   :  { %v582_v24 = vsel %vm581_vm10, %v1028_v9, %v578_v43  ;;  %v723_v20 = vmul.f32 %v692_v13, %v1450_v47 }
 0x10a   :  { %v587_v57 = vsel %vm584_vm12, %v586_v59, %v582_v24  ;;  %v698_v10 = vadd.f32 %v1030_v41, %v697_v8 }
 0x10b   :  { %v716_v58 = vmul.f32 %v587_v57, %v1468_v5 }
 0x10c   :  { %v702_v3 = vsel %vm701_vm15, %v1030_v41, %v698_v10 }
 0x10d   :  { %v928_v16 = vpack.c.bf16 %v716_v58, %v715_v12  ;;  %v707_v19 = vsel %vm704_vm0, %v706_v14, %v702_v3 }
 0x10e   :  { %v724_v60 = vmul.f32 %v707_v19, %v1483_v54 }
 0x10f   :  { %952 = vst [vmem:[%s1525_s3 + $0x18] sm:$0xff] %v928_v16  }
 0x110   :  { %v948_v21 = vpack.c.bf16 %v724_v60, %v723_v20 }
 0x112   :  { %956 = vst [vmem:[%s1525_s3 + $0x38] sm:$0xff] %v948_v21  }

// kernel: deyolov6_forward.15
= control target key start
LH: loop header
LB: loop body
LE: loop exit
PB: predicated region body
PF: predicated region fallthrough
CT: control target
= control target key end

     0   :  { %s848_s12 = smov 0   ;;  %s850_s13 = smov 0   ;;  %s991_s0 = inlined_call_operand.vmem [shape: bf16[32,384], index: 0, kind: input, shape index: {}]   ;;  %s992_s1 = inlined_call_operand.vmem [shape: bf16[384,128], index: 1, kind: input, shape index: {}]   ;;  %s993_s2 = inlined_call_operand.vmem [shape: f32[1,128], index: 2, kind: input, shape index: {}]   ;;  %s994_s3 = inlined_call_operand.vmem [shape: bf16[32,128], index: 3, kind: output, shape index: {}]  }
   0x1   :  { %s852_s14 = smov 0   ;;  %s854_s15 = smov 0  }
   0x2   :  { %s856_s16 = smov 0  }
   0x3 LB: > { %s25_s17 = sadd.s32 1, %s821_s15  ;;  %p48_p1 = scmp.ne.s32.totalorder %s813_s13, %s809_s12  ;;  %s825_s16 = sphi %s856_s16, %s13_s16   ;;  %s821_s15 = sphi %s854_s15, %s1008_s15   ;;  %s817_s14 = sphi %s852_s14, %s1007_s14   ;;  %s813_s13 = sphi %s850_s13, %s1006_s13   ;;  %s809_s12 = sphi %s848_s12, %s1005_s12  }
   0x4   : > { %p26_p0 = scmp.ge.s32.totalorder %s25_s17, 3  ;;  %p49_p2 = scmp.eq.s32.totalorder %s825_s16, 0 }
   0x5   : > { %s41_s19 = sadd.s32 1, %s813_s13  ;;  %p643_p5 = scmp.ge.s32.totalorder %s825_s16, 3 }
   0x6   : > { %s1010_s17 = smov (%p26_p0, %s25_s17), 0  ;;  %p50_p3 = por %p49_p2, %p48_p1 }
   0x7   : > { %s37_s18 = ssub.s32 %s821_s15, %s1010_s17  ;;  %162 = sbr.rel (%p643_p5) target bundleno = 20 (0x14), region = 20 }
   0x8   : > { %p39_p4 = scmp.eq.s32.totalorder %s37_s18, 0 }
   0xa   : > { %s883_s20 = scalar_select %p39_p4, %s813_s13, %s41_s19  }
   0xc   : > { %165 = sbr.rel (!%p50_p3) target bundleno = 20 (0x14), region = 24  ;;  %s167_s21 = sand.u32 (%p50_p3), 1, %s813_s13  }
   0xd   : > { %s645_s22 = sshll.u32 (%p50_p3), %s821_s15, 2  ;;  %s644_s23 = sshll.u32 (%p50_p3), %s167_s21, 4 }
   0xe   : > { %s174_s26 = scalar_lea.vmem (%p50_p3), %s991_s0, %s645_s22  ;;  %s169_s27 = scalar_lea.vmem (%p50_p3), [#allocation3], %s644_s23 }
   0xf   : > { %v191_v0 = vld [vmem:[%s174_s26] sm:$0xf] (%p50_p3)  ;;  %v193_v1 = vld [vmem:[%s174_s26 + $0xc] sm:$0xf] (%p50_p3)  ;;  %v195_v2 = vld [vmem:[%s174_s26 + $0x18] sm:$0xf] (%p50_p3) }
  0x10   : > { %192 = vst [vmem:[%s169_s27] sm:$0xf] (%p50_p3), %v191_v0  ;;  %v197_v3 = vld [vmem:[%s174_s26 + $0x24] sm:$0xf] (%p50_p3) }
  0x11   : > { %194 = vst [vmem:[%s169_s27 + $0x4] sm:$0xf] %v193_v1 }
  0x12   : > { %196 = vst [vmem:[%s169_s27 + $0x8] sm:$0xf] %v195_v2 }
  0x13   : > { %198 = vst [vmem:[%s169_s27 + $0xc] sm:$0xf] %v197_v3 }
  0x14 PF: > { %p646_p6 = scmp.ge.s32.totalorder %s825_s16, 1  ;;  %p241_p7 = scmp.lt.s32.totalorder %s825_s16, 4 }
  0x16   : > { %p242_p8 = pnand %p646_p6, %p241_p7 }
  0x17   : > { %s248_s28 = sand.u32 (!%p242_p8), 1, %s809_s12   ;;  %s648_s29 = sshll.u32 (!%p242_p8), %s817_s14, 4 }
  0x18   : > { %245 = sbr.rel (%p242_p8) target bundleno = 252 (0xfc), region = 69  ;;  %s895_s30 = sshll.u32 (!%p242_p8), %s248_s28, 4 }
  0x19   : > { %p287_p9 = scmp.lt.s32.totalorder (!%p242_p8), %s648_s29, 47  ;;  %s250_s8 = scalar_lea.vmem (!%p242_p8), [#allocation3], %s895_s30 }
  0x1a   : > { %p650_p10 = scmp.ne.s32.totalorder (!%p242_p8), %s817_s14, 0 }
  0x1d   : > { %s1012_s29 = smov (!%p287_p9, %s648_s29), 47  ;;  %310 = sbr.rel (%p650_p10) target bundleno = 39 (0x27), region = 77 }
  0x1e   : > { %s649_s4 = sshll.u32 %s1012_s29, 2 }
  0x1f   : > { %s900_s7 = scalar_lea.vmem %s992_s1, %s649_s4 }
  0x22   : > { %v827_v4 = vmov 0.0  }
  0x23   : > { %311 = vst [vmem:[#allocation2 + $0x10] sm:$0xff] %v827_v4 }
  0x24   : > { %312 = vst [vmem:[#allocation2] sm:$0xff] %v827_v4 }
  0x25   : > { %313 = vst [vmem:[#allocation2 + $0x18] sm:$0xff] %v827_v4 }
  0x26   : > { %314 = vst [vmem:[#allocation2 + $0x8] sm:$0xff] %v827_v4 }
  0x27 PF: > { %v709_v5 = vld [vmem:[%s900_s7 + $0x38] sm:$0xff]  ;;  %v708_v6 = vld [vmem:[%s900_s7 + $0x30] sm:$0xff]  ;;  %v707_v7 = vld [vmem:[%s900_s7 + $0x28] sm:$0xff]  ;;  %p691_p11 = scmp.ne.s32.totalorder %s817_s14, 2 }
  0x28   : > { %399 = vmatpush.bf16.msra.mxu0 %v709_v5  ;;  %721 = vmatpush.bf16.msra.mxu1 %v709_v5  ;;  %v706_v8 = vld [vmem:[%s900_s7 + $0x20] sm:$0xff]  ;;  %v705_v9 = vld [vmem:[%s900_s7 + $0x18] sm:$0xff]  ;;  %v704_v10 = vld [vmem:[%s900_s7 + $0x10] sm:$0xff] }
  0x29   : > { %v703_v11 = vld [vmem:[%s900_s7 + $0x8] sm:$0xff]  ;;  %v702_v12 = vld [vmem:[%s900_s7] sm:$0xff] }
  0x2a   : > { %v700_v13 = vld [vmem:[%s250_s8] sm:$0xff]  ;;  %v701_v14 = vld [vmem:[%s250_s8 + $0x8] sm:$0xff] }
  0x2b   : > { %v315_v15 = vld [vmem:[#allocation2 + $0x10] sm:$0xff]  ;;  %v316_v21 = vld [vmem:[#allocation2] sm:$0xff] }
  0x2c   : > { %400 = vmatpush.bf16.msra.mxu0 %v708_v6  ;;  %722 = vmatpush.bf16.msra.mxu1 %v708_v6  ;;  %v317_v16 = vld [vmem:[#allocation2 + $0x18] sm:$0xff] }
  0x2d   : > { %v318_v22 = vld [vmem:[#allocation2 + $0x8] sm:$0xff] }
  0x30   : > { %401 = vmatpush.bf16.msra.mxu0 %v707_v7  ;;  %723 = vmatpush.bf16.msra.mxu1 %v707_v7 }
  0x34   : > { %402 = vmatpush.bf16.msra.mxu0 %v706_v8  ;;  %724 = vmatpush.bf16.msra.mxu1 %v706_v8 }
  0x38   : > { %403 = vmatpush.bf16.msra.mxu0 %v705_v9  ;;  %725 = vmatpush.bf16.msra.mxu1 %v705_v9 }
  0x3c   : > { %404 = vmatpush.bf16.msra.mxu0 %v704_v10  ;;  %726 = vmatpush.bf16.msra.mxu1 %v704_v10 }
  0x40   : > { %405 = vmatpush.bf16.msra.mxu0 %v703_v11  ;;  %727 = vmatpush.bf16.msra.mxu1 %v703_v11 }
  0x44   : > { %406 = vmatpush.bf16.msra.mxu0 %v702_v12  ;;  %728 = vmatpush.bf16.msra.mxu1 %v702_v12 }
  0x47   : > { %407 = vmatmul.bf16.vlgmr.msra.gmra.mxu0 %v700_v13  ;;  %412 = vmatmul.bf16.vlgmr.msra.gmra.mxu1 %v701_v14 }
  0xc4   : > { %v408_v17 = vpop.f32.mrf.mxu0  ;;  %v413_v18 = vpop.f32.mrf.mxu1 }
  0xc5   : > { %v418_v19 = vadd.f32 %v408_v17, %v315_v15  ;;  %v420_v20 = vadd.f32 %v413_v18, %v317_v16 }
  0xc7   : > { %422 = vst [vmem:[#allocation2 + $0x10] sm:$0xff] %v418_v19 }
  0xc8   : > { %424 = vst [vmem:[#allocation2 + $0x18] sm:$0xff] %v420_v20 }
  0xcc   : > { %v410_v23 = vpop.f32.mrf.mxu0  ;;  %v415_v24 = vpop.f32.mrf.mxu1  ;;  %429 = sbr.rel (%p691_p11) target bundleno = 252 (0xfc), region = 81 }
  0xcd   : > { %v419_v25 = vadd.f32 %v410_v23, %v316_v21  ;;  %v421_v26 = vadd.f32 %v415_v24, %v318_v22 }
  0xcf   : > { %423 = vst [vmem:[#allocation2] sm:$0xff] %v419_v25 }
  0xd0   : > { %425 = vst [vmem:[#allocation2 + $0x8] sm:$0xff] %v421_v26 }
  0xd1   : > { %v430_v27 = vld [vmem:[#allocation2 + $0x10] sm:$0xff]  ;;  %v770_v29 = vld [vmem:[%s993_s2] ss:$0 sm:$0xff]  ;;  %v432_v30 = vld [vmem:[#allocation2 + $0x18] sm:$0xff] }
  0xd2   : > { %v920_v32 = vadd.f32 %v770_v29, %v430_v27  ;;  %v924_v34 = vadd.f32 %v770_v29, %v432_v30 }
  0xd4   : > { %v692_v36 = vmul.f32 -1.442695, %v920_v32  ;;  %v694_v38 = vmul.f32 -1.442695, %v924_v34 }
  0xd6   : > { %v431_v28 = vld [vmem:[#allocation2] sm:$0xff]  ;;  %771 = vpow2.f32 %v692_v36 }
  0xd7   : > { %v433_v31 = vld [vmem:[#allocation2 + $0x8] sm:$0xff]  ;;  %v922_v33 = vadd.f32 %v770_v29, %v431_v28 }
  0xd8   : > { %v926_v35 = vadd.f32 %v770_v29, %v433_v31 }
  0xd9   : > { %v693_v37 = vmul.f32 -1.442695, %v922_v33 }
  0xda   : > { %v695_v39 = vmul.f32 -1.442695, %v926_v35 }
  0xdb   : > { %773 = vpow2.f32 %v693_v37 }
  0xdc   : > { %775 = vpow2.f32 %v694_v38  ;;  %v772_v40 = vpop.eup %771 }
  0xdd   : > { %777 = vpow2.f32 %v695_v39  ;;  %v454_v42 = vadd.f32 1.0, %v772_v40 }
  0xdf   : > { %779 = vrcp.f32 %v454_v42  ;;  %v467_v48 = vand.u32 2147483647, %v454_v42  ;;  %v469_v49 = vand.u32 2147483648, %v454_v42  ;;  %vm463_vm0 = vweird.f32 %v454_v42 }
  0xe1   : > { %v774_v41 = vpop.eup %773  ;;  %vm932_vm3 = vcmp.eq.f32.partialorder %v467_v48, 8.507059e+37  ;;  %v470_v58 = vor.u32 1.1754944e-38, %v469_v49 }
  0xe2   : > { %v776_v43 = vpop.eup %775  ;;  %v455_v44 = vadd.f32 1.0, %v774_v41 }
  0xe3   : > { %v778_v45 = vpop.eup %777  ;;  %v456_v46 = vadd.f32 1.0, %v776_v43 }
  0xe4   : > { %781 = vrcp.f32 %v455_v44  ;;  %v457_v47 = vadd.f32 1.0, %v778_v45  ;;  %v482_v51 = vand.u32 2147483647, %v455_v44  ;;  %v484_v52 = vand.u32 2147483648, %v455_v44 }
  0xe5   : > { %783 = vrcp.f32 %v456_v46  ;;  %v780_v50 = vpop.eup %779  ;;  %vm478_vm1 = vweird.f32 %v455_v44  ;;  %vm493_vm6 = vweird.f32 %v456_v46  ;;  %v497_v2 = vand.u32 2147483647, %v456_v46 }
  0xe6   : > { %785 = vrcp.f32 %v457_v47  ;;  %v459_v54 = vmul.f32 %v780_v50, %v454_v42  ;;  %vm464_vm2 = vweird.f32 %v780_v50  ;;  %vm936_vm5 = vcmp.eq.f32.partialorder %v482_v51, 8.507059e+37 }
  0xe7   : > { %v485_v62 = vor.u32 1.1754944e-38, %v484_v52  ;;  %vm941_vm7 = vmor %vm463_vm0, %vm464_vm2  ;;  %v499_v5 = vand.u32 2147483648, %v456_v46  ;;  %vm508_vm8 = vweird.f32 %v457_v47  ;;  %v514_v10 = vand.u32 2147483648, %v457_v47 }
  0xe8   : > { %v460_v56 = vsub.f32 1.0, %v459_v54  ;;  %v512_v13 = vand.u32 2147483647, %v457_v47  ;;  %vm952_vm12 = vcmp.eq.f32.partialorder %v497_v2, 8.507059e+37 }
  0xe9   : > { %v500_v19 = vor.u32 1.1754944e-38, %v499_v5  ;;  %v515_v24 = vor.u32 1.1754944e-38, %v514_v10 }
  0xea   : > { %v782_v53 = vpop.eup %781  ;;  %v461_v0 = vmul.f32 %v780_v50, %v460_v56  ;;  %vm513_vm15 = vcmp.eq.f32.partialorder %v512_v13, 8.507059e+37 }
  0xeb   : > { %v474_v55 = vmul.f32 %v782_v53, %v455_v44  ;;  %v784_v59 = vpop.eup %783  ;;  %vm479_vm4 = vweird.f32 %v782_v53 }
  0xec   : > { %v786_v63 = vpop.eup %785  ;;  %v489_v1 = vmul.f32 %v784_v59, %v456_v46  ;;  %v462_v7 = vadd.f32 %v780_v50, %v461_v0  ;;  %vm946_vm9 = vmor %vm478_vm1, %vm479_vm4  ;;  %vm494_vm10 = vweird.f32 %v784_v59 }
  0xed   : > { %v475_v60 = vsub.f32 1.0, %v474_v55  ;;  %v504_v6 = vmul.f32 %v786_v63, %v457_v47  ;;  %vm509_vm11 = vweird.f32 %v786_v63  ;;  %vm495_vm13 = vmor %vm493_vm6, %vm494_vm10 }
  0xee   : > { %v490_v9 = vsub.f32 1.0, %v489_v1  ;;  %v466_v14 = vsel %vm941_vm7, %v780_v50, %v462_v7  ;;  %vm510_vm14 = vmor %vm508_vm8, %vm509_vm11 }
  0xef   : > { %v476_v4 = vmul.f32 %v782_v53, %v475_v60  ;;  %v505_v12 = vsub.f32 1.0, %v504_v6  ;;  %v471_v17 = vsel %vm932_vm3, %v470_v58, %v466_v14 }
  0xf0   : > { %v491_v15 = vmul.f32 %v784_v59, %v490_v9  ;;  %v518_v22 = vmul.f32 %v471_v17, %v920_v32 }
  0xf1   : > { %v477_v11 = vadd.f32 %v782_v53, %v476_v4  ;;  %v506_v20 = vmul.f32 %v786_v63, %v505_v12 }
  0xf2   : > { %v492_v23 = vadd.f32 %v784_v59, %v491_v15 }
  0xf3   : > { %v481_v18 = vsel %vm946_vm9, %v782_v53, %v477_v11  ;;  %v507_v26 = vadd.f32 %v786_v63, %v506_v20 }
  0xf4   : > { %v486_v21 = vsel %vm936_vm5, %v485_v62, %v481_v18  ;;  %v496_v27 = vsel %vm495_vm13, %v784_v59, %v492_v23 }
  0xf5   : > { %v519_v25 = vmul.f32 %v486_v21, %v922_v33  ;;  %v501_v29 = vsel %vm952_vm12, %v500_v19, %v496_v27  ;;  %v511_v30 = vsel %vm510_vm14, %v786_v63, %v507_v26 }
  0xf6   : > { %v516_v31 = vsel %vm513_vm15, %v515_v24, %v511_v30  ;;  %v520_v36 = vmul.f32 %v501_v29, %v924_v34 }
  0xf7   : > { %v713_v28 = vpack.c.bf16 %v519_v25, %v518_v22  ;;  %v521_v32 = vmul.f32 %v516_v31, %v926_v35 }
  0xf9   : > { %714 = vst [vmem:[%s994_s3] sm:$0xff] %v713_v28   ;;  %v718_v37 = vpack.c.bf16 %v521_v32, %v520_v36 }
  0xfb   : > { %720 = vst [vmem:[%s994_s3 + $0x8] sm:$0xff] %v718_v37  }
  0xfc PF: > { %s13_s16 = sadd.s32 1, %s825_s16   ;;  %s1005_s12 = smov %s813_s13 }
  0xfd   : > { %p10_p12 = scmp.ge.s32.totalorder %s13_s16, 5   ;;  %s1006_s13 = smov %s883_s20 }
  0xfe   : > { %s1007_s14 = smov %s821_s15  ;;  %s1008_s15 = smov %s1010_s17 }
  0xff   :  { %12 = sbr.rel (!%p10_p12) target bundleno = 3 (0x3), region = 122 }

// kernel: deyolov6_forward.16
= control target key start
LH: loop header
LB: loop body
LE: loop exit
PB: predicated region body
PF: predicated region fallthrough
CT: control target
= control target key end

     0   :  { %s606_s12 = smov 0   ;;  %s608_s13 = smov 0   ;;  %s652_s0 = inlined_call_operand.vmem [shape: bf16[8,640], index: 0, kind: input, shape index: {}]   ;;  %s653_s1 = inlined_call_operand.vmem [shape: bf16[640,128], index: 1, kind: input, shape index: {}]   ;;  %s654_s2 = inlined_call_operand.vmem [shape: f32[1,128], index: 2, kind: input, shape index: {}]   ;;  %s655_s3 = inlined_call_operand.vmem [shape: bf16[8,128], index: 3, kind: output, shape index: {}]  }
   0x1   :  { %s610_s14 = smov 0  }
   0x2 LB: > { %s25_s15 = sadd.s32 1, %s579_s13  ;;  %p481_p0 = scmp.ge.s32.totalorder %s583_s14, 1  ;;  %s583_s14 = sphi %s610_s14, %s13_s14   ;;  %s579_s13 = sphi %s608_s13, %s657_s13   ;;  %s575_s12 = sphi %s606_s12, %s656_s12  }
   0x3   : > { %p26_p1 = scmp.ge.s32.totalorder %s25_s15, 5  ;;  %p187_p2 = scmp.lt.s32.totalorder %s583_s14, 6 }
   0x5   : > { %s659_s15 = smov (%p26_p1, %s25_s15), 0  ;;  %p188_p3 = pnand %p481_p0, %p187_p2 }
   0x6   : > { %p229_p4 = scmp.lt.s32.totalorder (!%p188_p3), %s575_s12, 4  ;;  %s483_s16 = sshll.u32 (!%p188_p3), %s575_s12, 4 }
   0x7   : > { %191 = sbr.rel (%p188_p3) target bundleno = 223 (0xdf), region = 32  ;;  %p236_p5 = scmp.lt.s32.totalorder (!%p188_p3), %s483_s16, 79 }
   0x8   : > { %p485_p6 = scmp.ne.s32.totalorder (!%p188_p3), %s575_s12, 0 }
   0xc   : > { %s230_s17 = scalar_select %p229_p4, %s575_s12, 4 }
   0xd   : > { %s661_s16 = smov (!%p236_p5, %s483_s16), 79  ;;  %257 = sbr.rel (%p485_p6) target bundleno = 20 (0x14), region = 36 }
   0xe   : > { %s482_s18 = sshll.u32 %s230_s17, 2  ;;  %s484_s22 = sshll.u32 %s661_s16, 2 }
   0xf   : > { %s234_s21 = scalar_lea.vmem %s652_s0, %s482_s18  ;;  %s242_s25 = scalar_lea.vmem %s653_s1, %s484_s22 }
  0x12   : > { %v585_v0 = vmov 0.0  }
  0x13   : > { %258 = vst [vmem:[#allocation2] sm:$0xff] %v585_v0 }
  0x14 PF: > { %v530_v1 = vld [vmem:[%s242_s25 + $0x38] sm:$0xff]  ;;  %v529_v2 = vld [vmem:[%s242_s25 + $0x30] sm:$0xff]  ;;  %v528_v3 = vld [vmem:[%s242_s25 + $0x28] sm:$0xff]  ;;  %p518_p7 = scmp.ne.s32.totalorder %s575_s12, 4 }
  0x15   : > { %325 = vmatpush.bf16.msra.mxu0 %v530_v1  ;;  %v527_v4 = vld [vmem:[%s242_s25 + $0x20] sm:$0xff]  ;;  %v526_v5 = vld [vmem:[%s242_s25 + $0x18] sm:$0xff]  ;;  %v525_v6 = vld [vmem:[%s242_s25 + $0x10] sm:$0xff] }
  0x16   : > { %v524_v7 = vld [vmem:[%s242_s25 + $0x8] sm:$0xff]  ;;  %v523_v8 = vld [vmem:[%s242_s25] sm:$0xff] }
  0x17   : > { %v260_v9 = vld [vmem:[%s234_s21] sm:$0xf] }
  0x19   : > { %326 = vmatpush.bf16.msra.mxu0 %v529_v2 }
  0x1a   : > { %v259_v10 = vld [vmem:[#allocation2] sm:$0xff] }
  0x1d   : > { %327 = vmatpush.bf16.msra.mxu0 %v528_v3 }
  0x21   : > { %328 = vmatpush.bf16.msra.mxu0 %v527_v4 }
  0x25   : > { %329 = vmatpush.bf16.msra.mxu0 %v526_v5 }
  0x29   : > { %330 = vmatpush.bf16.msra.mxu0 %v525_v6 }
  0x2d   : > { %331 = vmatpush.bf16.msra.mxu0 %v524_v7 }
  0x31   : > { %332 = vmatpush.bf16.msra.mxu0 %v523_v8 }
  0x34   : > { %333 = vmatmul.bf16.vlgmr.msra.gmra.mxu0 %v260_v9 }
  0xb1   : > { %v334_v11 = vpop.f32.mrf.mxu0 }
  0xb2   : > { %v338_v12 = vadd.f32 %v334_v11, %v259_v10 }
  0xb4   : > { %339 = vst [vmem:[#allocation2] sm:$0xff] %v338_v12 }
  0xb5   : > { %343 = sbr.rel (%p518_p7) target bundleno = 223 (0xdf), region = 40 }
  0xb9   : > { %v336_v13 = vpop.f32.mrf.mxu0 }
  0xba   : > { %v556_v15 = vld [vmem:[%s654_s2] ss:$0 sm:$0xff] }
  0xbb   : > { %v344_v14 = vld [vmem:[#allocation2] sm:$0xff] }
  0xbc   : > { %v349_v16 = vadd.f32 %v556_v15, %v344_v14 }
  0xbe   : > { %v519_v17 = vmul.f32 -1.442695, %v349_v16 }
  0xc0   : > { %557 = vpow2.f32 %v519_v17 }
  0xc6   : > { %v558_v18 = vpop.eup %557 }
  0xc7   : > { %v353_v19 = vadd.f32 1.0, %v558_v18 }
  0xc9   : > { %559 = vrcp.f32 %v353_v19  ;;  %v365_v22 = vand.u32 2147483648, %v353_v19  ;;  %vm359_vm0 = vweird.f32 %v353_v19  ;;  %v363_v24 = vand.u32 2147483647, %v353_v19 }
  0xcb   : > { %v366_v26 = vor.u32 1.1754944e-38, %v365_v22  ;;  %vm364_vm3 = vcmp.eq.f32.partialorder %v363_v24, 8.507059e+37 }
  0xcf   : > { %v560_v20 = vpop.eup %559 }
  0xd0   : > { %v355_v21 = vmul.f32 %v560_v20, %v353_v19  ;;  %vm360_vm1 = vweird.f32 %v560_v20 }
  0xd1   : > { %vm361_vm2 = vmor %vm359_vm0, %vm360_vm1 }
  0xd2   : > { %v356_v23 = vsub.f32 1.0, %v355_v21 }
  0xd4   : > { %v357_v25 = vmul.f32 %v560_v20, %v356_v23 }
  0xd6   : > { %v358_v27 = vadd.f32 %v560_v20, %v357_v25 }
  0xd8   : > { %v362_v28 = vsel %vm361_vm2, %v560_v20, %v358_v27 }
  0xd9   : > { %v367_v29 = vsel %vm364_vm3, %v366_v26, %v362_v28 }
  0xda   : > { %v369_v30 = vmul.f32 %v367_v29, %v349_v16 }
  0xdc   : > { %v370_v31 = vpack.c.bf16 %v369_v30, %v369_v30 }
  0xde   : > { %371 = vst [vmem:[%s655_s3] sm:$0xf] %v370_v31 }
  0xdf PF: > { %s13_s14 = sadd.s32 1, %s583_s14   ;;  %s656_s12 = smov %s579_s13 }
  0xe0   : > { %p10_p8 = scmp.ge.s32.totalorder %s13_s14, 7   ;;  %s657_s13 = smov %s659_s15 }
  0xe2   :  { %12 = sbr.rel (!%p10_p8) target bundleno = 2 (0x2), region = 76 }

// kernel: deyolov6_forward.18
= control target key start
LH: loop header
LB: loop body
LE: loop exit
PB: predicated region body
PF: predicated region fallthrough
CT: control target
= control target key end

     0   :  { %vm73_vm0 = vcmask 523264   ;;  %s220_s1 = inlined_call_operand.vmem [shape: bf16[64,128], index: 1, kind: input, shape index: {}]   ;;  %s221_s2 = inlined_call_operand.vmem [shape: f32[1,128], index: 2, kind: input, shape index: {}]   ;;  %s222_s0 = inlined_call_operand.vmem [shape: bf16[32,64], index: 0, kind: input, shape index: {}]   ;;  %s223_s3 = inlined_call_operand.vmem [shape: f32[32,128], index: 3, kind: output, shape index: {}]  }
   0x1   :  { %v161_v0 = vld [vmem:[%s220_s1 + $0x18] sm:$0xff]  ;;  %v160_v1 = vld [vmem:[%s220_s1 + $0x10] sm:$0xff]  ;;  %v159_v2 = vld [vmem:[%s220_s1 + $0x8] sm:$0xff] }
   0x2   :  { %84 = vmatpush.bf16.msra.mxu0 %v161_v0  ;;  %162 = vmatpush.bf16.msra.mxu1 %v161_v0  ;;  %v158_v3 = vld [vmem:[%s220_s1] sm:$0xff]  ;;  %v157_v5 = vld [vmem:[%s222_s0 + $0x8] sm:$0xff] }
   0x3   :  { %v156_v4 = vld [vmem:[%s222_s0] sm:$0xff] }
   0x4   :  { %v166_v6 = vld [vmem:[%s221_s2] ss:$0 sm:$0xff] }
   0x6   :  { %85 = vmatpush.bf16.msra.mxu0 %v160_v1  ;;  %163 = vmatpush.bf16.msra.mxu1 %v160_v1 }
   0xa   :  { %86 = vmatpush.bf16.msra.mxu0 %v159_v2  ;;  %164 = vmatpush.bf16.msra.mxu1 %v159_v2 }
   0xe   :  { %87 = vmatpush.bf16.msra.mxu0 %v158_v3  ;;  %165 = vmatpush.bf16.msra.mxu1 %v158_v3 }
  0x11   :  { %154 = vmatmul.msk.bf16.vlgmr.msra.gmra.mxu0 %vm73_vm0, %v156_v4  ;;  %155 = vmatmul.msk.bf16.vlgmr.msra.gmra.mxu1 %vm73_vm0, %v157_v5 }
  0x8e   :  { %v89_v7 = vpop.f32.mrf.mxu0  ;;  %v94_v8 = vpop.f32.mrf.mxu1 }
  0x8f   :  { %v118_v9 = vadd.f32 %v166_v6, %v89_v7  ;;  %v120_v10 = vadd.f32 %v166_v6, %v94_v8 }
  0x91   :  { %122 = vst [vmem:[%s223_s3] sm:$0xff] %v118_v9 }
  0x92   :  { %124 = vst [vmem:[%s223_s3 + $0x10] sm:$0xff] %v120_v10 }
  0x96   :  { %v91_v11 = vpop.f32.mrf.mxu0  ;;  %v96_v12 = vpop.f32.mrf.mxu1 }
  0x97   :  { %v119_v13 = vadd.f32 %v166_v6, %v91_v11  ;;  %v121_v14 = vadd.f32 %v166_v6, %v96_v12 }
  0x99   :  { %123 = vst [vmem:[%s223_s3 + $0x8] sm:$0xff] %v119_v13 }
  0x9a   :  { %125 = vst [vmem:[%s223_s3 + $0x18] sm:$0xff] %v121_v14 }

// kernel: deyolov6_forward.19
= control target key start
LH: loop header
LB: loop body
LE: loop exit
PB: predicated region body
PF: predicated region fallthrough
CT: control target
= control target key end

     0   :  { %s208_s1 = inlined_call_operand.vmem [shape: bf16[128,128], index: 1, kind: input, shape index: {}]   ;;  %s209_s2 = inlined_call_operand.vmem [shape: f32[1,128], index: 2, kind: input, shape index: {}]   ;;  %s210_s0 = inlined_call_operand.vmem [shape: bf16[8,128], index: 0, kind: input, shape index: {}]   ;;  %s211_s3 = inlined_call_operand.vmem [shape: f32[8,128], index: 3, kind: output, shape index: {}]  }
   0x1   :  { %v153_v0 = vld [vmem:[%s208_s1 + $0x38] sm:$0xff]  ;;  %v152_v1 = vld [vmem:[%s208_s1 + $0x30] sm:$0xff]  ;;  %v151_v2 = vld [vmem:[%s208_s1 + $0x28] sm:$0xff] }
   0x2   :  { %85 = vmatpush.bf16.msra.mxu0 %v153_v0  ;;  %v150_v3 = vld [vmem:[%s208_s1 + $0x20] sm:$0xff]  ;;  %v149_v4 = vld [vmem:[%s208_s1 + $0x18] sm:$0xff]  ;;  %v148_v5 = vld [vmem:[%s208_s1 + $0x10] sm:$0xff] }
   0x3   :  { %v147_v6 = vld [vmem:[%s208_s1 + $0x8] sm:$0xff]  ;;  %v146_v7 = vld [vmem:[%s208_s1] sm:$0xff] }
   0x4   :  { %v20_v8 = vld [vmem:[%s210_s0] sm:$0xf] }
   0x5   :  { %v154_v9 = vld [vmem:[%s209_s2] ss:$0 sm:$0xff] }
   0x6   :  { %86 = vmatpush.bf16.msra.mxu0 %v152_v1 }
   0xa   :  { %87 = vmatpush.bf16.msra.mxu0 %v151_v2 }
   0xe   :  { %88 = vmatpush.bf16.msra.mxu0 %v150_v3 }
  0x12   :  { %89 = vmatpush.bf16.msra.mxu0 %v149_v4 }
  0x16   :  { %90 = vmatpush.bf16.msra.mxu0 %v148_v5 }
  0x1a   :  { %91 = vmatpush.bf16.msra.mxu0 %v147_v6 }
  0x1e   :  { %92 = vmatpush.bf16.msra.mxu0 %v146_v7 }
  0x21   :  { %93 = vmatmul.bf16.vlgmr.msra.gmra.mxu0 %v20_v8 }
  0x9e   :  { %v94_v10 = vpop.f32.mrf.mxu0 }
  0x9f   :  { %v108_v11 = vadd.f32 %v154_v9, %v94_v10 }
  0xa1   :  { %109 = vst [vmem:[%s211_s3] sm:$0xff] %v108_v11 }
  0xa6   :  { %v96_v12 = vpop.f32.mrf.mxu0 }

// kernel: deyolov6_forward.17
= control target key start
LH: loop header
LB: loop body
LE: loop exit
PB: predicated region body
PF: predicated region fallthrough
CT: control target
= control target key end

     0   :  { %vm123_vm0 = vcmask 261120   ;;  %s462_s1 = inlined_call_operand.vmem [shape: bf16[32,128], index: 1, kind: input, shape index: {}]   ;;  %s463_s0 = inlined_call_operand.vmem [shape: bf16[128,32], index: 0, kind: input, shape index: {}]   ;;  %s464_s2 = inlined_call_operand.vmem [shape: f32[1,128], index: 2, kind: input, shape index: {}]   ;;  %s465_s3 = inlined_call_operand.vmem [shape: f32[128,128], index: 3, kind: output, shape index: {}]  }
   0x1   :  { %v345_v0 = vld [vmem:[%s462_s1 + $0x8] sm:$0xff]  ;;  %v344_v1 = vld [vmem:[%s462_s1] sm:$0xff]  ;;  %v338_v3 = vld [vmem:[%s463_s0 + $0x10] sm:$0xff] }
   0x2   :  { %154 = vmatpush.bf16.msra.mxu0 %v345_v0  ;;  %346 = vmatpush.bf16.msra.mxu1 %v345_v0  ;;  %v336_v2 = vld [vmem:[%s463_s0] sm:$0xff]  ;;  %v342_v5 = vld [vmem:[%s463_s0 + $0x30] sm:$0xff]  ;;  %v337_v6 = vld [vmem:[%s463_s0 + $0x8] sm:$0xff] }
   0x3   :  { %347 = vmatpush.bf16.msra.mxu2 %v345_v0  ;;  %348 = vmatpush.bf16.msra.mxu3 %v345_v0  ;;  %v340_v4 = vld [vmem:[%s463_s0 + $0x20] sm:$0xff]  ;;  %v339_v7 = vld [vmem:[%s463_s0 + $0x18] sm:$0xff]  ;;  %v341_v8 = vld [vmem:[%s463_s0 + $0x28] sm:$0xff] }
   0x4   :  { %v343_v9 = vld [vmem:[%s463_s0 + $0x38] sm:$0xff]  ;;  %v352_v10 = vld [vmem:[%s464_s2] ss:$0 sm:$0xff] }
   0x6   :  { %155 = vmatpush.bf16.msra.mxu0 %v344_v1  ;;  %349 = vmatpush.bf16.msra.mxu1 %v344_v1 }
   0x7   :  { %350 = vmatpush.bf16.msra.mxu2 %v344_v1  ;;  %351 = vmatpush.bf16.msra.mxu3 %v344_v1 }
   0x9   :  { %328 = vmatmul.msk.bf16.vlgmr.msra.gmra.mxu0 %vm123_vm0, %v336_v2  ;;  %330 = vmatmul.msk.bf16.vlgmr.msra.gmra.mxu1 %vm123_vm0, %v338_v3 }
   0xa   :  { %332 = vmatmul.msk.bf16.vlgmr.msra.gmra.mxu2 %vm123_vm0, %v340_v4  ;;  %334 = vmatmul.msk.bf16.vlgmr.msra.gmra.mxu3 %vm123_vm0, %v342_v5 }
  0x19   :  { %329 = vmatmul.msk.bf16.gmra.mxu0 %vm123_vm0, %v337_v6  ;;  %331 = vmatmul.msk.bf16.gmra.mxu1 %vm123_vm0, %v339_v7 }
  0x1a   :  { %333 = vmatmul.msk.bf16.gmra.mxu2 %vm123_vm0, %v341_v8  ;;  %335 = vmatmul.msk.bf16.gmra.mxu3 %vm123_vm0, %v343_v9 }
  0x86   :  { %v157_v11 = vpop.f32.mrf.mxu0  ;;  %v167_v12 = vpop.f32.mrf.mxu1 }
  0x87   :  { %v252_v13 = vadd.f32 %v352_v10, %v157_v11  ;;  %v256_v14 = vadd.f32 %v352_v10, %v167_v12 }
  0x89   :  { %268 = vst [vmem:[%s465_s3] sm:$0xff] %v252_v13 }
  0x8a   :  { %272 = vst [vmem:[%s465_s3 + $0x20] sm:$0xff] %v256_v14 }
  0x8d   :  { %v177_v15 = vpop.f32.mrf.mxu2  ;;  %v187_v16 = vpop.f32.mrf.mxu3 }
  0x8e   :  { %v260_v17 = vadd.f32 %v352_v10, %v177_v15  ;;  %v264_v18 = vadd.f32 %v352_v10, %v187_v16  ;;  %v159_v19 = vpop.f32.mrf.mxu0  ;;  %v169_v20 = vpop.f32.mrf.mxu1 }
  0x8f   :  { %v253_v21 = vadd.f32 %v352_v10, %v159_v19  ;;  %v257_v22 = vadd.f32 %v352_v10, %v169_v20 }
  0x90   :  { %276 = vst [vmem:[%s465_s3 + $0x40] sm:$0xff] %v260_v17 }
  0x91   :  { %280 = vst [vmem:[%s465_s3 + $0x60] sm:$0xff] %v264_v18 }
  0x92   :  { %269 = vst [vmem:[%s465_s3 + $0x8] sm:$0xff] %v253_v21 }
  0x93   :  { %273 = vst [vmem:[%s465_s3 + $0x28] sm:$0xff] %v257_v22 }
  0x95   :  { %v179_v23 = vpop.f32.mrf.mxu2  ;;  %v189_v24 = vpop.f32.mrf.mxu3 }
  0x96   :  { %v261_v25 = vadd.f32 %v352_v10, %v179_v23  ;;  %v265_v26 = vadd.f32 %v352_v10, %v189_v24  ;;  %v162_v27 = vpop.f32.mrf.mxu0  ;;  %v172_v28 = vpop.f32.mrf.mxu1 }
  0x97   :  { %v254_v29 = vadd.f32 %v352_v10, %v162_v27  ;;  %v258_v30 = vadd.f32 %v352_v10, %v172_v28 }
  0x98   :  { %277 = vst [vmem:[%s465_s3 + $0x48] sm:$0xff] %v261_v25 }
  0x99   :  { %281 = vst [vmem:[%s465_s3 + $0x68] sm:$0xff] %v265_v26 }
  0x9a   :  { %270 = vst [vmem:[%s465_s3 + $0x10] sm:$0xff] %v254_v29 }
  0x9b   :  { %274 = vst [vmem:[%s465_s3 + $0x30] sm:$0xff] %v258_v30 }
  0x9d   :  { %v182_v31 = vpop.f32.mrf.mxu2  ;;  %v192_v32 = vpop.f32.mrf.mxu3 }
  0x9e   :  { %v262_v33 = vadd.f32 %v352_v10, %v182_v31  ;;  %v266_v34 = vadd.f32 %v352_v10, %v192_v32  ;;  %v164_v35 = vpop.f32.mrf.mxu0  ;;  %v174_v36 = vpop.f32.mrf.mxu1 }
  0x9f   :  { %v255_v37 = vadd.f32 %v352_v10, %v164_v35  ;;  %v259_v38 = vadd.f32 %v352_v10, %v174_v36 }
  0xa0   :  { %278 = vst [vmem:[%s465_s3 + $0x50] sm:$0xff] %v262_v33 }
  0xa1   :  { %282 = vst [vmem:[%s465_s3 + $0x70] sm:$0xff] %v266_v34 }
  0xa2   :  { %271 = vst [vmem:[%s465_s3 + $0x18] sm:$0xff] %v255_v37 }
  0xa3   :  { %275 = vst [vmem:[%s465_s3 + $0x38] sm:$0xff] %v259_v38 }
  0xa5   :  { %v184_v39 = vpop.f32.mrf.mxu2  ;;  %v194_v40 = vpop.f32.mrf.mxu3 }
  0xa6   :  { %v263_v41 = vadd.f32 %v352_v10, %v184_v39  ;;  %v267_v42 = vadd.f32 %v352_v10, %v194_v40 }
  0xa8   :  { %279 = vst [vmem:[%s465_s3 + $0x58] sm:$0xff] %v263_v41 }
  0xa9   :  { %283 = vst [vmem:[%s465_s3 + $0x78] sm:$0xff] %v267_v42 }

</bundles_post_ra>
